<compile_context>
chip_gen: v7x
topology: tpu7x:2x2x1
jax: 0.10.0
libtpu: 0.0.40
codegen_flags: <defaults>
</compile_context>

<pallas_src>
import functools
import math

import jax
import jax.numpy as jnp
from jax.experimental import pallas as pl
from jax.experimental.pallas import tpu as pltpu

F32 = jnp.float32
BF16 = jnp.bfloat16
LN_EPS_DEFAULT = 1e-5    # nn.LayerNorm default (the `layer_norm` helper)
LN_EPS_BERT = 1e-12      # config.layer_norm_eps (bert-base-uncased)
ATTN_HEAD = 64           # attention_head_size in TransformerBlock


@functools.lru_cache(maxsize=None)
def _vmem_limit_bytes():
    """Per-generation scoped-VMEM cap (v7x: 64 MiB physical; v5e/v6e: 128 MiB)."""
    try:
        kind = jax.devices()[0].device_kind.lower()
    except Exception:
        return 32 * 1024 * 1024
    if "v7" in kind:
        return 48 * 1024 * 1024
    if "v5" in kind or "v6" in kind:
        return 96 * 1024 * 1024
    return 32 * 1024 * 1024


def _pick_batch_block(n, seq, target_rows=256, max_rows=1024):
    """Largest divisor of n with b*seq <= max_rows, stopping once b*seq hits the
    MXU M-dimension target."""
    best = 1
    for b in range(1, n + 1):
        if n % b == 0 and b * seq <= max_rows:
            best = b
            if b * seq >= target_rows:
                break
    return best


def _silu_f32(x):
    # SiLU; the sigmoid divide rides the (otherwise idle) EUP reciprocal slot.
    return x * pl.reciprocal(1.0 + jnp.exp(-x), approx=True)


def _layernorm(x, g, b, eps):
    mu = jnp.mean(x, axis=-1, keepdims=True)
    var = jnp.mean((x - mu) ** 2, axis=-1, keepdims=True)
    return (x - mu) * jax.lax.rsqrt(var + eps) * g + b


# ---------------------------------------------------------------------------
# Fused kernel (one batch-block per grid step):
#   [optional emb_layers: SiLU -> Linear -> broadcast add]
#   -> LayerNorm -> SiLU
#   -> BertAttention (fused QKV matmul, per-(batch,head) softmax with query
#      tiling, single Call-deep output projection, residual (+ optional learned
#      projection), LayerNorm)
#   -> [optional fused skip add]
# ---------------------------------------------------------------------------
def _make_attn_kernel(n_heads, head_size, batch, seq, has_emb, has_skip,
                      has_res_proj, q_block):
    call = n_heads * head_size
    rows = batch * seq

    def kernel(*refs):
        ctx_sc = refs[-1]          # VMEM scratch [rows, call] bf16
        o_ref = refs[-2]
        it = iter(refs[:-2])

        x = next(it)[...].astype(F32)                          # [B, L, Cin]

        if has_emb:
            emb_ref, ew_ref, eb_ref = next(it), next(it), next(it)
            e = emb_ref[...].reshape(batch, -1).astype(F32)    # [B, Demb]
            e = _silu_f32(e)
            ew = ew_ref[...]                                   # [Demb, Call] bf16
            e = jnp.dot(e.astype(ew.dtype), ew,
                        preferred_element_type=F32) + eb_ref[...]
            x = x + e.reshape(batch, 1, call)                  # broadcast over L

        g1, b1 = next(it)[...], next(it)[...]
        x = _silu_f32(_layernorm(x, g1, b1, LN_EPS_DEFAULT))   # pre-LN + SiLU (f32)

        wqkv = next(it)[...]        # [Cin, 3*Call]  bf16 (Q cols pre-scaled)
        bqkv = next(it)[...]        # [1, 3*Call]    f32
        wo = next(it)[...]          # [Call, Call]   bf16
        bo = next(it)[...]          # [1, Call]      f32
        lp = wqkv.dtype

        x2 = x.reshape(rows, x.shape[-1])                      # [B*L, Cin] f32
        x2_lp = x2.astype(lp)

        # Fused Q|K|V projection over all batch-block rows (one wide MXU pass).
        qkv = jnp.dot(x2_lp, wqkv, preferred_element_type=F32) + bqkv
        qkv_lp = qkv.astype(lp)                                # single full-tile cast

        # Per-(batch, head) attention with query-block tiling; contexts are
        # written into lane slices of one scratch buffer so the output
        # projection is a single Call-deep matmul afterwards.
        for b in range(batch):
            r0 = b * seq
            for h in range(n_heads):
                lo = h * head_size
                kh = qkv_lp[r0:r0 + seq, call + lo:call + lo + head_size]
                vh = qkv_lp[r0:r0 + seq, 2 * call + lo:2 * call + lo + head_size]
                for q0 in range(0, seq, q_block):
                    qc = min(q_block, seq - q0)
                    qh = qkv_lp[r0 + q0:r0 + q0 + qc, lo:lo + head_size]
                    # q @ k^T via dimension numbers (no explicit transpose);
                    # softmax scale already folded into the Q weights.
                    s = jax.lax.dot_general(qh, kh, (((1,), (1,)), ((), ())),
                                            preferred_element_type=F32)
                    s = s - jnp.max(s, axis=-1, keepdims=True)
                    p = jnp.exp(s)
                    # Exact reciprocal over a [qc, 1] column (cheap, accurate).
                    p = p * (1.0 / jnp.sum(p, axis=-1, keepdims=True))
                    ctx = jnp.dot(p.astype(lp), vh, preferred_element_type=F32)
                    ctx_sc[r0 + q0:r0 + q0 + qc, lo:lo + head_size] = ctx.astype(lp)

        # Single output projection: [B*L, Call] @ [Call, Call].
        attn = jnp.dot(ctx_sc[...], wo, preferred_element_type=F32) + bo

        if has_res_proj:
            # TODO(synk): BertAttention source not provided; when the input dim
            # differs from num_heads*head_size the BertSelfOutput residual is
            # modeled as a learned linear projection of the attention input.
            wr, br = next(it)[...], next(it)[...]
            res = jnp.dot(x2_lp, wr, preferred_element_type=F32) + br
        else:
            res = x2

        g2, b2 = next(it)[...], next(it)[...]
        y = _layernorm(attn + res, g2, b2, LN_EPS_BERT)

        if has_skip:
            y = y + next(it)[...].reshape(rows, call).astype(F32)

        o_ref[...] = y.reshape(batch, seq, call).astype(o_ref.dtype)

    return kernel


def attention_block(x, p, *, emb=None, emb_w=None, emb_b=None, skip=None,
                    out_dtype=BF16):
    """Fused (emb-add +) LN + SiLU + BertAttention (+ skip add).

    x: [N, L, Cin] -> [N, L, n_heads*head_size]
    """
    N, L, Cin = x.shape
    n_heads, head_size = p['n_heads'], p['head_size']
    call = n_heads * head_size
    has_emb = emb is not None
    has_skip = skip is not None
    has_res_proj = 'wr' in p
    if has_emb:
        assert Cin == call, "emb add requires Cin == n_heads*head_size"

    B = _pick_batch_block(N, L)
    q_block = min(L, 256)

    def full2d(a):
        return pl.BlockSpec(a.shape, lambda i: (0, 0))   # params are all 2-D

    operands = [x]
    specs = [pl.BlockSpec((B, L, Cin), lambda i: (i, 0, 0))]

    if has_emb:
        demb = emb.shape[-1]
        operands.append(emb.reshape(N, 1, demb))
        specs.append(pl.BlockSpec((B, 1, demb), lambda i: (i, 0, 0)))
        operands += [emb_w, emb_b]
        specs += [full2d(emb_w), full2d(emb_b)]

    params = [p['pre_g'], p['pre_b'], p['wqkv'], p['bqkv'], p['wo'], p['bo']]
    if has_res_proj:
        params += [p['wr'], p['br']]
    params += [p['ln_g'], p['ln_b']]
    for a in params:
        operands.append(a)
        specs.append(full2d(a))

    if has_skip:
        operands.append(skip)
        specs.append(pl.BlockSpec((B, L, call), lambda i: (i, 0, 0)))

    kernel = _make_attn_kernel(n_heads, head_size, B, L, has_emb, has_skip,
                               has_res_proj, q_block)
    return pl.pallas_call(
        kernel,
        out_shape=jax.ShapeDtypeStruct((N, L, call), out_dtype),
        grid=(N // B,),
        in_specs=specs,
        out_specs=pl.BlockSpec((B, L, call), lambda i: (i, 0, 0)),
        scratch_shapes=[pltpu.VMEM((B * L, call), BF16)],
        compiler_params=pltpu.CompilerParams(
            dimension_semantics=("parallel",),
            vmem_limit_bytes=_vmem_limit_bytes()),
    )(*operands)


# ---------------------------------------------------------------------------
# Skip connection kernel: Linear(Cin, Cout) + LayerNorm(Cout, eps=1e-12),
# rows flattened to [B*L, Cin] for MXU utilization.
# ---------------------------------------------------------------------------
def linear_layernorm(x, w, b, g, beta, *, out_dtype=BF16):
    N, L, Cin = x.shape
    Cout = w.shape[1]
    B = _pick_batch_block(N, L)

    def kernel(x_ref, w_ref, b_ref, g_ref, be_ref, o_ref):
        wv = w_ref[...]
        xf = x_ref[...].reshape(B * L, Cin).astype(wv.dtype)
        y = jnp.dot(xf, wv, preferred_element_type=F32) + b_ref[...]
        y = _layernorm(y, g_ref[...], be_ref[...], LN_EPS_BERT)
        o_ref[...] = y.reshape(B, L, Cout).astype(o_ref.dtype)

    return pl.pallas_call(
        kernel,
        out_shape=jax.ShapeDtypeStruct((N, L, Cout), out_dtype),
        grid=(N // B,),
        in_specs=[pl.BlockSpec((B, L, Cin), lambda i: (i, 0, 0)),
                  pl.BlockSpec((Cin, Cout), lambda i: (0, 0)),
                  pl.BlockSpec((1, Cout), lambda i: (0, 0)),
                  pl.BlockSpec((1, Cout), lambda i: (0, 0)),
                  pl.BlockSpec((1, Cout), lambda i: (0, 0))],
        out_specs=pl.BlockSpec((B, L, Cout), lambda i: (i, 0, 0)),
        compiler_params=pltpu.CompilerParams(
            dimension_semantics=("parallel",),
            vmem_limit_bytes=_vmem_limit_bytes()),
    )(x, w, b, g, beta)


# ---------------------------------------------------------------------------
# Parameter initialization (deterministic, synthetic). Matmul weights in bf16.
# ---------------------------------------------------------------------------
class ParamGen:
    def __init__(self, key, scale=0.02):
        self.key = key
        self.scale = scale
        self.count = 0

    def _next(self):
        self.count += 1
        return jax.random.fold_in(self.key, self.count)

    def w_f32(self, *shape):
        return self.scale * jax.random.normal(self._next(), shape, dtype=F32)

    def w(self, *shape):
        return self.w_f32(*shape).astype(BF16)

    def b(self, *shape):        # small random bias (f32)
        return self.w_f32(*shape)

    def g(self, *shape):        # LN scale near 1 (f32)
        return 1.0 + self.w_f32(*shape)


def init_attn(pg, cin, n_heads, head_size):
    call = n_heads * head_size
    q_scale = 1.0 / math.sqrt(head_size)
    # Fold the softmax 1/sqrt(head_size) into the Q columns of the fused QKV weight.
    wq = pg.w_f32(cin, call) * q_scale
    wk = pg.w_f32(cin, call)
    wv = pg.w_f32(cin, call)
    p = dict(n_heads=n_heads, head_size=head_size,
             wqkv=jnp.concatenate([wq, wk, wv], axis=1).astype(BF16),
             bqkv=pg.b(1, 3 * call),
             wo=pg.w(call, call), bo=pg.b(1, call),
             pre_g=pg.g(1, cin), pre_b=pg.b(1, cin),
             ln_g=pg.g(1, call), ln_b=pg.b(1, call))
    if cin != call:
        p['wr'] = pg.w(cin, call)
        p['br'] = pg.b(1, call)
    return p


def init_transformer_block(pg, channels, emb_channels, out_channels):
    assert out_channels % ATTN_HEAD == 0
    n_heads = out_channels // ATTN_HEAD
    p = dict(
        in_attn=init_attn(pg, channels, n_heads, ATTN_HEAD),
        emb_w=pg.w(emb_channels, out_channels), emb_b=pg.b(1, out_channels),
        out_attn=init_attn(pg, out_channels, n_heads, ATTN_HEAD),
    )
    if out_channels != channels:
        p['skip_w'] = pg.w(channels, out_channels)
        p['skip_b'] = pg.b(1, out_channels)
        p['skip_g'] = pg.g(1, out_channels)
        p['skip_beta'] = pg.b(1, out_channels)
    return p


def transformer_block(x, emb, p, *, out_dtype=F32):
    """TransformerBlock._forward (use_scale_shift_norm=False, eval / dropout off).

    x: [N, L, channels], emb: [N, emb_channels] -> [N, L, out_channels]
    """
    # TODO(synk): use_scale_shift_norm=True branch not implemented (module default False).
    h = attention_block(x, p['in_attn'], out_dtype=BF16)              # in_layers
    if 'skip_w' in p:
        skip = linear_layernorm(x, p['skip_w'], p['skip_b'],
                                p['skip_g'], p['skip_beta'],
                                out_dtype=BF16)                        # Linear+LN skip
    else:
        skip = x                                                       # Identity skip
    # out_layers(h + emb_layers(emb)) with the emb SiLU+Linear and the final
    # skip-add fused into the attention kernel epilogue.
    return attention_block(h, p['out_attn'], emb=emb, emb_w=p['emb_w'],
                           emb_b=p['emb_b'], skip=skip, out_dtype=out_dtype)


# ---------------------------------------------------------------------------
# Pure-JAX f32 reference (same bf16 weights cast to f32) for tolerance check.
# ---------------------------------------------------------------------------
def _ref_ln(x, g, b, eps):
    mu = x.mean(-1, keepdims=True)
    var = ((x - mu) ** 2).mean(-1, keepdims=True)
    return (x - mu) / jnp.sqrt(var + eps) * g + b


def _ref_attn(x, p, emb_out=None):
    n_heads, hd = p['n_heads'], p['head_size']
    call = n_heads * hd
    x = x.astype(F32)
    if emb_out is not None:
        x = x + emb_out[:, None, :]
    x = _ref_ln(x, p['pre_g'], p['pre_b'], LN_EPS_DEFAULT)
    x = x * jax.nn.sigmoid(x)
    qkv = x @ p['wqkv'].astype(F32) + p['bqkv']
    q, k, v = jnp.split(qkv, 3, axis=-1)
    N, L, _ = x.shape
    q = q.reshape(N, L, n_heads, hd)
    k = k.reshape(N, L, n_heads, hd)
    v = v.reshape(N, L, n_heads, hd)
    s = jnp.einsum('nqhd,nkhd->nhqk', q, k)   # scale already folded into wqkv
    pr = jax.nn.softmax(s, axis=-1)
    ctx = jnp.einsum('nhqk,nkhd->nqhd', pr, v).reshape(N, L, call)
    attn = ctx @ p['wo'].astype(F32) + p['bo']
    res = (x @ p['wr'].astype(F32) + p['br']) if 'wr' in p else x
    return _ref_ln(attn + res, p['ln_g'], p['ln_b'], LN_EPS_BERT)


def _ref_block(x, emb, p):
    h = _ref_attn(x, p['in_attn'])
    eo = jax.nn.silu(emb.astype(F32)) @ p['emb_w'].astype(F32) + p['emb_b']
    if 'skip_w' in p:
        skip = _ref_ln(x.astype(F32) @ p['skip_w'].astype(F32) + p['skip_b'],
                       p['skip_g'], p['skip_beta'], LN_EPS_BERT)
    else:
        skip = x.astype(F32)
    return skip + _ref_attn(h, p['out_attn'], eo)


if __name__ == "__main__":
    key = jax.random.PRNGKey(0)

    # Small shapes consistent with the module: out_channels must be a multiple
    # of attention_head_size=64.
    N, L = 2, 16
    channels, emb_channels, out_channels = 64, 256, 128

    pg = ParamGen(jax.random.fold_in(key, 1))
    # Block 1 changes channel count -> exercises the Linear+LayerNorm skip and
    # the learned residual projection inside BertAttention.
    blk1 = init_transformer_block(pg, channels, emb_channels, out_channels)
    # Block 2 keeps channels -> exercises the Identity skip path.
    blk2 = init_transformer_block(pg, out_channels, emb_channels, out_channels)

    x = jax.random.normal(jax.random.fold_in(key, 2), (N, L, channels), dtype=F32)
    emb = jax.random.normal(jax.random.fold_in(key, 3), (N, emb_channels), dtype=F32)

    def forward(xx, ee):
        h = transformer_block(xx, ee, blk1, out_dtype=BF16)   # bf16 inter-block activations
        return transformer_block(h, ee, blk2, out_dtype=F32)

    fwd = jax.jit(forward)
    out = jax.block_until_ready(fwd(x, emb))

    ref = _ref_block(_ref_block(x, emb, blk1), emb, blk2)
    err = float(jnp.max(jnp.abs(out.astype(F32) - ref)))

    assert out.shape == (N, L, out_channels), out.shape
    assert bool(jnp.all(jnp.isfinite(out)))
    # bf16 weights + bf16 inter-kernel activations + approx SiLU reciprocal vs f32 reference.
    assert err < 0.1, f"max abs error vs f32 reference: {err}"
    print("KERNEL_OK")
</pallas_src>

<mosaic_0001>
module attributes {stable_mosaic.version = 11 : i64} {
  func.func @kernel(%arg0: i32, %arg1: memref<2x16x64xf32, #tpu.memory_space<vmem>>, %arg2: memref<64x128xbf16, #tpu.memory_space<vmem>>, %arg3: memref<1x128xf32, #tpu.memory_space<vmem>>, %arg4: memref<1x128xf32, #tpu.memory_space<vmem>>, %arg5: memref<1x128xf32, #tpu.memory_space<vmem>>, %arg6: memref<2x16x128xbf16, #tpu.memory_space<vmem>>) attributes {dimension_semantics = [#tpu.dimension_semantics<parallel>], iteration_bounds = array<i64: 1>, scalar_prefetch = 0 : i64, scratch_operands = 0 : i64, tpu.core_type = #tpu.core_type<tc>, window_params = [{transform_indices = @transform_0, window_bounds = array<i64: 2, 16, 64>}, {pipeline_mode = #tpu.pipeline_mode<synchronous>, transform_indices = @transform_1, window_bounds = array<i64: 64, 128>}, {pipeline_mode = #tpu.pipeline_mode<synchronous>, transform_indices = @transform_2, window_bounds = array<i64: 1, 128>}, {pipeline_mode = #tpu.pipeline_mode<synchronous>, transform_indices = @transform_3, window_bounds = array<i64: 1, 128>}, {pipeline_mode = #tpu.pipeline_mode<synchronous>, transform_indices = @transform_4, window_bounds = array<i64: 1, 128>}, {transform_indices = @transform_5, window_bounds = array<i64: 2, 16, 128>}]} {
    %c0 = arith.constant 0 : index
    %c0_0 = arith.constant 0 : index
    %0 = vector.load %arg2[%c0, %c0_0] : memref<64x128xbf16, #tpu.memory_space<vmem>>, vector<64x128xbf16>
    %c0_1 = arith.constant 0 : index
    %c0_2 = arith.constant 0 : index
    %c0_3 = arith.constant 0 : index
    %1 = vector.load %arg1[%c0_1, %c0_2, %c0_3] : memref<2x16x64xf32, #tpu.memory_space<vmem>>, vector<2x16x64xf32>
    %2 = vector.shape_cast %1 : vector<2x16x64xf32> to vector<32x64xf32>
    %3 = arith.truncf %2 : vector<32x64xf32> to vector<32x64xbf16>
    %cst = arith.constant dense<0.000000e+00> : vector<32x128xf32>
    %4 = tpu.matmul %3, %0, %cst {dimension_numbers = #tpu.dot_dimension_numbers<[1], [0], [0], [1], [0, 0, 1, 1], [], []>} : vector<32x64xbf16>, vector<64x128xbf16>, vector<32x128xf32> -> vector<32x128xf32>
    %c0_4 = arith.constant 0 : index
    %c0_5 = arith.constant 0 : index
    %5 = vector.load %arg3[%c0_4, %c0_5] : memref<1x128xf32, #tpu.memory_space<vmem>>, vector<1x128xf32>
    %6 = vector.broadcast %5 : vector<1x128xf32> to vector<32x128xf32>
    %7 = arith.addf %4, %6 : vector<32x128xf32>
    %c0_6 = arith.constant 0 : index
    %c0_7 = arith.constant 0 : index
    %8 = vector.load %arg4[%c0_6, %c0_7] : memref<1x128xf32, #tpu.memory_space<vmem>>, vector<1x128xf32>
    %c0_8 = arith.constant 0 : index
    %c0_9 = arith.constant 0 : index
    %9 = vector.load %arg5[%c0_8, %c0_9] : memref<1x128xf32, #tpu.memory_space<vmem>>, vector<1x128xf32>
    %cst_10 = arith.constant dense<0.000000e+00> : vector<32xf32>
    %10 = vector.multi_reduction <add>, %7, %cst_10 [1] : vector<32x128xf32> to vector<32xf32>
    %11 = vector.shape_cast %10 : vector<32xf32> to vector<32x1xf32>
    %cst_11 = arith.constant 1.280000e+02 : f32
    %12 = vector.broadcast %cst_11 : f32 to vector<32x1xf32>
    %13 = arith.divf %11, %12 : vector<32x1xf32>
    %14 = vector.broadcast %13 : vector<32x1xf32> to vector<32x128xf32>
    %15 = arith.subf %7, %14 : vector<32x128xf32>
    %16 = arith.mulf %15, %15 : vector<32x128xf32>
    %cst_12 = arith.constant dense<0.000000e+00> : vector<32xf32>
    %17 = vector.multi_reduction <add>, %16, %cst_12 [1] : vector<32x128xf32> to vector<32xf32>
    %18 = vector.shape_cast %17 : vector<32xf32> to vector<32x1xf32>
    %cst_13 = arith.constant 1.280000e+02 : f32
    %19 = vector.broadcast %cst_13 : f32 to vector<32x1xf32>
    %20 = arith.divf %18, %19 : vector<32x1xf32>
    %21 = vector.broadcast %13 : vector<32x1xf32> to vector<32x128xf32>
    %22 = arith.subf %7, %21 : vector<32x128xf32>
    %cst_14 = arith.constant 9.99999996E-13 : f32
    %23 = vector.broadcast %cst_14 : f32 to vector<32x1xf32>
    %24 = arith.addf %20, %23 : vector<32x1xf32>
    %25 = math.rsqrt %24 : vector<32x1xf32>
    %26 = vector.broadcast %25 : vector<32x1xf32> to vector<32x128xf32>
    %27 = arith.mulf %22, %26 : vector<32x128xf32>
    %28 = vector.broadcast %8 : vector<1x128xf32> to vector<32x128xf32>
    %29 = arith.mulf %27, %28 : vector<32x128xf32>
    %30 = vector.broadcast %9 : vector<1x128xf32> to vector<32x128xf32>
    %31 = arith.addf %29, %30 : vector<32x128xf32>
    %32 = vector.shape_cast %31 : vector<32x128xf32> to vector<2x16x128xf32>
    %33 = arith.truncf %32 : vector<2x16x128xf32> to vector<2x16x128xbf16>
    %c0_15 = arith.constant 0 : index
    %c0_16 = arith.constant 0 : index
    %c0_17 = arith.constant 0 : index
    %34 = vector.load %arg6[%c0_15, %c0_16, %c0_17] : memref<2x16x128xbf16, #tpu.memory_space<vmem>>, vector<2x16x128xbf16>
    tpu.vector_store %arg6[%c0_15, %c0_16, %c0_17], %33 {strides = array<i32>} : memref<2x16x128xbf16, #tpu.memory_space<vmem>>, vector<2x16x128xbf16>,
    return
  }
  func.func @transform_0(%arg0: i32) -> (i32, i32, i32) {
    %c0_i32 = arith.constant 0 : i32
    %c0_i32_0 = arith.constant 0 : i32
    %c0_i32_1 = arith.constant 0 : i32
    return %arg0, %c0_i32, %c0_i32_0 : i32, i32, i32
  }
  func.func @transform_1(%arg0: i32) -> (i32, i32) {
    %c0_i32 = arith.constant 0 : i32
    %c0_i32_0 = arith.constant 0 : i32
    %c0_i32_1 = arith.constant 0 : i32
    return %c0_i32, %c0_i32_0 : i32, i32
  }
  func.func @transform_2(%arg0: i32) -> (i32, i32) {
    %c0_i32 = arith.constant 0 : i32
    %c0_i32_0 = arith.constant 0 : i32
    %c0_i32_1 = arith.constant 0 : i32
    return %c0_i32, %c0_i32_0 : i32, i32
  }
  func.func @transform_3(%arg0: i32) -> (i32, i32) {
    %c0_i32 = arith.constant 0 : i32
    %c0_i32_0 = arith.constant 0 : i32
    %c0_i32_1 = arith.constant 0 : i32
    return %c0_i32, %c0_i32_0 : i32, i32
  }
  func.func @transform_4(%arg0: i32) -> (i32, i32) {
    %c0_i32 = arith.constant 0 : i32
    %c0_i32_0 = arith.constant 0 : i32
    %c0_i32_1 = arith.constant 0 : i32
    return %c0_i32, %c0_i32_0 : i32, i32
  }
  func.func @transform_5(%arg0: i32) -> (i32, i32, i32) {
    %c0_i32 = arith.constant 0 : i32
    %c0_i32_0 = arith.constant 0 : i32
    %c0_i32_1 = arith.constant 0 : i32
    return %arg0, %c0_i32, %c0_i32_0 : i32, i32, i32
  }
}

module attributes {stable_mosaic.version = 11 : i64} {
  func.func @kernel(%arg0: i32, %arg1: memref<2x16x64xf32, #tpu.memory_space<vmem>>, %arg2: memref<1x64xf32, #tpu.memory_space<vmem>>, %arg3: memref<1x64xf32, #tpu.memory_space<vmem>>, %arg4: memref<64x384xbf16, #tpu.memory_space<vmem>>, %arg5: memref<1x384xf32, #tpu.memory_space<vmem>>, %arg6: memref<128x128xbf16, #tpu.memory_space<vmem>>, %arg7: memref<1x128xf32, #tpu.memory_space<vmem>>, %arg8: memref<64x128xbf16, #tpu.memory_space<vmem>>, %arg9: memref<1x128xf32, #tpu.memory_space<vmem>>, %arg10: memref<1x128xf32, #tpu.memory_space<vmem>>, %arg11: memref<1x128xf32, #tpu.memory_space<vmem>>, %arg12: memref<2x16x128xbf16, #tpu.memory_space<vmem>>, %arg13: memref<32x128xbf16, #tpu.memory_space<vmem>>) attributes {dimension_semantics = [#tpu.dimension_semantics<parallel>], iteration_bounds = array<i64: 1>, scalar_prefetch = 0 : i64, scratch_operands = 1 : i64, tpu.core_type = #tpu.core_type<tc>, window_params = [{transform_indices = @transform_0, window_bounds = array<i64: 2, 16, 64>}, {pipeline_mode = #tpu.pipeline_mode<synchronous>, transform_indices = @transform_1, window_bounds = array<i64: 1, 64>}, {pipeline_mode = #tpu.pipeline_mode<synchronous>, transform_indices = @transform_2, window_bounds = array<i64: 1, 64>}, {pipeline_mode = #tpu.pipeline_mode<synchronous>, transform_indices = @transform_3, window_bounds = array<i64: 64, 384>}, {pipeline_mode = #tpu.pipeline_mode<synchronous>, transform_indices = @transform_4, window_bounds = array<i64: 1, 384>}, {pipeline_mode = #tpu.pipeline_mode<synchronous>, transform_indices = @transform_5, window_bounds = array<i64: 128, 128>}, {pipeline_mode = #tpu.pipeline_mode<synchronous>, transform_indices = @transform_6, window_bounds = array<i64: 1, 128>}, {pipeline_mode = #tpu.pipeline_mode<synchronous>, transform_indices = @transform_7, window_bounds = array<i64: 64, 128>}, {pipeline_mode = #tpu.pipeline_mode<synchronous>, transform_indices = @transform_8, window_bounds = array<i64: 1, 128>}, {pipeline_mode = #tpu.pipeline_mode<synchronous>, transform_indices = @transform_9, window_bounds = array<i64: 1, 128>}, {pipeline_mode = #tpu.pipeline_mode<synchronous>, transform_indices = @transform_10, window_bounds = array<i64: 1, 128>}, {transform_indices = @transform_11, window_bounds = array<i64: 2, 16, 128>}]} {
    %c0 = arith.constant 0 : index
    %c0_0 = arith.constant 0 : index
    %c0_1 = arith.constant 0 : index
    %0 = vector.load %arg1[%c0, %c0_0, %c0_1] : memref<2x16x64xf32, #tpu.memory_space<vmem>>, vector<2x16x64xf32>
    %c0_2 = arith.constant 0 : index
    %c0_3 = arith.constant 0 : index
    %1 = vector.load %arg2[%c0_2, %c0_3] : memref<1x64xf32, #tpu.memory_space<vmem>>, vector<1x64xf32>
    %c0_4 = arith.constant 0 : index
    %c0_5 = arith.constant 0 : index
    %2 = vector.load %arg3[%c0_4, %c0_5] : memref<1x64xf32, #tpu.memory_space<vmem>>, vector<1x64xf32>
    %cst = arith.constant dense<0.000000e+00> : vector<2x16xf32>
    %3 = vector.multi_reduction <add>, %0, %cst [2] : vector<2x16x64xf32> to vector<2x16xf32>
    %4 = vector.shape_cast %3 : vector<2x16xf32> to vector<2x16x1xf32>
    %cst_6 = arith.constant 6.400000e+01 : f32
    %5 = vector.broadcast %cst_6 : f32 to vector<2x16x1xf32>
    %6 = arith.divf %4, %5 : vector<2x16x1xf32>
    %7 = vector.broadcast %6 : vector<2x16x1xf32> to vector<2x16x64xf32>
    %8 = arith.subf %0, %7 : vector<2x16x64xf32>
    %9 = arith.mulf %8, %8 : vector<2x16x64xf32>
    %cst_7 = arith.constant dense<0.000000e+00> : vector<2x16xf32>
    %10 = vector.multi_reduction <add>, %9, %cst_7 [2] : vector<2x16x64xf32> to vector<2x16xf32>
    %11 = vector.shape_cast %10 : vector<2x16xf32> to vector<2x16x1xf32>
    %cst_8 = arith.constant 6.400000e+01 : f32
    %12 = vector.broadcast %cst_8 : f32 to vector<2x16x1xf32>
    %13 = arith.divf %11, %12 : vector<2x16x1xf32>
    %14 = vector.broadcast %6 : vector<2x16x1xf32> to vector<2x16x64xf32>
    %15 = arith.subf %0, %14 : vector<2x16x64xf32>
    %cst_9 = arith.constant 9.99999974E-6 : f32
    %16 = vector.broadcast %cst_9 : f32 to vector<2x16x1xf32>
    %17 = arith.addf %13, %16 : vector<2x16x1xf32>
    %18 = math.rsqrt %17 : vector<2x16x1xf32>
    %19 = vector.broadcast %18 : vector<2x16x1xf32> to vector<2x16x64xf32>
    %20 = arith.mulf %15, %19 : vector<2x16x64xf32>
    %21 = vector.shape_cast %1 : vector<1x64xf32> to vector<1x1x64xf32>
    %22 = vector.broadcast %21 : vector<1x1x64xf32> to vector<2x16x64xf32>
    %23 = arith.mulf %20, %22 : vector<2x16x64xf32>
    %24 = vector.shape_cast %2 : vector<1x64xf32> to vector<1x1x64xf32>
    %25 = vector.broadcast %24 : vector<1x1x64xf32> to vector<2x16x64xf32>
    %26 = arith.addf %23, %25 : vector<2x16x64xf32>
    %cst_10 = arith.constant 0.000000e+00 : f32
    %27 = vector.broadcast %cst_10 : f32 to vector<2x16x64xf32>
    %28 = arith.subf %27, %26 : vector<2x16x64xf32>
    %29 = math.exp %28 : vector<2x16x64xf32>
    %cst_11 = arith.constant 1.000000e+00 : f32
    %30 = vector.broadcast %cst_11 : f32 to vector<2x16x64xf32>
    %31 = arith.addf %30, %29 : vector<2x16x64xf32>
    %32 = tpu.reciprocal %31 {approx = true} : vector<2x16x64xf32> -> vector<2x16x64xf32>
    %33 = arith.mulf %26, %32 : vector<2x16x64xf32>
    %c0_12 = arith.constant 0 : index
    %c0_13 = arith.constant 0 : index
    %34 = vector.load %arg4[%c0_12, %c0_13] : memref<64x384xbf16, #tpu.memory_space<vmem>>, vector<64x384xbf16>
    %c0_14 = arith.constant 0 : index
    %c0_15 = arith.constant 0 : index
    %35 = vector.load %arg5[%c0_14, %c0_15] : memref<1x384xf32, #tpu.memory_space<vmem>>, vector<1x384xf32>
    %c0_16 = arith.constant 0 : index
    %c0_17 = arith.constant 0 : index
    %36 = vector.load %arg6[%c0_16, %c0_17] : memref<128x128xbf16, #tpu.memory_space<vmem>>, vector<128x128xbf16>
    %c0_18 = arith.constant 0 : index
    %c0_19 = arith.constant 0 : index
    %37 = vector.load %arg7[%c0_18, %c0_19] : memref<1x128xf32, #tpu.memory_space<vmem>>, vector<1x128xf32>
    %38 = vector.shape_cast %33 : vector<2x16x64xf32> to vector<32x64xf32>
    %39 = arith.truncf %38 : vector<32x64xf32> to vector<32x64xbf16>
    %cst_20 = arith.constant dense<0.000000e+00> : vector<32x384xf32>
    %40 = tpu.matmul %39, %34, %cst_20 {dimension_numbers = #tpu.dot_dimension_numbers<[1], [0], [0], [1], [0, 0, 1, 1], [], []>} : vector<32x64xbf16>, vector<64x384xbf16>, vector<32x384xf32> -> vector<32x384xf32>
    %41 = vector.broadcast %35 : vector<1x384xf32> to vector<32x384xf32>
    %42 = arith.addf %40, %41 : vector<32x384xf32>
    %43 = arith.truncf %42 : vector<32x384xf32> to vector<32x384xbf16>
    %44 = vector.extract_strided_slice %43 {offsets = [0, 128], sizes = [16, 64], strides = [1, 1]} : vector<32x384xbf16> to vector<16x64xbf16>
    %45 = vector.extract_strided_slice %43 {offsets = [0, 256], sizes = [16, 64], strides = [1, 1]} : vector<32x384xbf16> to vector<16x64xbf16>
    %46 = vector.extract_strided_slice %43 {offsets = [0, 0], sizes = [16, 64], strides = [1, 1]} : vector<32x384xbf16> to vector<16x64xbf16>
    %cst_21 = arith.constant dense<0.000000e+00> : vector<16x16xf32>
    %47 = tpu.matmul %46, %44, %cst_21 {dimension_numbers = #tpu.dot_dimension_numbers<[1], [1], [0], [0], [0, 0, 1, 0], [], []>} : vector<16x64xbf16>, vector<16x64xbf16>, vector<16x16xf32> -> vector<16x16xf32>
    %cst_22 = arith.constant dense<0xFF800000> : vector<16xf32>
    %48 = vector.multi_reduction <maximumf>, %47, %cst_22 [1] : vector<16x16xf32> to vector<16xf32>
    %49 = vector.shape_cast %48 : vector<16xf32> to vector<16x1xf32>
    %50 = vector.broadcast %49 : vector<16x1xf32> to vector<16x16xf32>
    %51 = arith.subf %47, %50 : vector<16x16xf32>
    %52 = math.exp %51 : vector<16x16xf32>
    %cst_23 = arith.constant dense<0.000000e+00> : vector<16xf32>
    %53 = vector.multi_reduction <add>, %52, %cst_23 [1] : vector<16x16xf32> to vector<16xf32>
    %54 = vector.shape_cast %53 : vector<16xf32> to vector<16x1xf32>
    %cst_24 = arith.constant 1.000000e+00 : f32
    %55 = vector.broadcast %cst_24 : f32 to vector<16x1xf32>
    %56 = arith.divf %55, %54 : vector<16x1xf32>
    %57 = vector.broadcast %56 : vector<16x1xf32> to vector<16x16xf32>
    %58 = arith.mulf %52, %57 : vector<16x16xf32>
    %59 = arith.truncf %58 : vector<16x16xf32> to vector<16x16xbf16>
    %cst_25 = arith.constant dense<0.000000e+00> : vector<16x64xf32>
    %60 = tpu.matmul %59, %45, %cst_25 {dimension_numbers = #tpu.dot_dimension_numbers<[1], [0], [0], [1], [0, 0, 1, 1], [], []>} : vector<16x16xbf16>, vector<16x64xbf16>, vector<16x64xf32> -> vector<16x64xf32>
    %61 = arith.truncf %60 : vector<16x64xf32> to vector<16x64xbf16>
    %c0_26 = arith.constant 0 : index
    %c0_27 = arith.constant 0 : index
    %62 = vector.load %arg13[%c0_26, %c0_27] : memref<32x128xbf16, #tpu.memory_space<vmem>>, vector<16x64xbf16>
    tpu.vector_store %arg13[%c0_26, %c0_27], %61 {strides = array<i32>} : memref<32x128xbf16, #tpu.memory_space<vmem>>, vector<16x64xbf16>,
    %63 = vector.extract_strided_slice %43 {offsets = [0, 192], sizes = [16, 64], strides = [1, 1]} : vector<32x384xbf16> to vector<16x64xbf16>
    %64 = vector.extract_strided_slice %43 {offsets = [0, 320], sizes = [16, 64], strides = [1, 1]} : vector<32x384xbf16> to vector<16x64xbf16>
    %65 = vector.extract_strided_slice %43 {offsets = [0, 64], sizes = [16, 64], strides = [1, 1]} : vector<32x384xbf16> to vector<16x64xbf16>
    %cst_28 = arith.constant dense<0.000000e+00> : vector<16x16xf32>
    %66 = tpu.matmul %65, %63, %cst_28 {dimension_numbers = #tpu.dot_dimension_numbers<[1], [1], [0], [0], [0, 0, 1, 0], [], []>} : vector<16x64xbf16>, vector<16x64xbf16>, vector<16x16xf32> -> vector<16x16xf32>
    %cst_29 = arith.constant dense<0xFF800000> : vector<16xf32>
    %67 = vector.multi_reduction <maximumf>, %66, %cst_29 [1] : vector<16x16xf32> to vector<16xf32>
    %68 = vector.shape_cast %67 : vector<16xf32> to vector<16x1xf32>
    %69 = vector.broadcast %68 : vector<16x1xf32> to vector<16x16xf32>
    %70 = arith.subf %66, %69 : vector<16x16xf32>
    %71 = math.exp %70 : vector<16x16xf32>
    %cst_30 = arith.constant dense<0.000000e+00> : vector<16xf32>
    %72 = vector.multi_reduction <add>, %71, %cst_30 [1] : vector<16x16xf32> to vector<16xf32>
    %73 = vector.shape_cast %72 : vector<16xf32> to vector<16x1xf32>
    %cst_31 = arith.constant 1.000000e+00 : f32
    %74 = vector.broadcast %cst_31 : f32 to vector<16x1xf32>
    %75 = arith.divf %74, %73 : vector<16x1xf32>
    %76 = vector.broadcast %75 : vector<16x1xf32> to vector<16x16xf32>
    %77 = arith.mulf %71, %76 : vector<16x16xf32>
    %78 = arith.truncf %77 : vector<16x16xf32> to vector<16x16xbf16>
    %cst_32 = arith.constant dense<0.000000e+00> : vector<16x64xf32>
    %79 = tpu.matmul %78, %64, %cst_32 {dimension_numbers = #tpu.dot_dimension_numbers<[1], [0], [0], [1], [0, 0, 1, 1], [], []>} : vector<16x16xbf16>, vector<16x64xbf16>, vector<16x64xf32> -> vector<16x64xf32>
    %80 = arith.truncf %79 : vector<16x64xf32> to vector<16x64xbf16>
    %c0_33 = arith.constant 0 : index
    %c64 = arith.constant 64 : index
    %81 = vector.load %arg13[%c0_33, %c64] : memref<32x128xbf16, #tpu.memory_space<vmem>>, vector<16x64xbf16>
    tpu.vector_store %arg13[%c0_33, %c64], %80 {strides = array<i32>} : memref<32x128xbf16, #tpu.memory_space<vmem>>, vector<16x64xbf16>,
    %82 = vector.extract_strided_slice %43 {offsets = [16, 128], sizes = [16, 64], strides = [1, 1]} : vector<32x384xbf16> to vector<16x64xbf16>
    %83 = vector.extract_strided_slice %43 {offsets = [16, 256], sizes = [16, 64], strides = [1, 1]} : vector<32x384xbf16> to vector<16x64xbf16>
    %84 = vector.extract_strided_slice %43 {offsets = [16, 0], sizes = [16, 64], strides = [1, 1]} : vector<32x384xbf16> to vector<16x64xbf16>
    %cst_34 = arith.constant dense<0.000000e+00> : vector<16x16xf32>
    %85 = tpu.matmul %84, %82, %cst_34 {dimension_numbers = #tpu.dot_dimension_numbers<[1], [1], [0], [0], [0, 0, 1, 0], [], []>} : vector<16x64xbf16>, vector<16x64xbf16>, vector<16x16xf32> -> vector<16x16xf32>
    %cst_35 = arith.constant dense<0xFF800000> : vector<16xf32>
    %86 = vector.multi_reduction <maximumf>, %85, %cst_35 [1] : vector<16x16xf32> to vector<16xf32>
    %87 = vector.shape_cast %86 : vector<16xf32> to vector<16x1xf32>
    %88 = vector.broadcast %87 : vector<16x1xf32> to vector<16x16xf32>
    %89 = arith.subf %85, %88 : vector<16x16xf32>
    %90 = math.exp %89 : vector<16x16xf32>
    %cst_36 = arith.constant dense<0.000000e+00> : vector<16xf32>
    %91 = vector.multi_reduction <add>, %90, %cst_36 [1] : vector<16x16xf32> to vector<16xf32>
    %92 = vector.shape_cast %91 : vector<16xf32> to vector<16x1xf32>
    %cst_37 = arith.constant 1.000000e+00 : f32
    %93 = vector.broadcast %cst_37 : f32 to vector<16x1xf32>
    %94 = arith.divf %93, %92 : vector<16x1xf32>
    %95 = vector.broadcast %94 : vector<16x1xf32> to vector<16x16xf32>
    %96 = arith.mulf %90, %95 : vector<16x16xf32>
    %97 = arith.truncf %96 : vector<16x16xf32> to vector<16x16xbf16>
    %cst_38 = arith.constant dense<0.000000e+00> : vector<16x64xf32>
    %98 = tpu.matmul %97, %83, %cst_38 {dimension_numbers = #tpu.dot_dimension_numbers<[1], [0], [0], [1], [0, 0, 1, 1], [], []>} : vector<16x16xbf16>, vector<16x64xbf16>, vector<16x64xf32> -> vector<16x64xf32>
    %99 = arith.truncf %98 : vector<16x64xf32> to vector<16x64xbf16>
    %c16 = arith.constant 16 : index
    %c0_39 = arith.constant 0 : index
    %100 = vector.load %arg13[%c16, %c0_39] : memref<32x128xbf16, #tpu.memory_space<vmem>>, vector<16x64xbf16>
    tpu.vector_store %arg13[%c16, %c0_39], %99 {strides = array<i32>} : memref<32x128xbf16, #tpu.memory_space<vmem>>, vector<16x64xbf16>,
    %101 = vector.extract_strided_slice %43 {offsets = [16, 192], sizes = [16, 64], strides = [1, 1]} : vector<32x384xbf16> to vector<16x64xbf16>
    %102 = vector.extract_strided_slice %43 {offsets = [16, 320], sizes = [16, 64], strides = [1, 1]} : vector<32x384xbf16> to vector<16x64xbf16>
    %103 = vector.extract_strided_slice %43 {offsets = [16, 64], sizes = [16, 64], strides = [1, 1]} : vector<32x384xbf16> to vector<16x64xbf16>
    %cst_40 = arith.constant dense<0.000000e+00> : vector<16x16xf32>
    %104 = tpu.matmul %103, %101, %cst_40 {dimension_numbers = #tpu.dot_dimension_numbers<[1], [1], [0], [0], [0, 0, 1, 0], [], []>} : vector<16x64xbf16>, vector<16x64xbf16>, vector<16x16xf32> -> vector<16x16xf32>
    %cst_41 = arith.constant dense<0xFF800000> : vector<16xf32>
    %105 = vector.multi_reduction <maximumf>, %104, %cst_41 [1] : vector<16x16xf32> to vector<16xf32>
    %106 = vector.shape_cast %105 : vector<16xf32> to vector<16x1xf32>
    %107 = vector.broadcast %106 : vector<16x1xf32> to vector<16x16xf32>
    %108 = arith.subf %104, %107 : vector<16x16xf32>
    %109 = math.exp %108 : vector<16x16xf32>
    %cst_42 = arith.constant dense<0.000000e+00> : vector<16xf32>
    %110 = vector.multi_reduction <add>, %109, %cst_42 [1] : vector<16x16xf32> to vector<16xf32>
    %111 = vector.shape_cast %110 : vector<16xf32> to vector<16x1xf32>
    %cst_43 = arith.constant 1.000000e+00 : f32
    %112 = vector.broadcast %cst_43 : f32 to vector<16x1xf32>
    %113 = arith.divf %112, %111 : vector<16x1xf32>
    %114 = vector.broadcast %113 : vector<16x1xf32> to vector<16x16xf32>
    %115 = arith.mulf %109, %114 : vector<16x16xf32>
    %116 = arith.truncf %115 : vector<16x16xf32> to vector<16x16xbf16>
    %cst_44 = arith.constant dense<0.000000e+00> : vector<16x64xf32>
    %117 = tpu.matmul %116, %102, %cst_44 {dimension_numbers = #tpu.dot_dimension_numbers<[1], [0], [0], [1], [0, 0, 1, 1], [], []>} : vector<16x16xbf16>, vector<16x64xbf16>, vector<16x64xf32> -> vector<16x64xf32>
    %118 = arith.truncf %117 : vector<16x64xf32> to vector<16x64xbf16>
    %c16_45 = arith.constant 16 : index
    %c64_46 = arith.constant 64 : index
    %119 = vector.load %arg13[%c16_45, %c64_46] : memref<32x128xbf16, #tpu.memory_space<vmem>>, vector<16x64xbf16>
    tpu.vector_store %arg13[%c16_45, %c64_46], %118 {strides = array<i32>} : memref<32x128xbf16, #tpu.memory_space<vmem>>, vector<16x64xbf16>,
    %c0_47 = arith.constant 0 : index
    %c0_48 = arith.constant 0 : index
    %120 = vector.load %arg13[%c0_47, %c0_48] : memref<32x128xbf16, #tpu.memory_space<vmem>>, vector<32x128xbf16>
    %cst_49 = arith.constant dense<0.000000e+00> : vector<32x128xf32>
    %121 = tpu.matmul %120, %36, %cst_49 {dimension_numbers = #tpu.dot_dimension_numbers<[1], [0], [0], [1], [0, 0, 1, 1], [], []>} : vector<32x128xbf16>, vector<128x128xbf16>, vector<32x128xf32> -> vector<32x128xf32>
    %122 = vector.broadcast %37 : vector<1x128xf32> to vector<32x128xf32>
    %123 = arith.addf %121, %122 : vector<32x128xf32>
    %c0_50 = arith.constant 0 : index
    %c0_51 = arith.constant 0 : index
    %124 = vector.load %arg8[%c0_50, %c0_51] : memref<64x128xbf16, #tpu.memory_space<vmem>>, vector<64x128xbf16>
    %c0_52 = arith.constant 0 : index
    %c0_53 = arith.constant 0 : index
    %125 = vector.load %arg9[%c0_52, %c0_53] : memref<1x128xf32, #tpu.memory_space<vmem>>, vector<1x128xf32>
    %cst_54 = arith.constant dense<0.000000e+00> : vector<32x128xf32>
    %126 = tpu.matmul %39, %124, %cst_54 {dimension_numbers = #tpu.dot_dimension_numbers<[1], [0], [0], [1], [0, 0, 1, 1], [], []>} : vector<32x64xbf16>, vector<64x128xbf16>, vector<32x128xf32> -> vector<32x128xf32>
    %127 = vector.broadcast %125 : vector<1x128xf32> to vector<32x128xf32>
    %128 = arith.addf %126, %127 : vector<32x128xf32>
    %c0_55 = arith.constant 0 : index
    %c0_56 = arith.constant 0 : index
    %129 = vector.load %arg10[%c0_55, %c0_56] : memref<1x128xf32, #tpu.memory_space<vmem>>, vector<1x128xf32>
    %c0_57 = arith.constant 0 : index
    %c0_58 = arith.constant 0 : index
    %130 = vector.load %arg11[%c0_57, %c0_58] : memref<1x128xf32, #tpu.memory_space<vmem>>, vector<1x128xf32>
    %131 = arith.addf %123, %128 : vector<32x128xf32>
    %cst_59 = arith.constant dense<0.000000e+00> : vector<32xf32>
    %132 = vector.multi_reduction <add>, %131, %cst_59 [1] : vector<32x128xf32> to vector<32xf32>
    %133 = vector.shape_cast %132 : vector<32xf32> to vector<32x1xf32>
    %cst_60 = arith.constant 1.280000e+02 : f32
    %134 = vector.broadcast %cst_60 : f32 to vector<32x1xf32>
    %135 = arith.divf %133, %134 : vector<32x1xf32>
    %136 = vector.broadcast %135 : vector<32x1xf32> to vector<32x128xf32>
    %137 = arith.subf %131, %136 : vector<32x128xf32>
    %138 = arith.mulf %137, %137 : vector<32x128xf32>
    %cst_61 = arith.constant dense<0.000000e+00> : vector<32xf32>
    %139 = vector.multi_reduction <add>, %138, %cst_61 [1] : vector<32x128xf32> to vector<32xf32>
    %140 = vector.shape_cast %139 : vector<32xf32> to vector<32x1xf32>
    %cst_62 = arith.constant 1.280000e+02 : f32
    %141 = vector.broadcast %cst_62 : f32 to vector<32x1xf32>
    %142 = arith.divf %140, %141 : vector<32x1xf32>
    %143 = vector.broadcast %135 : vector<32x1xf32> to vector<32x128xf32>
    %144 = arith.subf %131, %143 : vector<32x128xf32>
    %cst_63 = arith.constant 9.99999996E-13 : f32
    %145 = vector.broadcast %cst_63 : f32 to vector<32x1xf32>
    %146 = arith.addf %142, %145 : vector<32x1xf32>
    %147 = math.rsqrt %146 : vector<32x1xf32>
    %148 = vector.broadcast %147 : vector<32x1xf32> to vector<32x128xf32>
    %149 = arith.mulf %144, %148 : vector<32x128xf32>
    %150 = vector.broadcast %129 : vector<1x128xf32> to vector<32x128xf32>
    %151 = arith.mulf %149, %150 : vector<32x128xf32>
    %152 = vector.broadcast %130 : vector<1x128xf32> to vector<32x128xf32>
    %153 = arith.addf %151, %152 : vector<32x128xf32>
    %154 = vector.shape_cast %153 : vector<32x128xf32> to vector<2x16x128xf32>
    %155 = arith.truncf %154 : vector<2x16x128xf32> to vector<2x16x128xbf16>
    %c0_64 = arith.constant 0 : index
    %c0_65 = arith.constant 0 : index
    %c0_66 = arith.constant 0 : index
    %156 = vector.load %arg12[%c0_64, %c0_65, %c0_66] : memref<2x16x128xbf16, #tpu.memory_space<vmem>>, vector<2x16x128xbf16>
    tpu.vector_store %arg12[%c0_64, %c0_65, %c0_66], %155 {strides = array<i32>} : memref<2x16x128xbf16, #tpu.memory_space<vmem>>, vector<2x16x128xbf16>,
    return
  }
  func.func @transform_0(%arg0: i32) -> (i32, i32, i32) {
    %c0_i32 = arith.constant 0 : i32
    %c0_i32_0 = arith.constant 0 : i32
    %c0_i32_1 = arith.constant 0 : i32
    return %arg0, %c0_i32, %c0_i32_0 : i32, i32, i32
  }
  func.func @transform_1(%arg0: i32) -> (i32, i32) {
    %c0_i32 = arith.constant 0 : i32
    %c0_i32_0 = arith.constant 0 : i32
    %c0_i32_1 = arith.constant 0 : i32
    return %c0_i32, %c0_i32_0 : i32, i32
  }
  func.func @transform_2(%arg0: i32) -> (i32, i32) {
    %c0_i32 = arith.constant 0 : i32
    %c0_i32_0 = arith.constant 0 : i32
    %c0_i32_1 = arith.constant 0 : i32
    return %c0_i32, %c0_i32_0 : i32, i32
  }
  func.func @transform_3(%arg0: i32) -> (i32, i32) {
    %c0_i32 = arith.constant 0 : i32
    %c0_i32_0 = arith.constant 0 : i32
    %c0_i32_1 = arith.constant 0 : i32
    return %c0_i32, %c0_i32_0 : i32, i32
  }
  func.func @transform_4(%arg0: i32) -> (i32, i32) {
    %c0_i32 = arith.constant 0 : i32
    %c0_i32_0 = arith.constant 0 : i32
    %c0_i32_1 = arith.constant 0 : i32
    return %c0_i32, %c0_i32_0 : i32, i32
  }
  func.func @transform_5(%arg0: i32) -> (i32, i32) {
    %c0_i32 = arith.constant 0 : i32
    %c0_i32_0 = arith.constant 0 : i32
    %c0_i32_1 = arith.constant 0 : i32
    return %c0_i32, %c0_i32_0 : i32, i32
  }
  func.func @transform_6(%arg0: i32) -> (i32, i32) {
    %c0_i32 = arith.constant 0 : i32
    %c0_i32_0 = arith.constant 0 : i32
    %c0_i32_1 = arith.constant 0 : i32
    return %c0_i32, %c0_i32_0 : i32, i32
  }
  func.func @transform_7(%arg0: i32) -> (i32, i32) {
    %c0_i32 = arith.constant 0 : i32
    %c0_i32_0 = arith.constant 0 : i32
    %c0_i32_1 = arith.constant 0 : i32
    return %c0_i32, %c0_i32_0 : i32, i32
  }
  func.func @transform_8(%arg0: i32) -> (i32, i32) {
    %c0_i32 = arith.constant 0 : i32
    %c0_i32_0 = arith.constant 0 : i32
    %c0_i32_1 = arith.constant 0 : i32
    return %c0_i32, %c0_i32_0 : i32, i32
  }
  func.func @transform_9(%arg0: i32) -> (i32, i32) {
    %c0_i32 = arith.constant 0 : i32
    %c0_i32_0 = arith.constant 0 : i32
    %c0_i32_1 = arith.constant 0 : i32
    return %c0_i32, %c0_i32_0 : i32, i32
  }
  func.func @transform_10(%arg0: i32) -> (i32, i32) {
    %c0_i32 = arith.constant 0 : i32
    %c0_i32_0 = arith.constant 0 : i32
    %c0_i32_1 = arith.constant 0 : i32
    return %c0_i32, %c0_i32_0 : i32, i32
  }
  func.func @transform_11(%arg0: i32) -> (i32, i32, i32) {
    %c0_i32 = arith.constant 0 : i32
    %c0_i32_0 = arith.constant 0 : i32
    %c0_i32_1 = arith.constant 0 : i32
    return %arg0, %c0_i32, %c0_i32_0 : i32, i32, i32
  }
}

module attributes {stable_mosaic.version = 11 : i64} {
  func.func @kernel(%arg0: i32, %arg1: memref<2x16x128xbf16, #tpu.memory_space<vmem>>, %arg2: memref<2x1x256xf32, #tpu.memory_space<vmem>>, %arg3: memref<256x128xbf16, #tpu.memory_space<vmem>>, %arg4: memref<1x128xf32, #tpu.memory_space<vmem>>, %arg5: memref<1x128xf32, #tpu.memory_space<vmem>>, %arg6: memref<1x128xf32, #tpu.memory_space<vmem>>, %arg7: memref<128x384xbf16, #tpu.memory_space<vmem>>, %arg8: memref<1x384xf32, #tpu.memory_space<vmem>>, %arg9: memref<128x128xbf16, #tpu.memory_space<vmem>>, %arg10: memref<1x128xf32, #tpu.memory_space<vmem>>, %arg11: memref<1x128xf32, #tpu.memory_space<vmem>>, %arg12: memref<1x128xf32, #tpu.memory_space<vmem>>, %arg13: memref<2x16x128xbf16, #tpu.memory_space<vmem>>, %arg14: memref<2x16x128xbf16, #tpu.memory_space<vmem>>, %arg15: memref<32x128xbf16, #tpu.memory_space<vmem>>) attributes {dimension_semantics = [#tpu.dimension_semantics<parallel>], iteration_bounds = array<i64: 1>, scalar_prefetch = 0 : i64, scratch_operands = 1 : i64, tpu.core_type = #tpu.core_type<tc>, window_params = [{transform_indices = @transform_0, window_bounds = array<i64: 2, 16, 128>}, {transform_indices = @transform_1, window_bounds = array<i64: 2, 1, 256>}, {pipeline_mode = #tpu.pipeline_mode<synchronous>, transform_indices = @transform_2, window_bounds = array<i64: 256, 128>}, {pipeline_mode = #tpu.pipeline_mode<synchronous>, transform_indices = @transform_3, window_bounds = array<i64: 1, 128>}, {pipeline_mode = #tpu.pipeline_mode<synchronous>, transform_indices = @transform_4, window_bounds = array<i64: 1, 128>}, {pipeline_mode = #tpu.pipeline_mode<synchronous>, transform_indices = @transform_5, window_bounds = array<i64: 1, 128>}, {pipeline_mode = #tpu.pipeline_mode<synchronous>, transform_indices = @transform_6, window_bounds = array<i64: 128, 384>}, {pipeline_mode = #tpu.pipeline_mode<synchronous>, transform_indices = @transform_7, window_bounds = array<i64: 1, 384>}, {pipeline_mode = #tpu.pipeline_mode<synchronous>, transform_indices = @transform_8, window_bounds = array<i64: 128, 128>}, {pipeline_mode = #tpu.pipeline_mode<synchronous>, transform_indices = @transform_9, window_bounds = array<i64: 1, 128>}, {pipeline_mode = #tpu.pipeline_mode<synchronous>, transform_indices = @transform_10, window_bounds = array<i64: 1, 128>}, {pipeline_mode = #tpu.pipeline_mode<synchronous>, transform_indices = @transform_11, window_bounds = array<i64: 1, 128>}, {transform_indices = @transform_12, window_bounds = array<i64: 2, 16, 128>}, {transform_indices = @transform_13, window_bounds = array<i64: 2, 16, 128>}]} {
    %c0 = arith.constant 0 : index
    %c0_0 = arith.constant 0 : index
    %c0_1 = arith.constant 0 : index
    %0 = vector.load %arg1[%c0, %c0_0, %c0_1] : memref<2x16x128xbf16, #tpu.memory_space<vmem>>, vector<2x16x128xbf16>
    %1 = arith.extf %0 : vector<2x16x128xbf16> to vector<2x16x128xf32>
    %c0_2 = arith.constant 0 : index
    %c0_3 = arith.constant 0 : index
    %c0_4 = arith.constant 0 : index
    %2 = vector.load %arg2[%c0_2, %c0_3, %c0_4] : memref<2x1x256xf32, #tpu.memory_space<vmem>>, vector<2x1x256xf32>
    %3 = vector.shape_cast %2 : vector<2x1x256xf32> to vector<2x256xf32>
    %cst = arith.constant 0.000000e+00 : f32
    %4 = vector.broadcast %cst : f32 to vector<2x256xf32>
    %5 = arith.subf %4, %3 : vector<2x256xf32>
    %6 = math.exp %5 : vector<2x256xf32>
    %cst_5 = arith.constant 1.000000e+00 : f32
    %7 = vector.broadcast %cst_5 : f32 to vector<2x256xf32>
    %8 = arith.addf %7, %6 : vector<2x256xf32>
    %9 = tpu.reciprocal %8 {approx = true} : vector<2x256xf32> -> vector<2x256xf32>
    %10 = arith.mulf %3, %9 : vector<2x256xf32>
    %c0_6 = arith.constant 0 : index
    %c0_7 = arith.constant 0 : index
    %11 = vector.load %arg3[%c0_6, %c0_7] : memref<256x128xbf16, #tpu.memory_space<vmem>>, vector<256x128xbf16>
    %12 = arith.truncf %10 : vector<2x256xf32> to vector<2x256xbf16>
    %cst_8 = arith.constant dense<0.000000e+00> : vector<2x128xf32>
    %13 = tpu.matmul %12, %11, %cst_8 {dimension_numbers = #tpu.dot_dimension_numbers<[1], [0], [0], [1], [0, 0, 1, 1], [], []>} : vector<2x256xbf16>, vector<256x128xbf16>, vector<2x128xf32> -> vector<2x128xf32>
    %c0_9 = arith.constant 0 : index
    %c0_10 = arith.constant 0 : index
    %14 = vector.load %arg4[%c0_9, %c0_10] : memref<1x128xf32, #tpu.memory_space<vmem>>, vector<1x128xf32>
    %15 = vector.broadcast %14 : vector<1x128xf32> to vector<2x128xf32>
    %16 = arith.addf %13, %15 : vector<2x128xf32>
    %17 = vector.shape_cast %16 : vector<2x128xf32> to vector<2x1x128xf32>
    %18 = vector.broadcast %17 : vector<2x1x128xf32> to vector<2x16x128xf32>
    %19 = arith.addf %1, %18 : vector<2x16x128xf32>
    %c0_11 = arith.constant 0 : index
    %c0_12 = arith.constant 0 : index
    %20 = vector.load %arg5[%c0_11, %c0_12] : memref<1x128xf32, #tpu.memory_space<vmem>>, vector<1x128xf32>
    %c0_13 = arith.constant 0 : index
    %c0_14 = arith.constant 0 : index
    %21 = vector.load %arg6[%c0_13, %c0_14] : memref<1x128xf32, #tpu.memory_space<vmem>>, vector<1x128xf32>
    %cst_15 = arith.constant dense<0.000000e+00> : vector<2x16xf32>
    %22 = vector.multi_reduction <add>, %19, %cst_15 [2] : vector<2x16x128xf32> to vector<2x16xf32>
    %23 = vector.shape_cast %22 : vector<2x16xf32> to vector<2x16x1xf32>
    %cst_16 = arith.constant 1.280000e+02 : f32
    %24 = vector.broadcast %cst_16 : f32 to vector<2x16x1xf32>
    %25 = arith.divf %23, %24 : vector<2x16x1xf32>
    %26 = vector.broadcast %25 : vector<2x16x1xf32> to vector<2x16x128xf32>
    %27 = arith.subf %19, %26 : vector<2x16x128xf32>
    %28 = arith.mulf %27, %27 : vector<2x16x128xf32>
    %cst_17 = arith.constant dense<0.000000e+00> : vector<2x16xf32>
    %29 = vector.multi_reduction <add>, %28, %cst_17 [2] : vector<2x16x128xf32> to vector<2x16xf32>
    %30 = vector.shape_cast %29 : vector<2x16xf32> to vector<2x16x1xf32>
    %cst_18 = arith.constant 1.280000e+02 : f32
    %31 = vector.broadcast %cst_18 : f32 to vector<2x16x1xf32>
    %32 = arith.divf %30, %31 : vector<2x16x1xf32>
    %33 = vector.broadcast %25 : vector<2x16x1xf32> to vector<2x16x128xf32>
    %34 = arith.subf %19, %33 : vector<2x16x128xf32>
    %cst_19 = arith.constant 9.99999974E-6 : f32
    %35 = vector.broadcast %cst_19 : f32 to vector<2x16x1xf32>
    %36 = arith.addf %32, %35 : vector<2x16x1xf32>
    %37 = math.rsqrt %36 : vector<2x16x1xf32>
    %38 = vector.broadcast %37 : vector<2x16x1xf32> to vector<2x16x128xf32>
    %39 = arith.mulf %34, %38 : vector<2x16x128xf32>
    %40 = vector.shape_cast %20 : vector<1x128xf32> to vector<1x1x128xf32>
    %41 = vector.broadcast %40 : vector<1x1x128xf32> to vector<2x16x128xf32>
    %42 = arith.mulf %39, %41 : vector<2x16x128xf32>
    %43 = vector.shape_cast %21 : vector<1x128xf32> to vector<1x1x128xf32>
    %44 = vector.broadcast %43 : vector<1x1x128xf32> to vector<2x16x128xf32>
    %45 = arith.addf %42, %44 : vector<2x16x128xf32>
    %cst_20 = arith.constant 0.000000e+00 : f32
    %46 = vector.broadcast %cst_20 : f32 to vector<2x16x128xf32>
    %47 = arith.subf %46, %45 : vector<2x16x128xf32>
    %48 = math.exp %47 : vector<2x16x128xf32>
    %cst_21 = arith.constant 1.000000e+00 : f32
    %49 = vector.broadcast %cst_21 : f32 to vector<2x16x128xf32>
    %50 = arith.addf %49, %48 : vector<2x16x128xf32>
    %51 = tpu.reciprocal %50 {approx = true} : vector<2x16x128xf32> -> vector<2x16x128xf32>
    %52 = arith.mulf %45, %51 : vector<2x16x128xf32>
    %c0_22 = arith.constant 0 : index
    %c0_23 = arith.constant 0 : index
    %53 = vector.load %arg7[%c0_22, %c0_23] : memref<128x384xbf16, #tpu.memory_space<vmem>>, vector<128x384xbf16>
    %c0_24 = arith.constant 0 : index
    %c0_25 = arith.constant 0 : index
    %54 = vector.load %arg8[%c0_24, %c0_25] : memref<1x384xf32, #tpu.memory_space<vmem>>, vector<1x384xf32>
    %c0_26 = arith.constant 0 : index
    %c0_27 = arith.constant 0 : index
    %55 = vector.load %arg9[%c0_26, %c0_27] : memref<128x128xbf16, #tpu.memory_space<vmem>>, vector<128x128xbf16>
    %c0_28 = arith.constant 0 : index
    %c0_29 = arith.constant 0 : index
    %56 = vector.load %arg10[%c0_28, %c0_29] : memref<1x128xf32, #tpu.memory_space<vmem>>, vector<1x128xf32>
    %57 = vector.shape_cast %52 : vector<2x16x128xf32> to vector<32x128xf32>
    %58 = arith.truncf %57 : vector<32x128xf32> to vector<32x128xbf16>
    %cst_30 = arith.constant dense<0.000000e+00> : vector<32x384xf32>
    %59 = tpu.matmul %58, %53, %cst_30 {dimension_numbers = #tpu.dot_dimension_numbers<[1], [0], [0], [1], [0, 0, 1, 1], [], []>} : vector<32x128xbf16>, vector<128x384xbf16>, vector<32x384xf32> -> vector<32x384xf32>
    %60 = vector.broadcast %54 : vector<1x384xf32> to vector<32x384xf32>
    %61 = arith.addf %59, %60 : vector<32x384xf32>
    %62 = arith.truncf %61 : vector<32x384xf32> to vector<32x384xbf16>
    %63 = vector.extract_strided_slice %62 {offsets = [0, 128], sizes = [16, 64], strides = [1, 1]} : vector<32x384xbf16> to vector<16x64xbf16>
    %64 = vector.extract_strided_slice %62 {offsets = [0, 256], sizes = [16, 64], strides = [1, 1]} : vector<32x384xbf16> to vector<16x64xbf16>
    %65 = vector.extract_strided_slice %62 {offsets = [0, 0], sizes = [16, 64], strides = [1, 1]} : vector<32x384xbf16> to vector<16x64xbf16>
    %cst_31 = arith.constant dense<0.000000e+00> : vector<16x16xf32>
    %66 = tpu.matmul %65, %63, %cst_31 {dimension_numbers = #tpu.dot_dimension_numbers<[1], [1], [0], [0], [0, 0, 1, 0], [], []>} : vector<16x64xbf16>, vector<16x64xbf16>, vector<16x16xf32> -> vector<16x16xf32>
    %cst_32 = arith.constant dense<0xFF800000> : vector<16xf32>
    %67 = vector.multi_reduction <maximumf>, %66, %cst_32 [1] : vector<16x16xf32> to vector<16xf32>
    %68 = vector.shape_cast %67 : vector<16xf32> to vector<16x1xf32>
    %69 = vector.broadcast %68 : vector<16x1xf32> to vector<16x16xf32>
    %70 = arith.subf %66, %69 : vector<16x16xf32>
    %71 = math.exp %70 : vector<16x16xf32>
    %cst_33 = arith.constant dense<0.000000e+00> : vector<16xf32>
    %72 = vector.multi_reduction <add>, %71, %cst_33 [1] : vector<16x16xf32> to vector<16xf32>
    %73 = vector.shape_cast %72 : vector<16xf32> to vector<16x1xf32>
    %cst_34 = arith.constant 1.000000e+00 : f32
    %74 = vector.broadcast %cst_34 : f32 to vector<16x1xf32>
    %75 = arith.divf %74, %73 : vector<16x1xf32>
    %76 = vector.broadcast %75 : vector<16x1xf32> to vector<16x16xf32>
    %77 = arith.mulf %71, %76 : vector<16x16xf32>
    %78 = arith.truncf %77 : vector<16x16xf32> to vector<16x16xbf16>
    %cst_35 = arith.constant dense<0.000000e+00> : vector<16x64xf32>
    %79 = tpu.matmul %78, %64, %cst_35 {dimension_numbers = #tpu.dot_dimension_numbers<[1], [0], [0], [1], [0, 0, 1, 1], [], []>} : vector<16x16xbf16>, vector<16x64xbf16>, vector<16x64xf32> -> vector<16x64xf32>
    %80 = arith.truncf %79 : vector<16x64xf32> to vector<16x64xbf16>
    %c0_36 = arith.constant 0 : index
    %c0_37 = arith.constant 0 : index
    %81 = vector.load %arg15[%c0_36, %c0_37] : memref<32x128xbf16, #tpu.memory_space<vmem>>, vector<16x64xbf16>
    tpu.vector_store %arg15[%c0_36, %c0_37], %80 {strides = array<i32>} : memref<32x128xbf16, #tpu.memory_space<vmem>>, vector<16x64xbf16>,
    %82 = vector.extract_strided_slice %62 {offsets = [0, 192], sizes = [16, 64], strides = [1, 1]} : vector<32x384xbf16> to vector<16x64xbf16>
    %83 = vector.extract_strided_slice %62 {offsets = [0, 320], sizes = [16, 64], strides = [1, 1]} : vector<32x384xbf16> to vector<16x64xbf16>
    %84 = vector.extract_strided_slice %62 {offsets = [0, 64], sizes = [16, 64], strides = [1, 1]} : vector<32x384xbf16> to vector<16x64xbf16>
    %cst_38 = arith.constant dense<0.000000e+00> : vector<16x16xf32>
    %85 = tpu.matmul %84, %82, %cst_38 {dimension_numbers = #tpu.dot_dimension_numbers<[1], [1], [0], [0], [0, 0, 1, 0], [], []>} : vector<16x64xbf16>, vector<16x64xbf16>, vector<16x16xf32> -> vector<16x16xf32>
    %cst_39 = arith.constant dense<0xFF800000> : vector<16xf32>
    %86 = vector.multi_reduction <maximumf>, %85, %cst_39 [1] : vector<16x16xf32> to vector<16xf32>
    %87 = vector.shape_cast %86 : vector<16xf32> to vector<16x1xf32>
    %88 = vector.broadcast %87 : vector<16x1xf32> to vector<16x16xf32>
    %89 = arith.subf %85, %88 : vector<16x16xf32>
    %90 = math.exp %89 : vector<16x16xf32>
    %cst_40 = arith.constant dense<0.000000e+00> : vector<16xf32>
    %91 = vector.multi_reduction <add>, %90, %cst_40 [1] : vector<16x16xf32> to vector<16xf32>
    %92 = vector.shape_cast %91 : vector<16xf32> to vector<16x1xf32>
    %cst_41 = arith.constant 1.000000e+00 : f32
    %93 = vector.broadcast %cst_41 : f32 to vector<16x1xf32>
    %94 = arith.divf %93, %92 : vector<16x1xf32>
    %95 = vector.broadcast %94 : vector<16x1xf32> to vector<16x16xf32>
    %96 = arith.mulf %90, %95 : vector<16x16xf32>
    %97 = arith.truncf %96 : vector<16x16xf32> to vector<16x16xbf16>
    %cst_42 = arith.constant dense<0.000000e+00> : vector<16x64xf32>
    %98 = tpu.matmul %97, %83, %cst_42 {dimension_numbers = #tpu.dot_dimension_numbers<[1], [0], [0], [1], [0, 0, 1, 1], [], []>} : vector<16x16xbf16>, vector<16x64xbf16>, vector<16x64xf32> -> vector<16x64xf32>
    %99 = arith.truncf %98 : vector<16x64xf32> to vector<16x64xbf16>
    %c0_43 = arith.constant 0 : index
    %c64 = arith.constant 64 : index
    %100 = vector.load %arg15[%c0_43, %c64] : memref<32x128xbf16, #tpu.memory_space<vmem>>, vector<16x64xbf16>
    tpu.vector_store %arg15[%c0_43, %c64], %99 {strides = array<i32>} : memref<32x128xbf16, #tpu.memory_space<vmem>>, vector<16x64xbf16>,
    %101 = vector.extract_strided_slice %62 {offsets = [16, 128], sizes = [16, 64], strides = [1, 1]} : vector<32x384xbf16> to vector<16x64xbf16>
    %102 = vector.extract_strided_slice %62 {offsets = [16, 256], sizes = [16, 64], strides = [1, 1]} : vector<32x384xbf16> to vector<16x64xbf16>
    %103 = vector.extract_strided_slice %62 {offsets = [16, 0], sizes = [16, 64], strides = [1, 1]} : vector<32x384xbf16> to vector<16x64xbf16>
    %cst_44 = arith.constant dense<0.000000e+00> : vector<16x16xf32>
    %104 = tpu.matmul %103, %101, %cst_44 {dimension_numbers = #tpu.dot_dimension_numbers<[1], [1], [0], [0], [0, 0, 1, 0], [], []>} : vector<16x64xbf16>, vector<16x64xbf16>, vector<16x16xf32> -> vector<16x16xf32>
    %cst_45 = arith.constant dense<0xFF800000> : vector<16xf32>
    %105 = vector.multi_reduction <maximumf>, %104, %cst_45 [1] : vector<16x16xf32> to vector<16xf32>
    %106 = vector.shape_cast %105 : vector<16xf32> to vector<16x1xf32>
    %107 = vector.broadcast %106 : vector<16x1xf32> to vector<16x16xf32>
    %108 = arith.subf %104, %107 : vector<16x16xf32>
    %109 = math.exp %108 : vector<16x16xf32>
    %cst_46 = arith.constant dense<0.000000e+00> : vector<16xf32>
    %110 = vector.multi_reduction <add>, %109, %cst_46 [1] : vector<16x16xf32> to vector<16xf32>
    %111 = vector.shape_cast %110 : vector<16xf32> to vector<16x1xf32>
    %cst_47 = arith.constant 1.000000e+00 : f32
    %112 = vector.broadcast %cst_47 : f32 to vector<16x1xf32>
    %113 = arith.divf %112, %111 : vector<16x1xf32>
    %114 = vector.broadcast %113 : vector<16x1xf32> to vector<16x16xf32>
    %115 = arith.mulf %109, %114 : vector<16x16xf32>
    %116 = arith.truncf %115 : vector<16x16xf32> to vector<16x16xbf16>
    %cst_48 = arith.constant dense<0.000000e+00> : vector<16x64xf32>
    %117 = tpu.matmul %116, %102, %cst_48 {dimension_numbers = #tpu.dot_dimension_numbers<[1], [0], [0], [1], [0, 0, 1, 1], [], []>} : vector<16x16xbf16>, vector<16x64xbf16>, vector<16x64xf32> -> vector<16x64xf32>
    %118 = arith.truncf %117 : vector<16x64xf32> to vector<16x64xbf16>
    %c16 = arith.constant 16 : index
    %c0_49 = arith.constant 0 : index
    %119 = vector.load %arg15[%c16, %c0_49] : memref<32x128xbf16, #tpu.memory_space<vmem>>, vector<16x64xbf16>
    tpu.vector_store %arg15[%c16, %c0_49], %118 {strides = array<i32>} : memref<32x128xbf16, #tpu.memory_space<vmem>>, vector<16x64xbf16>,
    %120 = vector.extract_strided_slice %62 {offsets = [16, 192], sizes = [16, 64], strides = [1, 1]} : vector<32x384xbf16> to vector<16x64xbf16>
    %121 = vector.extract_strided_slice %62 {offsets = [16, 320], sizes = [16, 64], strides = [1, 1]} : vector<32x384xbf16> to vector<16x64xbf16>
    %122 = vector.extract_strided_slice %62 {offsets = [16, 64], sizes = [16, 64], strides = [1, 1]} : vector<32x384xbf16> to vector<16x64xbf16>
    %cst_50 = arith.constant dense<0.000000e+00> : vector<16x16xf32>
    %123 = tpu.matmul %122, %120, %cst_50 {dimension_numbers = #tpu.dot_dimension_numbers<[1], [1], [0], [0], [0, 0, 1, 0], [], []>} : vector<16x64xbf16>, vector<16x64xbf16>, vector<16x16xf32> -> vector<16x16xf32>
    %cst_51 = arith.constant dense<0xFF800000> : vector<16xf32>
    %124 = vector.multi_reduction <maximumf>, %123, %cst_51 [1] : vector<16x16xf32> to vector<16xf32>
    %125 = vector.shape_cast %124 : vector<16xf32> to vector<16x1xf32>
    %126 = vector.broadcast %125 : vector<16x1xf32> to vector<16x16xf32>
    %127 = arith.subf %123, %126 : vector<16x16xf32>
    %128 = math.exp %127 : vector<16x16xf32>
    %cst_52 = arith.constant dense<0.000000e+00> : vector<16xf32>
    %129 = vector.multi_reduction <add>, %128, %cst_52 [1] : vector<16x16xf32> to vector<16xf32>
    %130 = vector.shape_cast %129 : vector<16xf32> to vector<16x1xf32>
    %cst_53 = arith.constant 1.000000e+00 : f32
    %131 = vector.broadcast %cst_53 : f32 to vector<16x1xf32>
    %132 = arith.divf %131, %130 : vector<16x1xf32>
    %133 = vector.broadcast %132 : vector<16x1xf32> to vector<16x16xf32>
    %134 = arith.mulf %128, %133 : vector<16x16xf32>
    %135 = arith.truncf %134 : vector<16x16xf32> to vector<16x16xbf16>
    %cst_54 = arith.constant dense<0.000000e+00> : vector<16x64xf32>
    %136 = tpu.matmul %135, %121, %cst_54 {dimension_numbers = #tpu.dot_dimension_numbers<[1], [0], [0], [1], [0, 0, 1, 1], [], []>} : vector<16x16xbf16>, vector<16x64xbf16>, vector<16x64xf32> -> vector<16x64xf32>
    %137 = arith.truncf %136 : vector<16x64xf32> to vector<16x64xbf16>
    %c16_55 = arith.constant 16 : index
    %c64_56 = arith.constant 64 : index
    %138 = vector.load %arg15[%c16_55, %c64_56] : memref<32x128xbf16, #tpu.memory_space<vmem>>, vector<16x64xbf16>
    tpu.vector_store %arg15[%c16_55, %c64_56], %137 {strides = array<i32>} : memref<32x128xbf16, #tpu.memory_space<vmem>>, vector<16x64xbf16>,
    %c0_57 = arith.constant 0 : index
    %c0_58 = arith.constant 0 : index
    %139 = vector.load %arg15[%c0_57, %c0_58] : memref<32x128xbf16, #tpu.memory_space<vmem>>, vector<32x128xbf16>
    %cst_59 = arith.constant dense<0.000000e+00> : vector<32x128xf32>
    %140 = tpu.matmul %139, %55, %cst_59 {dimension_numbers = #tpu.dot_dimension_numbers<[1], [0], [0], [1], [0, 0, 1, 1], [], []>} : vector<32x128xbf16>, vector<128x128xbf16>, vector<32x128xf32> -> vector<32x128xf32>
    %141 = vector.broadcast %56 : vector<1x128xf32> to vector<32x128xf32>
    %142 = arith.addf %140, %141 : vector<32x128xf32>
    %c0_60 = arith.constant 0 : index
    %c0_61 = arith.constant 0 : index
    %143 = vector.load %arg11[%c0_60, %c0_61] : memref<1x128xf32, #tpu.memory_space<vmem>>, vector<1x128xf32>
    %c0_62 = arith.constant 0 : index
    %c0_63 = arith.constant 0 : index
    %144 = vector.load %arg12[%c0_62, %c0_63] : memref<1x128xf32, #tpu.memory_space<vmem>>, vector<1x128xf32>
    %145 = arith.addf %142, %57 : vector<32x128xf32>
    %cst_64 = arith.constant dense<0.000000e+00> : vector<32xf32>
    %146 = vector.multi_reduction <add>, %145, %cst_64 [1] : vector<32x128xf32> to vector<32xf32>
    %147 = vector.shape_cast %146 : vector<32xf32> to vector<32x1xf32>
    %cst_65 = arith.constant 1.280000e+02 : f32
    %148 = vector.broadcast %cst_65 : f32 to vector<32x1xf32>
    %149 = arith.divf %147, %148 : vector<32x1xf32>
    %150 = vector.broadcast %149 : vector<32x1xf32> to vector<32x128xf32>
    %151 = arith.subf %145, %150 : vector<32x128xf32>
    %152 = arith.mulf %151, %151 : vector<32x128xf32>
    %cst_66 = arith.constant dense<0.000000e+00> : vector<32xf32>
    %153 = vector.multi_reduction <add>, %152, %cst_66 [1] : vector<32x128xf32> to vector<32xf32>
    %154 = vector.shape_cast %153 : vector<32xf32> to vector<32x1xf32>
    %cst_67 = arith.constant 1.280000e+02 : f32
    %155 = vector.broadcast %cst_67 : f32 to vector<32x1xf32>
    %156 = arith.divf %154, %155 : vector<32x1xf32>
    %157 = vector.broadcast %149 : vector<32x1xf32> to vector<32x128xf32>
    %158 = arith.subf %145, %157 : vector<32x128xf32>
    %cst_68 = arith.constant 9.99999996E-13 : f32
    %159 = vector.broadcast %cst_68 : f32 to vector<32x1xf32>
    %160 = arith.addf %156, %159 : vector<32x1xf32>
    %161 = math.rsqrt %160 : vector<32x1xf32>
    %162 = vector.broadcast %161 : vector<32x1xf32> to vector<32x128xf32>
    %163 = arith.mulf %158, %162 : vector<32x128xf32>
    %164 = vector.broadcast %143 : vector<1x128xf32> to vector<32x128xf32>
    %165 = arith.mulf %163, %164 : vector<32x128xf32>
    %166 = vector.broadcast %144 : vector<1x128xf32> to vector<32x128xf32>
    %167 = arith.addf %165, %166 : vector<32x128xf32>
    %c0_69 = arith.constant 0 : index
    %c0_70 = arith.constant 0 : index
    %c0_71 = arith.constant 0 : index
    %168 = vector.load %arg13[%c0_69, %c0_70, %c0_71] : memref<2x16x128xbf16, #tpu.memory_space<vmem>>, vector<2x16x128xbf16>
    %169 = vector.shape_cast %168 : vector<2x16x128xbf16> to vector<32x128xbf16>
    %170 = arith.extf %169 : vector<32x128xbf16> to vector<32x128xf32>
    %171 = arith.addf %167, %170 : vector<32x128xf32>
    %172 = vector.shape_cast %171 : vector<32x128xf32> to vector<2x16x128xf32>
    %173 = arith.truncf %172 : vector<2x16x128xf32> to vector<2x16x128xbf16>
    %c0_72 = arith.constant 0 : index
    %c0_73 = arith.constant 0 : index
    %c0_74 = arith.constant 0 : index
    %174 = vector.load %arg14[%c0_72, %c0_73, %c0_74] : memref<2x16x128xbf16, #tpu.memory_space<vmem>>, vector<2x16x128xbf16>
    tpu.vector_store %arg14[%c0_72, %c0_73, %c0_74], %173 {strides = array<i32>} : memref<2x16x128xbf16, #tpu.memory_space<vmem>>, vector<2x16x128xbf16>,
    return
  }
  func.func @transform_0(%arg0: i32) -> (i32, i32, i32) {
    %c0_i32 = arith.constant 0 : i32
    %c0_i32_0 = arith.constant 0 : i32
    %c0_i32_1 = arith.constant 0 : i32
    return %arg0, %c0_i32, %c0_i32_0 : i32, i32, i32
  }
  func.func @transform_1(%arg0: i32) -> (i32, i32, i32) {
    %c0_i32 = arith.constant 0 : i32
    %c0_i32_0 = arith.constant 0 : i32
    %c0_i32_1 = arith.constant 0 : i32
    return %arg0, %c0_i32, %c0_i32_0 : i32, i32, i32
  }
  func.func @transform_2(%arg0: i32) -> (i32, i32) {
    %c0_i32 = arith.constant 0 : i32
    %c0_i32_0 = arith.constant 0 : i32
    %c0_i32_1 = arith.constant 0 : i32
    return %c0_i32, %c0_i32_0 : i32, i32
  }
  func.func @transform_3(%arg0: i32) -> (i32, i32) {
    %c0_i32 = arith.constant 0 : i32
    %c0_i32_0 = arith.constant 0 : i32
    %c0_i32_1 = arith.constant 0 : i32
    return %c0_i32, %c0_i32_0 : i32, i32
  }
  func.func @transform_4(%arg0: i32) -> (i32, i32) {
    %c0_i32 = arith.constant 0 : i32
    %c0_i32_0 = arith.constant 0 : i32
    %c0_i32_1 = arith.constant 0 : i32
    return %c0_i32, %c0_i32_0 : i32, i32
  }
  func.func @transform_5(%arg0: i32) -> (i32, i32) {
    %c0_i32 = arith.constant 0 : i32
    %c0_i32_0 = arith.constant 0 : i32
    %c0_i32_1 = arith.constant 0 : i32
    return %c0_i32, %c0_i32_0 : i32, i32
  }
  func.func @transform_6(%arg0: i32) -> (i32, i32) {
    %c0_i32 = arith.constant 0 : i32
    %c0_i32_0 = arith.constant 0 : i32
    %c0_i32_1 = arith.constant 0 : i32
    return %c0_i32, %c0_i32_0 : i32, i32
  }
  func.func @transform_7(%arg0: i32) -> (i32, i32) {
    %c0_i32 = arith.constant 0 : i32
    %c0_i32_0 = arith.constant 0 : i32
    %c0_i32_1 = arith.constant 0 : i32
    return %c0_i32, %c0_i32_0 : i32, i32
  }
  func.func @transform_8(%arg0: i32) -> (i32, i32) {
    %c0_i32 = arith.constant 0 : i32
    %c0_i32_0 = arith.constant 0 : i32
    %c0_i32_1 = arith.constant 0 : i32
    return %c0_i32, %c0_i32_0 : i32, i32
  }
  func.func @transform_9(%arg0: i32) -> (i32, i32) {
    %c0_i32 = arith.constant 0 : i32
    %c0_i32_0 = arith.constant 0 : i32
    %c0_i32_1 = arith.constant 0 : i32
    return %c0_i32, %c0_i32_0 : i32, i32
  }
  func.func @transform_10(%arg0: i32) -> (i32, i32) {
    %c0_i32 = arith.constant 0 : i32
    %c0_i32_0 = arith.constant 0 : i32
    %c0_i32_1 = arith.constant 0 : i32
    return %c0_i32, %c0_i32_0 : i32, i32
  }
  func.func @transform_11(%arg0: i32) -> (i32, i32) {
    %c0_i32 = arith.constant 0 : i32
    %c0_i32_0 = arith.constant 0 : i32
    %c0_i32_1 = arith.constant 0 : i32
    return %c0_i32, %c0_i32_0 : i32, i32
  }
  func.func @transform_12(%arg0: i32) -> (i32, i32, i32) {
    %c0_i32 = arith.constant 0 : i32
    %c0_i32_0 = arith.constant 0 : i32
    %c0_i32_1 = arith.constant 0 : i32
    return %arg0, %c0_i32, %c0_i32_0 : i32, i32, i32
  }
  func.func @transform_13(%arg0: i32) -> (i32, i32, i32) {
    %c0_i32 = arith.constant 0 : i32
    %c0_i32_0 = arith.constant 0 : i32
    %c0_i32_1 = arith.constant 0 : i32
    return %arg0, %c0_i32, %c0_i32_0 : i32, i32, i32
  }
}

module attributes {stable_mosaic.version = 11 : i64} {
  func.func @kernel(%arg0: i32, %arg1: memref<2x16x128xbf16, #tpu.memory_space<vmem>>, %arg2: memref<1x128xf32, #tpu.memory_space<vmem>>, %arg3: memref<1x128xf32, #tpu.memory_space<vmem>>, %arg4: memref<128x384xbf16, #tpu.memory_space<vmem>>, %arg5: memref<1x384xf32, #tpu.memory_space<vmem>>, %arg6: memref<128x128xbf16, #tpu.memory_space<vmem>>, %arg7: memref<1x128xf32, #tpu.memory_space<vmem>>, %arg8: memref<1x128xf32, #tpu.memory_space<vmem>>, %arg9: memref<1x128xf32, #tpu.memory_space<vmem>>, %arg10: memref<2x16x128xbf16, #tpu.memory_space<vmem>>, %arg11: memref<32x128xbf16, #tpu.memory_space<vmem>>) attributes {dimension_semantics = [#tpu.dimension_semantics<parallel>], iteration_bounds = array<i64: 1>, scalar_prefetch = 0 : i64, scratch_operands = 1 : i64, tpu.core_type = #tpu.core_type<tc>, window_params = [{transform_indices = @transform_0, window_bounds = array<i64: 2, 16, 128>}, {pipeline_mode = #tpu.pipeline_mode<synchronous>, transform_indices = @transform_1, window_bounds = array<i64: 1, 128>}, {pipeline_mode = #tpu.pipeline_mode<synchronous>, transform_indices = @transform_2, window_bounds = array<i64: 1, 128>}, {pipeline_mode = #tpu.pipeline_mode<synchronous>, transform_indices = @transform_3, window_bounds = array<i64: 128, 384>}, {pipeline_mode = #tpu.pipeline_mode<synchronous>, transform_indices = @transform_4, window_bounds = array<i64: 1, 384>}, {pipeline_mode = #tpu.pipeline_mode<synchronous>, transform_indices = @transform_5, window_bounds = array<i64: 128, 128>}, {pipeline_mode = #tpu.pipeline_mode<synchronous>, transform_indices = @transform_6, window_bounds = array<i64: 1, 128>}, {pipeline_mode = #tpu.pipeline_mode<synchronous>, transform_indices = @transform_7, window_bounds = array<i64: 1, 128>}, {pipeline_mode = #tpu.pipeline_mode<synchronous>, transform_indices = @transform_8, window_bounds = array<i64: 1, 128>}, {transform_indices = @transform_9, window_bounds = array<i64: 2, 16, 128>}]} {
    %c0 = arith.constant 0 : index
    %c0_0 = arith.constant 0 : index
    %c0_1 = arith.constant 0 : index
    %0 = vector.load %arg1[%c0, %c0_0, %c0_1] : memref<2x16x128xbf16, #tpu.memory_space<vmem>>, vector<2x16x128xbf16>
    %1 = arith.extf %0 : vector<2x16x128xbf16> to vector<2x16x128xf32>
    %c0_2 = arith.constant 0 : index
    %c0_3 = arith.constant 0 : index
    %2 = vector.load %arg2[%c0_2, %c0_3] : memref<1x128xf32, #tpu.memory_space<vmem>>, vector<1x128xf32>
    %c0_4 = arith.constant 0 : index
    %c0_5 = arith.constant 0 : index
    %3 = vector.load %arg3[%c0_4, %c0_5] : memref<1x128xf32, #tpu.memory_space<vmem>>, vector<1x128xf32>
    %cst = arith.constant dense<0.000000e+00> : vector<2x16xf32>
    %4 = vector.multi_reduction <add>, %1, %cst [2] : vector<2x16x128xf32> to vector<2x16xf32>
    %5 = vector.shape_cast %4 : vector<2x16xf32> to vector<2x16x1xf32>
    %cst_6 = arith.constant 1.280000e+02 : f32
    %6 = vector.broadcast %cst_6 : f32 to vector<2x16x1xf32>
    %7 = arith.divf %5, %6 : vector<2x16x1xf32>
    %8 = vector.broadcast %7 : vector<2x16x1xf32> to vector<2x16x128xf32>
    %9 = arith.subf %1, %8 : vector<2x16x128xf32>
    %10 = arith.mulf %9, %9 : vector<2x16x128xf32>
    %cst_7 = arith.constant dense<0.000000e+00> : vector<2x16xf32>
    %11 = vector.multi_reduction <add>, %10, %cst_7 [2] : vector<2x16x128xf32> to vector<2x16xf32>
    %12 = vector.shape_cast %11 : vector<2x16xf32> to vector<2x16x1xf32>
    %cst_8 = arith.constant 1.280000e+02 : f32
    %13 = vector.broadcast %cst_8 : f32 to vector<2x16x1xf32>
    %14 = arith.divf %12, %13 : vector<2x16x1xf32>
    %15 = vector.broadcast %7 : vector<2x16x1xf32> to vector<2x16x128xf32>
    %16 = arith.subf %1, %15 : vector<2x16x128xf32>
    %cst_9 = arith.constant 9.99999974E-6 : f32
    %17 = vector.broadcast %cst_9 : f32 to vector<2x16x1xf32>
    %18 = arith.addf %14, %17 : vector<2x16x1xf32>
    %19 = math.rsqrt %18 : vector<2x16x1xf32>
    %20 = vector.broadcast %19 : vector<2x16x1xf32> to vector<2x16x128xf32>
    %21 = arith.mulf %16, %20 : vector<2x16x128xf32>
    %22 = vector.shape_cast %2 : vector<1x128xf32> to vector<1x1x128xf32>
    %23 = vector.broadcast %22 : vector<1x1x128xf32> to vector<2x16x128xf32>
    %24 = arith.mulf %21, %23 : vector<2x16x128xf32>
    %25 = vector.shape_cast %3 : vector<1x128xf32> to vector<1x1x128xf32>
    %26 = vector.broadcast %25 : vector<1x1x128xf32> to vector<2x16x128xf32>
    %27 = arith.addf %24, %26 : vector<2x16x128xf32>
    %cst_10 = arith.constant 0.000000e+00 : f32
    %28 = vector.broadcast %cst_10 : f32 to vector<2x16x128xf32>
    %29 = arith.subf %28, %27 : vector<2x16x128xf32>
    %30 = math.exp %29 : vector<2x16x128xf32>
    %cst_11 = arith.constant 1.000000e+00 : f32
    %31 = vector.broadcast %cst_11 : f32 to vector<2x16x128xf32>
    %32 = arith.addf %31, %30 : vector<2x16x128xf32>
    %33 = tpu.reciprocal %32 {approx = true} : vector<2x16x128xf32> -> vector<2x16x128xf32>
    %34 = arith.mulf %27, %33 : vector<2x16x128xf32>
    %c0_12 = arith.constant 0 : index
    %c0_13 = arith.constant 0 : index
    %35 = vector.load %arg4[%c0_12, %c0_13] : memref<128x384xbf16, #tpu.memory_space<vmem>>, vector<128x384xbf16>
    %c0_14 = arith.constant 0 : index
    %c0_15 = arith.constant 0 : index
    %36 = vector.load %arg5[%c0_14, %c0_15] : memref<1x384xf32, #tpu.memory_space<vmem>>, vector<1x384xf32>
    %c0_16 = arith.constant 0 : index
    %c0_17 = arith.constant 0 : index
    %37 = vector.load %arg6[%c0_16, %c0_17] : memref<128x128xbf16, #tpu.memory_space<vmem>>, vector<128x128xbf16>
    %c0_18 = arith.constant 0 : index
    %c0_19 = arith.constant 0 : index
    %38 = vector.load %arg7[%c0_18, %c0_19] : memref<1x128xf32, #tpu.memory_space<vmem>>, vector<1x128xf32>
    %39 = vector.shape_cast %34 : vector<2x16x128xf32> to vector<32x128xf32>
    %40 = arith.truncf %39 : vector<32x128xf32> to vector<32x128xbf16>
    %cst_20 = arith.constant dense<0.000000e+00> : vector<32x384xf32>
    %41 = tpu.matmul %40, %35, %cst_20 {dimension_numbers = #tpu.dot_dimension_numbers<[1], [0], [0], [1], [0, 0, 1, 1], [], []>} : vector<32x128xbf16>, vector<128x384xbf16>, vector<32x384xf32> -> vector<32x384xf32>
    %42 = vector.broadcast %36 : vector<1x384xf32> to vector<32x384xf32>
    %43 = arith.addf %41, %42 : vector<32x384xf32>
    %44 = arith.truncf %43 : vector<32x384xf32> to vector<32x384xbf16>
    %45 = vector.extract_strided_slice %44 {offsets = [0, 128], sizes = [16, 64], strides = [1, 1]} : vector<32x384xbf16> to vector<16x64xbf16>
    %46 = vector.extract_strided_slice %44 {offsets = [0, 256], sizes = [16, 64], strides = [1, 1]} : vector<32x384xbf16> to vector<16x64xbf16>
    %47 = vector.extract_strided_slice %44 {offsets = [0, 0], sizes = [16, 64], strides = [1, 1]} : vector<32x384xbf16> to vector<16x64xbf16>
    %cst_21 = arith.constant dense<0.000000e+00> : vector<16x16xf32>
    %48 = tpu.matmul %47, %45, %cst_21 {dimension_numbers = #tpu.dot_dimension_numbers<[1], [1], [0], [0], [0, 0, 1, 0], [], []>} : vector<16x64xbf16>, vector<16x64xbf16>, vector<16x16xf32> -> vector<16x16xf32>
    %cst_22 = arith.constant dense<0xFF800000> : vector<16xf32>
    %49 = vector.multi_reduction <maximumf>, %48, %cst_22 [1] : vector<16x16xf32> to vector<16xf32>
    %50 = vector.shape_cast %49 : vector<16xf32> to vector<16x1xf32>
    %51 = vector.broadcast %50 : vector<16x1xf32> to vector<16x16xf32>
    %52 = arith.subf %48, %51 : vector<16x16xf32>
    %53 = math.exp %52 : vector<16x16xf32>
    %cst_23 = arith.constant dense<0.000000e+00> : vector<16xf32>
    %54 = vector.multi_reduction <add>, %53, %cst_23 [1] : vector<16x16xf32> to vector<16xf32>
    %55 = vector.shape_cast %54 : vector<16xf32> to vector<16x1xf32>
    %cst_24 = arith.constant 1.000000e+00 : f32
    %56 = vector.broadcast %cst_24 : f32 to vector<16x1xf32>
    %57 = arith.divf %56, %55 : vector<16x1xf32>
    %58 = vector.broadcast %57 : vector<16x1xf32> to vector<16x16xf32>
    %59 = arith.mulf %53, %58 : vector<16x16xf32>
    %60 = arith.truncf %59 : vector<16x16xf32> to vector<16x16xbf16>
    %cst_25 = arith.constant dense<0.000000e+00> : vector<16x64xf32>
    %61 = tpu.matmul %60, %46, %cst_25 {dimension_numbers = #tpu.dot_dimension_numbers<[1], [0], [0], [1], [0, 0, 1, 1], [], []>} : vector<16x16xbf16>, vector<16x64xbf16>, vector<16x64xf32> -> vector<16x64xf32>
    %62 = arith.truncf %61 : vector<16x64xf32> to vector<16x64xbf16>
    %c0_26 = arith.constant 0 : index
    %c0_27 = arith.constant 0 : index
    %63 = vector.load %arg11[%c0_26, %c0_27] : memref<32x128xbf16, #tpu.memory_space<vmem>>, vector<16x64xbf16>
    tpu.vector_store %arg11[%c0_26, %c0_27], %62 {strides = array<i32>} : memref<32x128xbf16, #tpu.memory_space<vmem>>, vector<16x64xbf16>,
    %64 = vector.extract_strided_slice %44 {offsets = [0, 192], sizes = [16, 64], strides = [1, 1]} : vector<32x384xbf16> to vector<16x64xbf16>
    %65 = vector.extract_strided_slice %44 {offsets = [0, 320], sizes = [16, 64], strides = [1, 1]} : vector<32x384xbf16> to vector<16x64xbf16>
    %66 = vector.extract_strided_slice %44 {offsets = [0, 64], sizes = [16, 64], strides = [1, 1]} : vector<32x384xbf16> to vector<16x64xbf16>
    %cst_28 = arith.constant dense<0.000000e+00> : vector<16x16xf32>
    %67 = tpu.matmul %66, %64, %cst_28 {dimension_numbers = #tpu.dot_dimension_numbers<[1], [1], [0], [0], [0, 0, 1, 0], [], []>} : vector<16x64xbf16>, vector<16x64xbf16>, vector<16x16xf32> -> vector<16x16xf32>
    %cst_29 = arith.constant dense<0xFF800000> : vector<16xf32>
    %68 = vector.multi_reduction <maximumf>, %67, %cst_29 [1] : vector<16x16xf32> to vector<16xf32>
    %69 = vector.shape_cast %68 : vector<16xf32> to vector<16x1xf32>
    %70 = vector.broadcast %69 : vector<16x1xf32> to vector<16x16xf32>
    %71 = arith.subf %67, %70 : vector<16x16xf32>
    %72 = math.exp %71 : vector<16x16xf32>
    %cst_30 = arith.constant dense<0.000000e+00> : vector<16xf32>
    %73 = vector.multi_reduction <add>, %72, %cst_30 [1] : vector<16x16xf32> to vector<16xf32>
    %74 = vector.shape_cast %73 : vector<16xf32> to vector<16x1xf32>
    %cst_31 = arith.constant 1.000000e+00 : f32
    %75 = vector.broadcast %cst_31 : f32 to vector<16x1xf32>
    %76 = arith.divf %75, %74 : vector<16x1xf32>
    %77 = vector.broadcast %76 : vector<16x1xf32> to vector<16x16xf32>
    %78 = arith.mulf %72, %77 : vector<16x16xf32>
    %79 = arith.truncf %78 : vector<16x16xf32> to vector<16x16xbf16>
    %cst_32 = arith.constant dense<0.000000e+00> : vector<16x64xf32>
    %80 = tpu.matmul %79, %65, %cst_32 {dimension_numbers = #tpu.dot_dimension_numbers<[1], [0], [0], [1], [0, 0, 1, 1], [], []>} : vector<16x16xbf16>, vector<16x64xbf16>, vector<16x64xf32> -> vector<16x64xf32>
    %81 = arith.truncf %80 : vector<16x64xf32> to vector<16x64xbf16>
    %c0_33 = arith.constant 0 : index
    %c64 = arith.constant 64 : index
    %82 = vector.load %arg11[%c0_33, %c64] : memref<32x128xbf16, #tpu.memory_space<vmem>>, vector<16x64xbf16>
    tpu.vector_store %arg11[%c0_33, %c64], %81 {strides = array<i32>} : memref<32x128xbf16, #tpu.memory_space<vmem>>, vector<16x64xbf16>,
    %83 = vector.extract_strided_slice %44 {offsets = [16, 128], sizes = [16, 64], strides = [1, 1]} : vector<32x384xbf16> to vector<16x64xbf16>
    %84 = vector.extract_strided_slice %44 {offsets = [16, 256], sizes = [16, 64], strides = [1, 1]} : vector<32x384xbf16> to vector<16x64xbf16>
    %85 = vector.extract_strided_slice %44 {offsets = [16, 0], sizes = [16, 64], strides = [1, 1]} : vector<32x384xbf16> to vector<16x64xbf16>
    %cst_34 = arith.constant dense<0.000000e+00> : vector<16x16xf32>
    %86 = tpu.matmul %85, %83, %cst_34 {dimension_numbers = #tpu.dot_dimension_numbers<[1], [1], [0], [0], [0, 0, 1, 0], [], []>} : vector<16x64xbf16>, vector<16x64xbf16>, vector<16x16xf32> -> vector<16x16xf32>
    %cst_35 = arith.constant dense<0xFF800000> : vector<16xf32>
    %87 = vector.multi_reduction <maximumf>, %86, %cst_35 [1] : vector<16x16xf32> to vector<16xf32>
    %88 = vector.shape_cast %87 : vector<16xf32> to vector<16x1xf32>
    %89 = vector.broadcast %88 : vector<16x1xf32> to vector<16x16xf32>
    %90 = arith.subf %86, %89 : vector<16x16xf32>
    %91 = math.exp %90 : vector<16x16xf32>
    %cst_36 = arith.constant dense<0.000000e+00> : vector<16xf32>
    %92 = vector.multi_reduction <add>, %91, %cst_36 [1] : vector<16x16xf32> to vector<16xf32>
    %93 = vector.shape_cast %92 : vector<16xf32> to vector<16x1xf32>
    %cst_37 = arith.constant 1.000000e+00 : f32
    %94 = vector.broadcast %cst_37 : f32 to vector<16x1xf32>
    %95 = arith.divf %94, %93 : vector<16x1xf32>
    %96 = vector.broadcast %95 : vector<16x1xf32> to vector<16x16xf32>
    %97 = arith.mulf %91, %96 : vector<16x16xf32>
    %98 = arith.truncf %97 : vector<16x16xf32> to vector<16x16xbf16>
    %cst_38 = arith.constant dense<0.000000e+00> : vector<16x64xf32>
    %99 = tpu.matmul %98, %84, %cst_38 {dimension_numbers = #tpu.dot_dimension_numbers<[1], [0], [0], [1], [0, 0, 1, 1], [], []>} : vector<16x16xbf16>, vector<16x64xbf16>, vector<16x64xf32> -> vector<16x64xf32>
    %100 = arith.truncf %99 : vector<16x64xf32> to vector<16x64xbf16>
    %c16 = arith.constant 16 : index
    %c0_39 = arith.constant 0 : index
    %101 = vector.load %arg11[%c16, %c0_39] : memref<32x128xbf16, #tpu.memory_space<vmem>>, vector<16x64xbf16>
    tpu.vector_store %arg11[%c16, %c0_39], %100 {strides = array<i32>} : memref<32x128xbf16, #tpu.memory_space<vmem>>, vector<16x64xbf16>,
    %102 = vector.extract_strided_slice %44 {offsets = [16, 192], sizes = [16, 64], strides = [1, 1]} : vector<32x384xbf16> to vector<16x64xbf16>
    %103 = vector.extract_strided_slice %44 {offsets = [16, 320], sizes = [16, 64], strides = [1, 1]} : vector<32x384xbf16> to vector<16x64xbf16>
    %104 = vector.extract_strided_slice %44 {offsets = [16, 64], sizes = [16, 64], strides = [1, 1]} : vector<32x384xbf16> to vector<16x64xbf16>
    %cst_40 = arith.constant dense<0.000000e+00> : vector<16x16xf32>
    %105 = tpu.matmul %104, %102, %cst_40 {dimension_numbers = #tpu.dot_dimension_numbers<[1], [1], [0], [0], [0, 0, 1, 0], [], []>} : vector<16x64xbf16>, vector<16x64xbf16>, vector<16x16xf32> -> vector<16x16xf32>
    %cst_41 = arith.constant dense<0xFF800000> : vector<16xf32>
    %106 = vector.multi_reduction <maximumf>, %105, %cst_41 [1] : vector<16x16xf32> to vector<16xf32>
    %107 = vector.shape_cast %106 : vector<16xf32> to vector<16x1xf32>
    %108 = vector.broadcast %107 : vector<16x1xf32> to vector<16x16xf32>
    %109 = arith.subf %105, %108 : vector<16x16xf32>
    %110 = math.exp %109 : vector<16x16xf32>
    %cst_42 = arith.constant dense<0.000000e+00> : vector<16xf32>
    %111 = vector.multi_reduction <add>, %110, %cst_42 [1] : vector<16x16xf32> to vector<16xf32>
    %112 = vector.shape_cast %111 : vector<16xf32> to vector<16x1xf32>
    %cst_43 = arith.constant 1.000000e+00 : f32
    %113 = vector.broadcast %cst_43 : f32 to vector<16x1xf32>
    %114 = arith.divf %113, %112 : vector<16x1xf32>
    %115 = vector.broadcast %114 : vector<16x1xf32> to vector<16x16xf32>
    %116 = arith.mulf %110, %115 : vector<16x16xf32>
    %117 = arith.truncf %116 : vector<16x16xf32> to vector<16x16xbf16>
    %cst_44 = arith.constant dense<0.000000e+00> : vector<16x64xf32>
    %118 = tpu.matmul %117, %103, %cst_44 {dimension_numbers = #tpu.dot_dimension_numbers<[1], [0], [0], [1], [0, 0, 1, 1], [], []>} : vector<16x16xbf16>, vector<16x64xbf16>, vector<16x64xf32> -> vector<16x64xf32>
    %119 = arith.truncf %118 : vector<16x64xf32> to vector<16x64xbf16>
    %c16_45 = arith.constant 16 : index
    %c64_46 = arith.constant 64 : index
    %120 = vector.load %arg11[%c16_45, %c64_46] : memref<32x128xbf16, #tpu.memory_space<vmem>>, vector<16x64xbf16>
    tpu.vector_store %arg11[%c16_45, %c64_46], %119 {strides = array<i32>} : memref<32x128xbf16, #tpu.memory_space<vmem>>, vector<16x64xbf16>,
    %c0_47 = arith.constant 0 : index
    %c0_48 = arith.constant 0 : index
    %121 = vector.load %arg11[%c0_47, %c0_48] : memref<32x128xbf16, #tpu.memory_space<vmem>>, vector<32x128xbf16>
    %cst_49 = arith.constant dense<0.000000e+00> : vector<32x128xf32>
    %122 = tpu.matmul %121, %37, %cst_49 {dimension_numbers = #tpu.dot_dimension_numbers<[1], [0], [0], [1], [0, 0, 1, 1], [], []>} : vector<32x128xbf16>, vector<128x128xbf16>, vector<32x128xf32> -> vector<32x128xf32>
    %123 = vector.broadcast %38 : vector<1x128xf32> to vector<32x128xf32>
    %124 = arith.addf %122, %123 : vector<32x128xf32>
    %c0_50 = arith.constant 0 : index
    %c0_51 = arith.constant 0 : index
    %125 = vector.load %arg8[%c0_50, %c0_51] : memref<1x128xf32, #tpu.memory_space<vmem>>, vector<1x128xf32>
    %c0_52 = arith.constant 0 : index
    %c0_53 = arith.constant 0 : index
    %126 = vector.load %arg9[%c0_52, %c0_53] : memref<1x128xf32, #tpu.memory_space<vmem>>, vector<1x128xf32>
    %127 = arith.addf %124, %39 : vector<32x128xf32>
    %cst_54 = arith.constant dense<0.000000e+00> : vector<32xf32>
    %128 = vector.multi_reduction <add>, %127, %cst_54 [1] : vector<32x128xf32> to vector<32xf32>
    %129 = vector.shape_cast %128 : vector<32xf32> to vector<32x1xf32>
    %cst_55 = arith.constant 1.280000e+02 : f32
    %130 = vector.broadcast %cst_55 : f32 to vector<32x1xf32>
    %131 = arith.divf %129, %130 : vector<32x1xf32>
    %132 = vector.broadcast %131 : vector<32x1xf32> to vector<32x128xf32>
    %133 = arith.subf %127, %132 : vector<32x128xf32>
    %134 = arith.mulf %133, %133 : vector<32x128xf32>
    %cst_56 = arith.constant dense<0.000000e+00> : vector<32xf32>
    %135 = vector.multi_reduction <add>, %134, %cst_56 [1] : vector<32x128xf32> to vector<32xf32>
    %136 = vector.shape_cast %135 : vector<32xf32> to vector<32x1xf32>
    %cst_57 = arith.constant 1.280000e+02 : f32
    %137 = vector.broadcast %cst_57 : f32 to vector<32x1xf32>
    %138 = arith.divf %136, %137 : vector<32x1xf32>
    %139 = vector.broadcast %131 : vector<32x1xf32> to vector<32x128xf32>
    %140 = arith.subf %127, %139 : vector<32x128xf32>
    %cst_58 = arith.constant 9.99999996E-13 : f32
    %141 = vector.broadcast %cst_58 : f32 to vector<32x1xf32>
    %142 = arith.addf %138, %141 : vector<32x1xf32>
    %143 = math.rsqrt %142 : vector<32x1xf32>
    %144 = vector.broadcast %143 : vector<32x1xf32> to vector<32x128xf32>
    %145 = arith.mulf %140, %144 : vector<32x128xf32>
    %146 = vector.broadcast %125 : vector<1x128xf32> to vector<32x128xf32>
    %147 = arith.mulf %145, %146 : vector<32x128xf32>
    %148 = vector.broadcast %126 : vector<1x128xf32> to vector<32x128xf32>
    %149 = arith.addf %147, %148 : vector<32x128xf32>
    %150 = vector.shape_cast %149 : vector<32x128xf32> to vector<2x16x128xf32>
    %151 = arith.truncf %150 : vector<2x16x128xf32> to vector<2x16x128xbf16>
    %c0_59 = arith.constant 0 : index
    %c0_60 = arith.constant 0 : index
    %c0_61 = arith.constant 0 : index
    %152 = vector.load %arg10[%c0_59, %c0_60, %c0_61] : memref<2x16x128xbf16, #tpu.memory_space<vmem>>, vector<2x16x128xbf16>
    tpu.vector_store %arg10[%c0_59, %c0_60, %c0_61], %151 {strides = array<i32>} : memref<2x16x128xbf16, #tpu.memory_space<vmem>>, vector<2x16x128xbf16>,
    return
  }
  func.func @transform_0(%arg0: i32) -> (i32, i32, i32) {
    %c0_i32 = arith.constant 0 : i32
    %c0_i32_0 = arith.constant 0 : i32
    %c0_i32_1 = arith.constant 0 : i32
    return %arg0, %c0_i32, %c0_i32_0 : i32, i32, i32
  }
  func.func @transform_1(%arg0: i32) -> (i32, i32) {
    %c0_i32 = arith.constant 0 : i32
    %c0_i32_0 = arith.constant 0 : i32
    %c0_i32_1 = arith.constant 0 : i32
    return %c0_i32, %c0_i32_0 : i32, i32
  }
  func.func @transform_2(%arg0: i32) -> (i32, i32) {
    %c0_i32 = arith.constant 0 : i32
    %c0_i32_0 = arith.constant 0 : i32
    %c0_i32_1 = arith.constant 0 : i32
    return %c0_i32, %c0_i32_0 : i32, i32
  }
  func.func @transform_3(%arg0: i32) -> (i32, i32) {
    %c0_i32 = arith.constant 0 : i32
    %c0_i32_0 = arith.constant 0 : i32
    %c0_i32_1 = arith.constant 0 : i32
    return %c0_i32, %c0_i32_0 : i32, i32
  }
  func.func @transform_4(%arg0: i32) -> (i32, i32) {
    %c0_i32 = arith.constant 0 : i32
    %c0_i32_0 = arith.constant 0 : i32
    %c0_i32_1 = arith.constant 0 : i32
    return %c0_i32, %c0_i32_0 : i32, i32
  }
  func.func @transform_5(%arg0: i32) -> (i32, i32) {
    %c0_i32 = arith.constant 0 : i32
    %c0_i32_0 = arith.constant 0 : i32
    %c0_i32_1 = arith.constant 0 : i32
    return %c0_i32, %c0_i32_0 : i32, i32
  }
  func.func @transform_6(%arg0: i32) -> (i32, i32) {
    %c0_i32 = arith.constant 0 : i32
    %c0_i32_0 = arith.constant 0 : i32
    %c0_i32_1 = arith.constant 0 : i32
    return %c0_i32, %c0_i32_0 : i32, i32
  }
  func.func @transform_7(%arg0: i32) -> (i32, i32) {
    %c0_i32 = arith.constant 0 : i32
    %c0_i32_0 = arith.constant 0 : i32
    %c0_i32_1 = arith.constant 0 : i32
    return %c0_i32, %c0_i32_0 : i32, i32
  }
  func.func @transform_8(%arg0: i32) -> (i32, i32) {
    %c0_i32 = arith.constant 0 : i32
    %c0_i32_0 = arith.constant 0 : i32
    %c0_i32_1 = arith.constant 0 : i32
    return %c0_i32, %c0_i32_0 : i32, i32
  }
  func.func @transform_9(%arg0: i32) -> (i32, i32, i32) {
    %c0_i32 = arith.constant 0 : i32
    %c0_i32_0 = arith.constant 0 : i32
    %c0_i32_1 = arith.constant 0 : i32
    return %arg0, %c0_i32, %c0_i32_0 : i32, i32, i32
  }
}

module attributes {stable_mosaic.version = 11 : i64} {
  func.func @kernel(%arg0: i32, %arg1: memref<2x16x128xbf16, #tpu.memory_space<vmem>>, %arg2: memref<2x1x256xf32, #tpu.memory_space<vmem>>, %arg3: memref<256x128xbf16, #tpu.memory_space<vmem>>, %arg4: memref<1x128xf32, #tpu.memory_space<vmem>>, %arg5: memref<1x128xf32, #tpu.memory_space<vmem>>, %arg6: memref<1x128xf32, #tpu.memory_space<vmem>>, %arg7: memref<128x384xbf16, #tpu.memory_space<vmem>>, %arg8: memref<1x384xf32, #tpu.memory_space<vmem>>, %arg9: memref<128x128xbf16, #tpu.memory_space<vmem>>, %arg10: memref<1x128xf32, #tpu.memory_space<vmem>>, %arg11: memref<1x128xf32, #tpu.memory_space<vmem>>, %arg12: memref<1x128xf32, #tpu.memory_space<vmem>>, %arg13: memref<2x16x128xbf16, #tpu.memory_space<vmem>>, %arg14: memref<2x16x128xf32, #tpu.memory_space<vmem>>, %arg15: memref<32x128xbf16, #tpu.memory_space<vmem>>) attributes {dimension_semantics = [#tpu.dimension_semantics<parallel>], iteration_bounds = array<i64: 1>, scalar_prefetch = 0 : i64, scratch_operands = 1 : i64, tpu.core_type = #tpu.core_type<tc>, window_params = [{transform_indices = @transform_0, window_bounds = array<i64: 2, 16, 128>}, {transform_indices = @transform_1, window_bounds = array<i64: 2, 1, 256>}, {pipeline_mode = #tpu.pipeline_mode<synchronous>, transform_indices = @transform_2, window_bounds = array<i64: 256, 128>}, {pipeline_mode = #tpu.pipeline_mode<synchronous>, transform_indices = @transform_3, window_bounds = array<i64: 1, 128>}, {pipeline_mode = #tpu.pipeline_mode<synchronous>, transform_indices = @transform_4, window_bounds = array<i64: 1, 128>}, {pipeline_mode = #tpu.pipeline_mode<synchronous>, transform_indices = @transform_5, window_bounds = array<i64: 1, 128>}, {pipeline_mode = #tpu.pipeline_mode<synchronous>, transform_indices = @transform_6, window_bounds = array<i64: 128, 384>}, {pipeline_mode = #tpu.pipeline_mode<synchronous>, transform_indices = @transform_7, window_bounds = array<i64: 1, 384>}, {pipeline_mode = #tpu.pipeline_mode<synchronous>, transform_indices = @transform_8, window_bounds = array<i64: 128, 128>}, {pipeline_mode = #tpu.pipeline_mode<synchronous>, transform_indices = @transform_9, window_bounds = array<i64: 1, 128>}, {pipeline_mode = #tpu.pipeline_mode<synchronous>, transform_indices = @transform_10, window_bounds = array<i64: 1, 128>}, {pipeline_mode = #tpu.pipeline_mode<synchronous>, transform_indices = @transform_11, window_bounds = array<i64: 1, 128>}, {transform_indices = @transform_12, window_bounds = array<i64: 2, 16, 128>}, {transform_indices = @transform_13, window_bounds = array<i64: 2, 16, 128>}]} {
    %c0 = arith.constant 0 : index
    %c0_0 = arith.constant 0 : index
    %c0_1 = arith.constant 0 : index
    %0 = vector.load %arg1[%c0, %c0_0, %c0_1] : memref<2x16x128xbf16, #tpu.memory_space<vmem>>, vector<2x16x128xbf16>
    %1 = arith.extf %0 : vector<2x16x128xbf16> to vector<2x16x128xf32>
    %c0_2 = arith.constant 0 : index
    %c0_3 = arith.constant 0 : index
    %c0_4 = arith.constant 0 : index
    %2 = vector.load %arg2[%c0_2, %c0_3, %c0_4] : memref<2x1x256xf32, #tpu.memory_space<vmem>>, vector<2x1x256xf32>
    %3 = vector.shape_cast %2 : vector<2x1x256xf32> to vector<2x256xf32>
    %cst = arith.constant 0.000000e+00 : f32
    %4 = vector.broadcast %cst : f32 to vector<2x256xf32>
    %5 = arith.subf %4, %3 : vector<2x256xf32>
    %6 = math.exp %5 : vector<2x256xf32>
    %cst_5 = arith.constant 1.000000e+00 : f32
    %7 = vector.broadcast %cst_5 : f32 to vector<2x256xf32>
    %8 = arith.addf %7, %6 : vector<2x256xf32>
    %9 = tpu.reciprocal %8 {approx = true} : vector<2x256xf32> -> vector<2x256xf32>
    %10 = arith.mulf %3, %9 : vector<2x256xf32>
    %c0_6 = arith.constant 0 : index
    %c0_7 = arith.constant 0 : index
    %11 = vector.load %arg3[%c0_6, %c0_7] : memref<256x128xbf16, #tpu.memory_space<vmem>>, vector<256x128xbf16>
    %12 = arith.truncf %10 : vector<2x256xf32> to vector<2x256xbf16>
    %cst_8 = arith.constant dense<0.000000e+00> : vector<2x128xf32>
    %13 = tpu.matmul %12, %11, %cst_8 {dimension_numbers = #tpu.dot_dimension_numbers<[1], [0], [0], [1], [0, 0, 1, 1], [], []>} : vector<2x256xbf16>, vector<256x128xbf16>, vector<2x128xf32> -> vector<2x128xf32>
    %c0_9 = arith.constant 0 : index
    %c0_10 = arith.constant 0 : index
    %14 = vector.load %arg4[%c0_9, %c0_10] : memref<1x128xf32, #tpu.memory_space<vmem>>, vector<1x128xf32>
    %15 = vector.broadcast %14 : vector<1x128xf32> to vector<2x128xf32>
    %16 = arith.addf %13, %15 : vector<2x128xf32>
    %17 = vector.shape_cast %16 : vector<2x128xf32> to vector<2x1x128xf32>
    %18 = vector.broadcast %17 : vector<2x1x128xf32> to vector<2x16x128xf32>
    %19 = arith.addf %1, %18 : vector<2x16x128xf32>
    %c0_11 = arith.constant 0 : index
    %c0_12 = arith.constant 0 : index
    %20 = vector.load %arg5[%c0_11, %c0_12] : memref<1x128xf32, #tpu.memory_space<vmem>>, vector<1x128xf32>
    %c0_13 = arith.constant 0 : index
    %c0_14 = arith.constant 0 : index
    %21 = vector.load %arg6[%c0_13, %c0_14] : memref<1x128xf32, #tpu.memory_space<vmem>>, vector<1x128xf32>
    %cst_15 = arith.constant dense<0.000000e+00> : vector<2x16xf32>
    %22 = vector.multi_reduction <add>, %19, %cst_15 [2] : vector<2x16x128xf32> to vector<2x16xf32>
    %23 = vector.shape_cast %22 : vector<2x16xf32> to vector<2x16x1xf32>
    %cst_16 = arith.constant 1.280000e+02 : f32
    %24 = vector.broadcast %cst_16 : f32 to vector<2x16x1xf32>
    %25 = arith.divf %23, %24 : vector<2x16x1xf32>
    %26 = vector.broadcast %25 : vector<2x16x1xf32> to vector<2x16x128xf32>
    %27 = arith.subf %19, %26 : vector<2x16x128xf32>
    %28 = arith.mulf %27, %27 : vector<2x16x128xf32>
    %cst_17 = arith.constant dense<0.000000e+00> : vector<2x16xf32>
    %29 = vector.multi_reduction <add>, %28, %cst_17 [2] : vector<2x16x128xf32> to vector<2x16xf32>
    %30 = vector.shape_cast %29 : vector<2x16xf32> to vector<2x16x1xf32>
    %cst_18 = arith.constant 1.280000e+02 : f32
    %31 = vector.broadcast %cst_18 : f32 to vector<2x16x1xf32>
    %32 = arith.divf %30, %31 : vector<2x16x1xf32>
    %33 = vector.broadcast %25 : vector<2x16x1xf32> to vector<2x16x128xf32>
    %34 = arith.subf %19, %33 : vector<2x16x128xf32>
    %cst_19 = arith.constant 9.99999974E-6 : f32
    %35 = vector.broadcast %cst_19 : f32 to vector<2x16x1xf32>
    %36 = arith.addf %32, %35 : vector<2x16x1xf32>
    %37 = math.rsqrt %36 : vector<2x16x1xf32>
    %38 = vector.broadcast %37 : vector<2x16x1xf32> to vector<2x16x128xf32>
    %39 = arith.mulf %34, %38 : vector<2x16x128xf32>
    %40 = vector.shape_cast %20 : vector<1x128xf32> to vector<1x1x128xf32>
    %41 = vector.broadcast %40 : vector<1x1x128xf32> to vector<2x16x128xf32>
    %42 = arith.mulf %39, %41 : vector<2x16x128xf32>
    %43 = vector.shape_cast %21 : vector<1x128xf32> to vector<1x1x128xf32>
    %44 = vector.broadcast %43 : vector<1x1x128xf32> to vector<2x16x128xf32>
    %45 = arith.addf %42, %44 : vector<2x16x128xf32>
    %cst_20 = arith.constant 0.000000e+00 : f32
    %46 = vector.broadcast %cst_20 : f32 to vector<2x16x128xf32>
    %47 = arith.subf %46, %45 : vector<2x16x128xf32>
    %48 = math.exp %47 : vector<2x16x128xf32>
    %cst_21 = arith.constant 1.000000e+00 : f32
    %49 = vector.broadcast %cst_21 : f32 to vector<2x16x128xf32>
    %50 = arith.addf %49, %48 : vector<2x16x128xf32>
    %51 = tpu.reciprocal %50 {approx = true} : vector<2x16x128xf32> -> vector<2x16x128xf32>
    %52 = arith.mulf %45, %51 : vector<2x16x128xf32>
    %c0_22 = arith.constant 0 : index
    %c0_23 = arith.constant 0 : index
    %53 = vector.load %arg7[%c0_22, %c0_23] : memref<128x384xbf16, #tpu.memory_space<vmem>>, vector<128x384xbf16>
    %c0_24 = arith.constant 0 : index
    %c0_25 = arith.constant 0 : index
    %54 = vector.load %arg8[%c0_24, %c0_25] : memref<1x384xf32, #tpu.memory_space<vmem>>, vector<1x384xf32>
    %c0_26 = arith.constant 0 : index
    %c0_27 = arith.constant 0 : index
    %55 = vector.load %arg9[%c0_26, %c0_27] : memref<128x128xbf16, #tpu.memory_space<vmem>>, vector<128x128xbf16>
    %c0_28 = arith.constant 0 : index
    %c0_29 = arith.constant 0 : index
    %56 = vector.load %arg10[%c0_28, %c0_29] : memref<1x128xf32, #tpu.memory_space<vmem>>, vector<1x128xf32>
    %57 = vector.shape_cast %52 : vector<2x16x128xf32> to vector<32x128xf32>
    %58 = arith.truncf %57 : vector<32x128xf32> to vector<32x128xbf16>
    %cst_30 = arith.constant dense<0.000000e+00> : vector<32x384xf32>
    %59 = tpu.matmul %58, %53, %cst_30 {dimension_numbers = #tpu.dot_dimension_numbers<[1], [0], [0], [1], [0, 0, 1, 1], [], []>} : vector<32x128xbf16>, vector<128x384xbf16>, vector<32x384xf32> -> vector<32x384xf32>
    %60 = vector.broadcast %54 : vector<1x384xf32> to vector<32x384xf32>
    %61 = arith.addf %59, %60 : vector<32x384xf32>
    %62 = arith.truncf %61 : vector<32x384xf32> to vector<32x384xbf16>
    %63 = vector.extract_strided_slice %62 {offsets = [0, 128], sizes = [16, 64], strides = [1, 1]} : vector<32x384xbf16> to vector<16x64xbf16>
    %64 = vector.extract_strided_slice %62 {offsets = [0, 256], sizes = [16, 64], strides = [1, 1]} : vector<32x384xbf16> to vector<16x64xbf16>
    %65 = vector.extract_strided_slice %62 {offsets = [0, 0], sizes = [16, 64], strides = [1, 1]} : vector<32x384xbf16> to vector<16x64xbf16>
    %cst_31 = arith.constant dense<0.000000e+00> : vector<16x16xf32>
    %66 = tpu.matmul %65, %63, %cst_31 {dimension_numbers = #tpu.dot_dimension_numbers<[1], [1], [0], [0], [0, 0, 1, 0], [], []>} : vector<16x64xbf16>, vector<16x64xbf16>, vector<16x16xf32> -> vector<16x16xf32>
    %cst_32 = arith.constant dense<0xFF800000> : vector<16xf32>
    %67 = vector.multi_reduction <maximumf>, %66, %cst_32 [1] : vector<16x16xf32> to vector<16xf32>
    %68 = vector.shape_cast %67 : vector<16xf32> to vector<16x1xf32>
    %69 = vector.broadcast %68 : vector<16x1xf32> to vector<16x16xf32>
    %70 = arith.subf %66, %69 : vector<16x16xf32>
    %71 = math.exp %70 : vector<16x16xf32>
    %cst_33 = arith.constant dense<0.000000e+00> : vector<16xf32>
    %72 = vector.multi_reduction <add>, %71, %cst_33 [1] : vector<16x16xf32> to vector<16xf32>
    %73 = vector.shape_cast %72 : vector<16xf32> to vector<16x1xf32>
    %cst_34 = arith.constant 1.000000e+00 : f32
    %74 = vector.broadcast %cst_34 : f32 to vector<16x1xf32>
    %75 = arith.divf %74, %73 : vector<16x1xf32>
    %76 = vector.broadcast %75 : vector<16x1xf32> to vector<16x16xf32>
    %77 = arith.mulf %71, %76 : vector<16x16xf32>
    %78 = arith.truncf %77 : vector<16x16xf32> to vector<16x16xbf16>
    %cst_35 = arith.constant dense<0.000000e+00> : vector<16x64xf32>
    %79 = tpu.matmul %78, %64, %cst_35 {dimension_numbers = #tpu.dot_dimension_numbers<[1], [0], [0], [1], [0, 0, 1, 1], [], []>} : vector<16x16xbf16>, vector<16x64xbf16>, vector<16x64xf32> -> vector<16x64xf32>
    %80 = arith.truncf %79 : vector<16x64xf32> to vector<16x64xbf16>
    %c0_36 = arith.constant 0 : index
    %c0_37 = arith.constant 0 : index
    %81 = vector.load %arg15[%c0_36, %c0_37] : memref<32x128xbf16, #tpu.memory_space<vmem>>, vector<16x64xbf16>
    tpu.vector_store %arg15[%c0_36, %c0_37], %80 {strides = array<i32>} : memref<32x128xbf16, #tpu.memory_space<vmem>>, vector<16x64xbf16>,
    %82 = vector.extract_strided_slice %62 {offsets = [0, 192], sizes = [16, 64], strides = [1, 1]} : vector<32x384xbf16> to vector<16x64xbf16>
    %83 = vector.extract_strided_slice %62 {offsets = [0, 320], sizes = [16, 64], strides = [1, 1]} : vector<32x384xbf16> to vector<16x64xbf16>
    %84 = vector.extract_strided_slice %62 {offsets = [0, 64], sizes = [16, 64], strides = [1, 1]} : vector<32x384xbf16> to vector<16x64xbf16>
    %cst_38 = arith.constant dense<0.000000e+00> : vector<16x16xf32>
    %85 = tpu.matmul %84, %82, %cst_38 {dimension_numbers = #tpu.dot_dimension_numbers<[1], [1], [0], [0], [0, 0, 1, 0], [], []>} : vector<16x64xbf16>, vector<16x64xbf16>, vector<16x16xf32> -> vector<16x16xf32>
    %cst_39 = arith.constant dense<0xFF800000> : vector<16xf32>
    %86 = vector.multi_reduction <maximumf>, %85, %cst_39 [1] : vector<16x16xf32> to vector<16xf32>
    %87 = vector.shape_cast %86 : vector<16xf32> to vector<16x1xf32>
    %88 = vector.broadcast %87 : vector<16x1xf32> to vector<16x16xf32>
    %89 = arith.subf %85, %88 : vector<16x16xf32>
    %90 = math.exp %89 : vector<16x16xf32>
    %cst_40 = arith.constant dense<0.000000e+00> : vector<16xf32>
    %91 = vector.multi_reduction <add>, %90, %cst_40 [1] : vector<16x16xf32> to vector<16xf32>
    %92 = vector.shape_cast %91 : vector<16xf32> to vector<16x1xf32>
    %cst_41 = arith.constant 1.000000e+00 : f32
    %93 = vector.broadcast %cst_41 : f32 to vector<16x1xf32>
    %94 = arith.divf %93, %92 : vector<16x1xf32>
    %95 = vector.broadcast %94 : vector<16x1xf32> to vector<16x16xf32>
    %96 = arith.mulf %90, %95 : vector<16x16xf32>
    %97 = arith.truncf %96 : vector<16x16xf32> to vector<16x16xbf16>
    %cst_42 = arith.constant dense<0.000000e+00> : vector<16x64xf32>
    %98 = tpu.matmul %97, %83, %cst_42 {dimension_numbers = #tpu.dot_dimension_numbers<[1], [0], [0], [1], [0, 0, 1, 1], [], []>} : vector<16x16xbf16>, vector<16x64xbf16>, vector<16x64xf32> -> vector<16x64xf32>
    %99 = arith.truncf %98 : vector<16x64xf32> to vector<16x64xbf16>
    %c0_43 = arith.constant 0 : index
    %c64 = arith.constant 64 : index
    %100 = vector.load %arg15[%c0_43, %c64] : memref<32x128xbf16, #tpu.memory_space<vmem>>, vector<16x64xbf16>
    tpu.vector_store %arg15[%c0_43, %c64], %99 {strides = array<i32>} : memref<32x128xbf16, #tpu.memory_space<vmem>>, vector<16x64xbf16>,
    %101 = vector.extract_strided_slice %62 {offsets = [16, 128], sizes = [16, 64], strides = [1, 1]} : vector<32x384xbf16> to vector<16x64xbf16>
    %102 = vector.extract_strided_slice %62 {offsets = [16, 256], sizes = [16, 64], strides = [1, 1]} : vector<32x384xbf16> to vector<16x64xbf16>
    %103 = vector.extract_strided_slice %62 {offsets = [16, 0], sizes = [16, 64], strides = [1, 1]} : vector<32x384xbf16> to vector<16x64xbf16>
    %cst_44 = arith.constant dense<0.000000e+00> : vector<16x16xf32>
    %104 = tpu.matmul %103, %101, %cst_44 {dimension_numbers = #tpu.dot_dimension_numbers<[1], [1], [0], [0], [0, 0, 1, 0], [], []>} : vector<16x64xbf16>, vector<16x64xbf16>, vector<16x16xf32> -> vector<16x16xf32>
    %cst_45 = arith.constant dense<0xFF800000> : vector<16xf32>
    %105 = vector.multi_reduction <maximumf>, %104, %cst_45 [1] : vector<16x16xf32> to vector<16xf32>
    %106 = vector.shape_cast %105 : vector<16xf32> to vector<16x1xf32>
    %107 = vector.broadcast %106 : vector<16x1xf32> to vector<16x16xf32>
    %108 = arith.subf %104, %107 : vector<16x16xf32>
    %109 = math.exp %108 : vector<16x16xf32>
    %cst_46 = arith.constant dense<0.000000e+00> : vector<16xf32>
    %110 = vector.multi_reduction <add>, %109, %cst_46 [1] : vector<16x16xf32> to vector<16xf32>
    %111 = vector.shape_cast %110 : vector<16xf32> to vector<16x1xf32>
    %cst_47 = arith.constant 1.000000e+00 : f32
    %112 = vector.broadcast %cst_47 : f32 to vector<16x1xf32>
    %113 = arith.divf %112, %111 : vector<16x1xf32>
    %114 = vector.broadcast %113 : vector<16x1xf32> to vector<16x16xf32>
    %115 = arith.mulf %109, %114 : vector<16x16xf32>
    %116 = arith.truncf %115 : vector<16x16xf32> to vector<16x16xbf16>
    %cst_48 = arith.constant dense<0.000000e+00> : vector<16x64xf32>
    %117 = tpu.matmul %116, %102, %cst_48 {dimension_numbers = #tpu.dot_dimension_numbers<[1], [0], [0], [1], [0, 0, 1, 1], [], []>} : vector<16x16xbf16>, vector<16x64xbf16>, vector<16x64xf32> -> vector<16x64xf32>
    %118 = arith.truncf %117 : vector<16x64xf32> to vector<16x64xbf16>
    %c16 = arith.constant 16 : index
    %c0_49 = arith.constant 0 : index
    %119 = vector.load %arg15[%c16, %c0_49] : memref<32x128xbf16, #tpu.memory_space<vmem>>, vector<16x64xbf16>
    tpu.vector_store %arg15[%c16, %c0_49], %118 {strides = array<i32>} : memref<32x128xbf16, #tpu.memory_space<vmem>>, vector<16x64xbf16>,
    %120 = vector.extract_strided_slice %62 {offsets = [16, 192], sizes = [16, 64], strides = [1, 1]} : vector<32x384xbf16> to vector<16x64xbf16>
    %121 = vector.extract_strided_slice %62 {offsets = [16, 320], sizes = [16, 64], strides = [1, 1]} : vector<32x384xbf16> to vector<16x64xbf16>
    %122 = vector.extract_strided_slice %62 {offsets = [16, 64], sizes = [16, 64], strides = [1, 1]} : vector<32x384xbf16> to vector<16x64xbf16>
    %cst_50 = arith.constant dense<0.000000e+00> : vector<16x16xf32>
    %123 = tpu.matmul %122, %120, %cst_50 {dimension_numbers = #tpu.dot_dimension_numbers<[1], [1], [0], [0], [0, 0, 1, 0], [], []>} : vector<16x64xbf16>, vector<16x64xbf16>, vector<16x16xf32> -> vector<16x16xf32>
    %cst_51 = arith.constant dense<0xFF800000> : vector<16xf32>
    %124 = vector.multi_reduction <maximumf>, %123, %cst_51 [1] : vector<16x16xf32> to vector<16xf32>
    %125 = vector.shape_cast %124 : vector<16xf32> to vector<16x1xf32>
    %126 = vector.broadcast %125 : vector<16x1xf32> to vector<16x16xf32>
    %127 = arith.subf %123, %126 : vector<16x16xf32>
    %128 = math.exp %127 : vector<16x16xf32>
    %cst_52 = arith.constant dense<0.000000e+00> : vector<16xf32>
    %129 = vector.multi_reduction <add>, %128, %cst_52 [1] : vector<16x16xf32> to vector<16xf32>
    %130 = vector.shape_cast %129 : vector<16xf32> to vector<16x1xf32>
    %cst_53 = arith.constant 1.000000e+00 : f32
    %131 = vector.broadcast %cst_53 : f32 to vector<16x1xf32>
    %132 = arith.divf %131, %130 : vector<16x1xf32>
    %133 = vector.broadcast %132 : vector<16x1xf32> to vector<16x16xf32>
    %134 = arith.mulf %128, %133 : vector<16x16xf32>
    %135 = arith.truncf %134 : vector<16x16xf32> to vector<16x16xbf16>
    %cst_54 = arith.constant dense<0.000000e+00> : vector<16x64xf32>
    %136 = tpu.matmul %135, %121, %cst_54 {dimension_numbers = #tpu.dot_dimension_numbers<[1], [0], [0], [1], [0, 0, 1, 1], [], []>} : vector<16x16xbf16>, vector<16x64xbf16>, vector<16x64xf32> -> vector<16x64xf32>
    %137 = arith.truncf %136 : vector<16x64xf32> to vector<16x64xbf16>
    %c16_55 = arith.constant 16 : index
    %c64_56 = arith.constant 64 : index
    %138 = vector.load %arg15[%c16_55, %c64_56] : memref<32x128xbf16, #tpu.memory_space<vmem>>, vector<16x64xbf16>
    tpu.vector_store %arg15[%c16_55, %c64_56], %137 {strides = array<i32>} : memref<32x128xbf16, #tpu.memory_space<vmem>>, vector<16x64xbf16>,
    %c0_57 = arith.constant 0 : index
    %c0_58 = arith.constant 0 : index
    %139 = vector.load %arg15[%c0_57, %c0_58] : memref<32x128xbf16, #tpu.memory_space<vmem>>, vector<32x128xbf16>
    %cst_59 = arith.constant dense<0.000000e+00> : vector<32x128xf32>
    %140 = tpu.matmul %139, %55, %cst_59 {dimension_numbers = #tpu.dot_dimension_numbers<[1], [0], [0], [1], [0, 0, 1, 1], [], []>} : vector<32x128xbf16>, vector<128x128xbf16>, vector<32x128xf32> -> vector<32x128xf32>
    %141 = vector.broadcast %56 : vector<1x128xf32> to vector<32x128xf32>
    %142 = arith.addf %140, %141 : vector<32x128xf32>
    %c0_60 = arith.constant 0 : index
    %c0_61 = arith.constant 0 : index
    %143 = vector.load %arg11[%c0_60, %c0_61] : memref<1x128xf32, #tpu.memory_space<vmem>>, vector<1x128xf32>
    %c0_62 = arith.constant 0 : index
    %c0_63 = arith.constant 0 : index
    %144 = vector.load %arg12[%c0_62, %c0_63] : memref<1x128xf32, #tpu.memory_space<vmem>>, vector<1x128xf32>
    %145 = arith.addf %142, %57 : vector<32x128xf32>
    %cst_64 = arith.constant dense<0.000000e+00> : vector<32xf32>
    %146 = vector.multi_reduction <add>, %145, %cst_64 [1] : vector<32x128xf32> to vector<32xf32>
    %147 = vector.shape_cast %146 : vector<32xf32> to vector<32x1xf32>
    %cst_65 = arith.constant 1.280000e+02 : f32
    %148 = vector.broadcast %cst_65 : f32 to vector<32x1xf32>
    %149 = arith.divf %147, %148 : vector<32x1xf32>
    %150 = vector.broadcast %149 : vector<32x1xf32> to vector<32x128xf32>
    %151 = arith.subf %145, %150 : vector<32x128xf32>
    %152 = arith.mulf %151, %151 : vector<32x128xf32>
    %cst_66 = arith.constant dense<0.000000e+00> : vector<32xf32>
    %153 = vector.multi_reduction <add>, %152, %cst_66 [1] : vector<32x128xf32> to vector<32xf32>
    %154 = vector.shape_cast %153 : vector<32xf32> to vector<32x1xf32>
    %cst_67 = arith.constant 1.280000e+02 : f32
    %155 = vector.broadcast %cst_67 : f32 to vector<32x1xf32>
    %156 = arith.divf %154, %155 : vector<32x1xf32>
    %157 = vector.broadcast %149 : vector<32x1xf32> to vector<32x128xf32>
    %158 = arith.subf %145, %157 : vector<32x128xf32>
    %cst_68 = arith.constant 9.99999996E-13 : f32
    %159 = vector.broadcast %cst_68 : f32 to vector<32x1xf32>
    %160 = arith.addf %156, %159 : vector<32x1xf32>
    %161 = math.rsqrt %160 : vector<32x1xf32>
    %162 = vector.broadcast %161 : vector<32x1xf32> to vector<32x128xf32>
    %163 = arith.mulf %158, %162 : vector<32x128xf32>
    %164 = vector.broadcast %143 : vector<1x128xf32> to vector<32x128xf32>
    %165 = arith.mulf %163, %164 : vector<32x128xf32>
    %166 = vector.broadcast %144 : vector<1x128xf32> to vector<32x128xf32>
    %167 = arith.addf %165, %166 : vector<32x128xf32>
    %c0_69 = arith.constant 0 : index
    %c0_70 = arith.constant 0 : index
    %c0_71 = arith.constant 0 : index
    %168 = vector.load %arg13[%c0_69, %c0_70, %c0_71] : memref<2x16x128xbf16, #tpu.memory_space<vmem>>, vector<2x16x128xbf16>
    %169 = vector.shape_cast %168 : vector<2x16x128xbf16> to vector<32x128xbf16>
    %170 = arith.extf %169 : vector<32x128xbf16> to vector<32x128xf32>
    %171 = arith.addf %167, %170 : vector<32x128xf32>
    %172 = vector.shape_cast %171 : vector<32x128xf32> to vector<2x16x128xf32>
    %c0_72 = arith.constant 0 : index
    %c0_73 = arith.constant 0 : index
    %c0_74 = arith.constant 0 : index
    %173 = vector.load %arg14[%c0_72, %c0_73, %c0_74] : memref<2x16x128xf32, #tpu.memory_space<vmem>>, vector<2x16x128xf32>
    tpu.vector_store %arg14[%c0_72, %c0_73, %c0_74], %172 {strides = array<i32>} : memref<2x16x128xf32, #tpu.memory_space<vmem>>, vector<2x16x128xf32>,
    return
  }
  func.func @transform_0(%arg0: i32) -> (i32, i32, i32) {
    %c0_i32 = arith.constant 0 : i32
    %c0_i32_0 = arith.constant 0 : i32
    %c0_i32_1 = arith.constant 0 : i32
    return %arg0, %c0_i32, %c0_i32_0 : i32, i32, i32
  }
  func.func @transform_1(%arg0: i32) -> (i32, i32, i32) {
    %c0_i32 = arith.constant 0 : i32
    %c0_i32_0 = arith.constant 0 : i32
    %c0_i32_1 = arith.constant 0 : i32
    return %arg0, %c0_i32, %c0_i32_0 : i32, i32, i32
  }
  func.func @transform_2(%arg0: i32) -> (i32, i32) {
    %c0_i32 = arith.constant 0 : i32
    %c0_i32_0 = arith.constant 0 : i32
    %c0_i32_1 = arith.constant 0 : i32
    return %c0_i32, %c0_i32_0 : i32, i32
  }
  func.func @transform_3(%arg0: i32) -> (i32, i32) {
    %c0_i32 = arith.constant 0 : i32
    %c0_i32_0 = arith.constant 0 : i32
    %c0_i32_1 = arith.constant 0 : i32
    return %c0_i32, %c0_i32_0 : i32, i32
  }
  func.func @transform_4(%arg0: i32) -> (i32, i32) {
    %c0_i32 = arith.constant 0 : i32
    %c0_i32_0 = arith.constant 0 : i32
    %c0_i32_1 = arith.constant 0 : i32
    return %c0_i32, %c0_i32_0 : i32, i32
  }
  func.func @transform_5(%arg0: i32) -> (i32, i32) {
    %c0_i32 = arith.constant 0 : i32
    %c0_i32_0 = arith.constant 0 : i32
    %c0_i32_1 = arith.constant 0 : i32
    return %c0_i32, %c0_i32_0 : i32, i32
  }
  func.func @transform_6(%arg0: i32) -> (i32, i32) {
    %c0_i32 = arith.constant 0 : i32
    %c0_i32_0 = arith.constant 0 : i32
    %c0_i32_1 = arith.constant 0 : i32
    return %c0_i32, %c0_i32_0 : i32, i32
  }
  func.func @transform_7(%arg0: i32) -> (i32, i32) {
    %c0_i32 = arith.constant 0 : i32
    %c0_i32_0 = arith.constant 0 : i32
    %c0_i32_1 = arith.constant 0 : i32
    return %c0_i32, %c0_i32_0 : i32, i32
  }
  func.func @transform_8(%arg0: i32) -> (i32, i32) {
    %c0_i32 = arith.constant 0 : i32
    %c0_i32_0 = arith.constant 0 : i32
    %c0_i32_1 = arith.constant 0 : i32
    return %c0_i32, %c0_i32_0 : i32, i32
  }
  func.func @transform_9(%arg0: i32) -> (i32, i32) {
    %c0_i32 = arith.constant 0 : i32
    %c0_i32_0 = arith.constant 0 : i32
    %c0_i32_1 = arith.constant 0 : i32
    return %c0_i32, %c0_i32_0 : i32, i32
  }
  func.func @transform_10(%arg0: i32) -> (i32, i32) {
    %c0_i32 = arith.constant 0 : i32
    %c0_i32_0 = arith.constant 0 : i32
    %c0_i32_1 = arith.constant 0 : i32
    return %c0_i32, %c0_i32_0 : i32, i32
  }
  func.func @transform_11(%arg0: i32) -> (i32, i32) {
    %c0_i32 = arith.constant 0 : i32
    %c0_i32_0 = arith.constant 0 : i32
    %c0_i32_1 = arith.constant 0 : i32
    return %c0_i32, %c0_i32_0 : i32, i32
  }
  func.func @transform_12(%arg0: i32) -> (i32, i32, i32) {
    %c0_i32 = arith.constant 0 : i32
    %c0_i32_0 = arith.constant 0 : i32
    %c0_i32_1 = arith.constant 0 : i32
    return %arg0, %c0_i32, %c0_i32_0 : i32, i32, i32
  }
  func.func @transform_13(%arg0: i32) -> (i32, i32, i32) {
    %c0_i32 = arith.constant 0 : i32
    %c0_i32_0 = arith.constant 0 : i32
    %c0_i32_1 = arith.constant 0 : i32
    return %arg0, %c0_i32, %c0_i32_0 : i32, i32, i32
  }
}

</mosaic_0001>

<bundles_post_ra>
// kernel: forward.6
= control target key start
LH: loop header
LB: loop body
LE: loop exit
PB: predicated region body
PF: predicated region fallthrough
CT: control target
= control target key end

     0   :  { %vm66_vm0 = vcmask 523264   ;;  %s340_s1 = inlined_call_operand.vmem [shape: bf16[64,128], index: 1, kind: input, shape index: {}]   ;;  %s341_s0 = inlined_call_operand.vmem [shape: f32[2,16,64], index: 0, kind: input, shape index: {}]   ;;  %s342_s2 = inlined_call_operand.vmem [shape: f32[1,128], index: 2, kind: input, shape index: {}]   ;;  %s343_s3 = inlined_call_operand.vmem [shape: f32[1,128], index: 3, kind: input, shape index: {}]   ;;  %s344_s4 = inlined_call_operand.vmem [shape: f32[1,128], index: 4, kind: input, shape index: {}]   ;;  %s345_s5 = inlined_call_operand.vmem [shape: bf16[2,16,128], index: 5, kind: output, shape index: {}]  }
   0x1   :  { %v259_v0 = vld [vmem:[%s340_s1] sm:$0xff]   ;;  %v260_v1 = vld [vmem:[%s340_s1 + $0x8] sm:$0xff]   ;;  %v261_v2 = vld [vmem:[%s340_s1 + $0x10] sm:$0xff]  }
   0x2   :  { %247 = vmatprep.subr.bf16.mxu0 %v259_v0  ;;  %v29_v3 = vld [vmem:[%s341_s0] sm:$0xff]  ;;  %v30_v4 = vld [vmem:[%s341_s0 + $0x8] sm:$0xff]  ;;  %v262_v6 = vld [vmem:[%s340_s1 + $0x18] sm:$0xff]  }
   0x3   :  { %248 = vmatpush3.bf16.msra.mxu0 %v259_v0  ;;  %v33_v5 = vpack.c.bf16 %v30_v4, %v29_v3  ;;  %v31_v7 = vld [vmem:[%s341_s0 + $0x10] sm:$0xff]  ;;  %v32_v8 = vld [vmem:[%s341_s0 + $0x18] sm:$0xff]  ;;  %v213_v10 = vld [vmem:[%s342_s2] ss:$0 sm:$0xff] }
   0x4   :  { %249 = vmatprep.subr.bf16.mxu0 %v260_v1  ;;  %v34_v9 = vpack.c.bf16 %v32_v8, %v31_v7  ;;  %v220_v49 = vld [vmem:[%s343_s3] ss:$0 sm:$0xff] }
   0x5   :  { %255 = vmatprep.mubr.msk.bf16.mxu0 %vm66_vm0, %v33_v5  ;;  %v221_v54 = vld [vmem:[%s344_s4] ss:$0 sm:$0xff] }
   0x7   :  { %250 = vmatpush3.bf16.msra.mxu0 %v260_v1 }
   0x8   :  { %251 = vmatprep.subr.bf16.mxu0 %v261_v2 }
   0xb   :  { %252 = vmatpush3.bf16.msra.mxu0 %v261_v2 }
   0xc   :  { %253 = vmatprep.subr.bf16.mxu0 %v262_v6 }
   0xf   :  { %254 = vmatpush3.bf16.msra.mxu0 %v262_v6 }
  0x12   :  { %256 = vmatmul.mubr.msk.bf16.vlgmr.msra.gmra.mrb[0].mxu0 %vm66_vm0, %v34_v9 }
  0xe5   :  { %v257_v11 = vpop.f32.mrb[0].mxu0 }
  0xe6   :  { %v116_v12 = vadd.f32 %v257_v11, %v213_v10  ;;  %v107_v13 = vpop.f32.mrb[1].mxu0 }
  0xe7   :  { %v108_v14 = vadd.f32 %v213_v10, %v107_v13  ;;  %v258_v15 = vpop.f32.mrb[2].mxu0 }
  0xe8   :  { %128 = vadd.xlane.f32.xlu1 %v116_v12  ;;  %v110_v16 = vpop.f32.mrb[3].mxu0  ;;  %v119_v17 = vadd.f32 %v258_v15, %v213_v10 }
  0xe9   :  { %124 = vadd.xlane.f32.xlu0 %v108_v14  ;;  %v111_v18 = vadd.f32 %v213_v10, %v110_v16 }
  0xec   :  { %130 = vadd.xlane.f32.xlu1 %v119_v17 }
  0xed   :  { %126 = vadd.xlane.f32.xlu0 %v111_v18 }
 0x175   :  { %v129_v19 = vpop.xlane.xlu1 %128 }
 0x176   :  { %v125_v20 = vpop.xlane.xlu0 %124  ;;  %v135_v21 = vmul.f32 0.0078125, %v129_v19 }
 0x177   :  { %v133_v22 = vmul.f32 0.0078125, %v125_v20 }
 0x178   :  { %v139_v26 = vsub.f32 %v116_v12, %v135_v21 }
 0x179   :  { %v137_v23 = vsub.f32 %v108_v14, %v133_v22  ;;  %v131_v24 = vpop.xlane.xlu1 %130 }
 0x17a   :  { %v127_v25 = vpop.xlane.xlu0 %126  ;;  %v136_v27 = vmul.f32 0.0078125, %v131_v24  ;;  %v143_v32 = vmul.f32 %v139_v26, %v139_v26 }
 0x17b   :  { %v134_v28 = vmul.f32 0.0078125, %v127_v25  ;;  %v141_v29 = vmul.f32 %v137_v23, %v137_v23 }
 0x17c   :  { %v140_v31 = vsub.f32 %v119_v17, %v136_v27 }
 0x17d   :  { %v138_v30 = vsub.f32 %v111_v18, %v134_v28  ;;  %145 = vadd.xlane.f32.xlu0 %v141_v29 }
 0x17e   :  { %v144_v34 = vmul.f32 %v140_v31, %v140_v31 }
 0x17f   :  { %v142_v33 = vmul.f32 %v138_v30, %v138_v30 }
 0x181   :  { %149 = vadd.xlane.f32.xlu0 %v143_v32  ;;  %147 = vadd.xlane.f32.xlu1 %v142_v33 }
 0x185   :  { %151 = vadd.xlane.f32.xlu1 %v144_v34 }
 0x20a   :  { %v146_v35 = vpop.xlane.xlu0 %145 }
 0x20b   :  { %v153_v36 = vmul.f32 0.0078125, %v146_v35 }
 0x20d   :  { %v157_v37 = vadd.f32 1e-12, %v153_v36 }
 0x20e   :  { %v148_v38 = vpop.xlane.xlu1 %147  ;;  %v150_v39 = vpop.xlane.xlu0 %149 }
 0x20f   :  { %263 = vrsqrt.f32 %v157_v37  ;;  %v154_v40 = vmul.f32 0.0078125, %v148_v38  ;;  %v155_v41 = vmul.f32 0.0078125, %v150_v39 }
 0x211   :  { %v158_v42 = vadd.f32 1e-12, %v154_v40  ;;  %v159_v43 = vadd.f32 1e-12, %v155_v41 }
 0x212   :  { %v152_v44 = vpop.xlane.xlu1 %151 }
 0x213   :  { %265 = vrsqrt.f32 %v158_v42  ;;  %v156_v45 = vmul.f32 0.0078125, %v152_v44 }
 0x214   :  { %267 = vrsqrt.f32 %v159_v43 }
 0x215   :  { %v160_v46 = vadd.f32 1e-12, %v156_v45 }
 0x217   :  { %269 = vrsqrt.f32 %v160_v46 }
 0x219   :  { %v264_v47 = vpop.eup %263 }
 0x21a   :  { %v165_v48 = vmul.f32 %v264_v47, %v137_v23 }
 0x21c   :  { %v175_v52 = vmul.f32 %v220_v49, %v165_v48 }
 0x21d   :  { %v266_v50 = vpop.eup %265 }
 0x21e   :  { %v268_v51 = vpop.eup %267  ;;  %v166_v53 = vmul.f32 %v266_v50, %v138_v30  ;;  %v185_v58 = vadd.f32 %v221_v54, %v175_v52 }
 0x21f   :  { %v167_v55 = vmul.f32 %v268_v51, %v139_v26 }
 0x220   :  { %v176_v56 = vmul.f32 %v220_v49, %v166_v53 }
 0x221   :  { %v270_v57 = vpop.eup %269  ;;  %v177_v60 = vmul.f32 %v220_v49, %v167_v55 }
 0x222   :  { %v186_v59 = vadd.f32 %v221_v54, %v176_v56  ;;  %v168_v61 = vmul.f32 %v270_v57, %v140_v31 }
 0x223   :  { %v187_v0 = vadd.f32 %v221_v54, %v177_v60 }
 0x224   :  { %v233_v62 = vpack.c.bf16 %v186_v59, %v185_v58  ;;  %v178_v63 = vmul.f32 %v220_v49, %v168_v61 }
 0x226   :  { %234 = vst [vmem:[%s345_s5] sm:$0xff] %v233_v62   ;;  %v188_v1 = vadd.f32 %v221_v54, %v178_v63 }
 0x228   :  { %v238_v2 = vpack.c.bf16 %v188_v1, %v187_v0 }
 0x22a   :  { %240 = vst [vmem:[%s345_s5 + $0x8] sm:$0xff] %v238_v2  }

// kernel: forward.5
= control target key start
LH: loop header
LB: loop body
LE: loop exit
PB: predicated region body
PF: predicated region fallthrough
CT: control target
= control target key end

     0   :  { %vm45_vm0 = vcmask 523264   ;;  %v1464_v29 = vmov 0   ;;  %vm1466_vm1 = vmmov 0   ;;  %s1467_s12 = smov 64   ;;  %vm420_vm2 = vcmask 130048   ;;  %s1749_s0 = inlined_call_operand.vmem [shape: f32[2,16,64], index: 0, kind: input, shape index: {}]   ;;  %s1750_s3 = inlined_call_operand.vmem [shape: bf16[64,384], index: 3, kind: input, shape index: {}]   ;;  %s1751_s1 = inlined_call_operand.vmem [shape: f32[1,64], index: 1, kind: input, shape index: {}]   ;;  %s1752_s2 = inlined_call_operand.vmem [shape: f32[1,64], index: 2, kind: input, shape index: {}]   ;;  %s1753_s4 = inlined_call_operand.vmem [shape: f32[1,384], index: 4, kind: input, shape index: {}]   ;;  %s1754_s5 = inlined_call_operand.vmem [shape: bf16[128,128], index: 5, kind: input, shape index: {}]   ;;  %s1755_s7 = inlined_call_operand.vmem [shape: bf16[64,128], index: 7, kind: input, shape index: {}]   ;;  %s1756_s6 = inlined_call_operand.vmem [shape: f32[1,128], index: 6, kind: input, shape index: {}]   ;;  %s1757_s8 = inlined_call_operand.vmem [shape: f32[1,128], index: 8, kind: input, shape index: {}]   ;;  %s1758_s9 = inlined_call_operand.vmem [shape: f32[1,128], index: 9, kind: input, shape index: {}]   ;;  %s1759_s10 = inlined_call_operand.vmem [shape: f32[1,128], index: 10, kind: input, shape index: {}]   ;;  %s1760_s11 = inlined_call_operand.vmem [shape: bf16[2,16,128], index: 11, kind: output, shape index: {}]  }
   0x1   :  { %v39_v0 = vld [vmem:[%s1749_s0] sm:$0xff]  ;;  %v41_v1 = vld [vmem:[%s1749_s0 + $0x10] sm:$0xff]  ;;  %v40_v2 = vld [vmem:[%s1749_s0 + $0x8] sm:$0xff]  ;;  %297 = vmatprep.mubr.bf16.mxu0 %v1464_v29  ;;  %vm623_vm3 = vcmask 1048064  }
   0x2   :  { %v46_v3 = vsel %vm45_vm0, %v39_v0, 0.0  ;;  %v52_v4 = vsel %vm45_vm0, %v41_v1, 0.0  ;;  %v42_v5 = vld [vmem:[%s1749_s0 + $0x18] sm:$0xff]  ;;  %v49_v6 = vsel %vm45_vm0, %v40_v2, 0.0  ;;  %v1372_v28 = vld [vmem:[%s1750_s3 + $0x4] ss:$12 sps:$4 sm:$0xff]  }
   0x3   :  { %47 = vadd.xlane.f32.xlu0 %v46_v3  ;;  %53 = vadd.xlane.f32.xlu1 %v52_v4  ;;  %v55_v7 = vsel %vm45_vm0, %v42_v5, 0.0  ;;  %v1374_v30 = vld [vmem:[%s1750_s3] ss:$12 sps:$4 sm:$0xff]   ;;  %v1375_v31 = vld [vmem:[%s1750_s3 + $0x1c] ss:$12 sps:$4 sm:$0xff]  }
   0x4   :  { %265 = vmatprep.subr.bf16.mxu0 %v1372_v28  ;;  %v1377_v32 = vld [vmem:[%s1750_s3 + $0x18] ss:$12 sps:$4 sm:$0xff]   ;;  %v1378_v33 = vld [vmem:[%s1750_s3 + $0x34] ss:$12 sps:$4 sm:$0xff]   ;;  %v1380_v34 = vld [vmem:[%s1750_s3 + $0x30] ss:$12 sps:$4 sm:$0xff]  }
   0x5   :  { %266 = vmatpush1.bf16.msra.mxu0 %v1374_v30  ;;  %v1381_v35 = vld [vmem:[%s1750_s3 + $0x4c] ss:$12 sps:$4 sm:$0xff]   ;;  %v1383_v36 = vld [vmem:[%s1750_s3 + $0x48] ss:$12 sps:$4 sm:$0xff]   ;;  %v1163_v51 = vld [vmem:[%s1751_s1] ss:$0 sm:$0xff] }
   0x6   :  { %267 = vmatprep.subr.bf16.mxu0 %v1375_v31  ;;  %v1584_v37 = vld [vmem:[%s1750_s3 + $0x8] ss:$12 sps:$4 sm:$0xff]   ;;  %v1164_v53 = vld [vmem:[%s1752_s2] ss:$0 sm:$0xff]  ;;  %v1386_v30 = vld [vmem:[%s1750_s3 + $0x38] ss:$12 sps:$4 sm:$0xff]  }
   0x7   :  { %50 = vadd.xlane.f32.xlu0 %v49_v6  ;;  %56 = vadd.xlane.f32.xlu1 %v55_v7 }
   0x9   :  { %268 = vmatpush1.bf16.msra.mxu0 %v1377_v32 }
   0xa   :  { %269 = vmatprep.subr.bf16.mxu0 %v1378_v33  ;;  %v1387_v33 = vld [vmem:[%s1750_s3 + $0x50] ss:$12 sps:$4 sm:$0xff]  }
   0xd   :  { %270 = vmatpush1.bf16.msra.mxu0 %v1380_v34  ;;  %v180_v34 = vlaneseq }
   0xe   :  { %271 = vmatprep.subr.bf16.mxu0 %v1381_v35 }
   0xf   :  { %v181_v35 = vshrl.u32 %v180_v34, 7 }
  0x11   :  { %272 = vmatpush1.bf16.msra.mxu0 %v1383_v36  ;;  %v182_v36 = vsub.s32 0, %v181_v35 }
  0x12   :  { %1264 = vmatprep.subr.bf16.mxu0 %v1584_v37 }
  0x90   :  { %v48_v8 = vpop.xlane.xlu0 %47  ;;  %v54_v9 = vpop.xlane.xlu1 %53 }
  0x91   :  { %v59_v10 = vmul.f32 0.015625, %v48_v8  ;;  %v61_v11 = vmul.f32 0.015625, %v54_v9 }
  0x93   :  { %v63_v12 = vsub.f32 %v39_v0, %v59_v10  ;;  %v1544_v13 = vsub.f32 %v41_v1, %v61_v11 }
  0x94   :  { %v51_v14 = vpop.xlane.xlu0 %50  ;;  %v57_v15 = vpop.xlane.xlu1 %56 }
  0x95   :  { %v60_v16 = vmul.f32 0.015625, %v51_v14  ;;  %v62_v17 = vmul.f32 0.015625, %v57_v15  ;;  %v67_v18 = vmul.f32 %v63_v12, %v63_v12  ;;  %v69_v19 = vmul.f32 %v1544_v13, %v1544_v13 }
  0x97   :  { %v64_v20 = vsub.f32 %v40_v2, %v60_v16  ;;  %v1548_v21 = vsub.f32 %v42_v5, %v62_v17  ;;  %v71_v22 = vsel %vm45_vm0, %v67_v18, 0.0  ;;  %v77_v23 = vsel %vm45_vm0, %v69_v19, 0.0 }
  0x98   :  { %72 = vadd.xlane.f32.xlu0 %v71_v22 }
  0x99   :  { %v68_v24 = vmul.f32 %v64_v20, %v64_v20  ;;  %v70_v25 = vmul.f32 %v1548_v21, %v1548_v21 }
  0x9b   :  { %v74_v26 = vsel %vm45_vm0, %v68_v24, 0.0  ;;  %v80_v27 = vsel %vm45_vm0, %v70_v25, 0.0  ;;  %v1385_v25 = vld [vmem:[%s1750_s3 + $0x20] ss:$12 sps:$4 sm:$0xff]  }
  0x9c   :  { %78 = vadd.xlane.f32.xlu0 %v77_v23  ;;  %75 = vadd.xlane.f32.xlu1 %v74_v26 }
  0xa0   :  { %81 = vadd.xlane.f32.xlu1 %v80_v27 }
 0x125   :  { %v73_v38 = vpop.xlane.xlu0 %72 }
 0x126   :  { %v83_v39 = vmul.f32 0.015625, %v73_v38  ;;  %v186_v38 = vsub.s32 1, %v181_v35 }
 0x128   :  { %v87_v40 = vadd.f32 1e-05, %v83_v39 }
 0x129   :  { %v76_v41 = vpop.xlane.xlu1 %75  ;;  %v79_v42 = vpop.xlane.xlu0 %78 }
 0x12a   :  { %1400 = vrsqrt.f32 %v87_v40  ;;  %v84_v43 = vmul.f32 0.015625, %v76_v41  ;;  %v85_v44 = vmul.f32 0.015625, %v79_v42 }
 0x12c   :  { %v88_v45 = vadd.f32 1e-05, %v84_v43  ;;  %v89_v46 = vadd.f32 1e-05, %v85_v44 }
 0x12d   :  { %v82_v47 = vpop.xlane.xlu1 %81 }
 0x12e   :  { %1402 = vrsqrt.f32 %v88_v45  ;;  %v86_v48 = vmul.f32 0.015625, %v82_v47 }
 0x12f   :  { %1404 = vrsqrt.f32 %v89_v46 }
 0x130   :  { %v90_v49 = vadd.f32 1e-05, %v86_v48 }
 0x132   :  { %1406 = vrsqrt.f32 %v90_v49 }
 0x134   :  { %v1401_v50 = vpop.eup %1400 }
 0x135   :  { %v95_v52 = vmul.f32 %v1401_v50, %v63_v12 }
 0x137   :  { %v105_v54 = vmul.f32 %v1163_v51, %v95_v52 }
 0x138   :  { %v1403_v55 = vpop.eup %1402 }
 0x139   :  { %v1405_v56 = vpop.eup %1404  ;;  %v96_v57 = vmul.f32 %v1403_v55, %v64_v20  ;;  %v115_v58 = vadd.f32 %v1164_v53, %v105_v54  ;;  %v190_v54 = vsub.s32 2, %v181_v35 }
 0x13a   :  { %v97_v59 = vmul.f32 %v1405_v56, %v1544_v13 }
 0x13b   :  { %v106_v60 = vmul.f32 %v1163_v51, %v96_v57  ;;  %v119_v61 = vsub.f32 0.0, %v115_v58 }
 0x13c   :  { %v1407_v62 = vpop.eup %1406  ;;  %v107_v63 = vmul.f32 %v1163_v51, %v97_v59 }
 0x13d   :  { %v98_v0 = vmul.f32 %v1407_v62, %v1548_v21  ;;  %v116_v1 = vadd.f32 %v1164_v53, %v106_v60  ;;  %v123_v2 = vmul.f32 1.442695, %v119_v61 }
 0x13e   :  { %v117_v3 = vadd.f32 %v1164_v53, %v107_v63 }
 0x13f   :  { %v120_v4 = vsub.f32 0.0, %v116_v1  ;;  %1408 = vpow2.f32 %v123_v2  ;;  %v108_v5 = vmul.f32 %v1163_v51, %v98_v0 }
 0x140   :  { %v121_v6 = vsub.f32 0.0, %v117_v3 }
 0x141   :  { %v125_v7 = vmul.f32 1.442695, %v120_v4  ;;  %v118_v8 = vadd.f32 %v1164_v53, %v108_v5 }
 0x142   :  { %v127_v9 = vmul.f32 1.442695, %v121_v6 }
 0x143   :  { %1410 = vpow2.f32 %v125_v7  ;;  %v122_v10 = vsub.f32 0.0, %v118_v8 }
 0x144   :  { %1412 = vpow2.f32 %v127_v9 }
 0x145   :  { %v129_v11 = vmul.f32 1.442695, %v122_v10 }
 0x147   :  { %1414 = vpow2.f32 %v129_v11 }
 0x149   :  { %v1409_v12 = vpop.eup %1408 }
 0x14a   :  { %v131_v13 = vadd.f32 1.0, %v1409_v12 }
 0x14c   :  { %1416 = vrcp.f32 %v131_v13 }
 0x14d   :  { %v1411_v14 = vpop.eup %1410 }
 0x14e   :  { %v132_v15 = vadd.f32 1.0, %v1411_v14  ;;  %v1413_v16 = vpop.eup %1412 }
 0x14f   :  { %v133_v18 = vadd.f32 1.0, %v1413_v16 }
 0x150   :  { %1418 = vrcp.f32 %v132_v15 }
 0x151   :  { %v1415_v17 = vpop.eup %1414 }
 0x152   :  { %v134_v19 = vadd.f32 1.0, %v1415_v17 }
 0x154   :  { %1420 = vrcp.f32 %v134_v19 }
 0x155   :  { %1422 = vrcp.f32 %v133_v18 }
 0x156   :  { %v1417_v20 = vpop.eup %1416 }
 0x157   :  { %v139_v22 = vmul.f32 %v1417_v20, %v115_v58 }
 0x15a   :  { %v1419_v21 = vpop.eup %1418 }
 0x15b   :  { %v140_v23 = vmul.f32 %v1419_v21, %v116_v1 }
 0x15d   :  { %v1595_v24 = vpack.c.bf16 %v140_v23, %v139_v22 }
 0x15e   :  { %v1421_v26 = vpop.eup %1420 }
 0x15f   :  { %1177 = vmatmul.mubr.msk.bf16.vlgmr.msra.gmra.mrb[0].mxu0 %vm45_vm0, %v1595_v24  ;;  %v1423_v27 = vpop.eup %1422  ;;  %v142_v28 = vmul.f32 %v1421_v26, %v118_v8 }
 0x160   :  { %1265 = vmatpush3.bf16.msra.mxu0 %v1584_v37  ;;  %307 = vmatprep.mubr.bf16.mxu0 %v1464_v29  ;;  %v141_v31 = vmul.f32 %v1423_v27, %v117_v3  ;;  %v1465_v29 = vmov 0.0   ;;  %v159_v37 = vld [vmem:[%s1753_s4] sm:$0x7] }
 0x161   :  { %1266 = vmatprep.subr.bf16.mxu0 %v1385_v25  ;;  %1288 = vmatprep.subr.bf16.mxu1 %v1465_v29  ;;  %v183_v39 = vrot.slane %v159_v37, %v182_v36  ;;  %v187_v41 = vrot.slane %v159_v37, %v186_v38  ;;  %v191_v62 = vrot.slane %v159_v37, %v190_v54 }
 0x162   :  { %v1607_v32 = vpack.c.bf16 %v142_v28, %v141_v31  ;;  %1290 = vmatprep.mubr.msk.bf16.mxu1 %vm1466_vm1, %v1465_v29 }
 0x164   :  { %1267 = vmatpush3.bf16.msra.mxu0 %v1385_v25 }
 0x165   :  { %1268 = vmatprep.subr.bf16.mxu0 %v1386_v30 }
 0x167   :  { %1178 = vmatmul.mubr.msk.bf16.gmra.mrb[4].mxu0 %vm45_vm0, %v1607_v32 }
 0x168   :  { %1269 = vmatpush3.bf16.msra.mxu0 %v1386_v30  ;;  %1272 = vmatprep.mubr.msk.bf16.mxu0 %vm45_vm0, %v1595_v24 }
 0x169   :  { %1270 = vmatprep.subr.bf16.mxu0 %v1387_v33 }
 0x16c   :  { %1271 = vmatpush3.bf16.msra.mxu0 %v1387_v33 }
 0x16d   :  { %1276 = vmatprep.subr.bf16.mxu0 %v1465_v29 }
 0x16f   :  { %1273 = vmatmul.mubr.msk.bf16.vlgmr.msra.gmra.mrb[8].mxu0 %vm45_vm0, %v1607_v32 }
 0x170   :  { %1278 = vmatprep.mubr.msk.bf16.mxu0 %vm1466_vm1, %v1465_v29 }
 0x232   :  { %v299_v40 = vpop.f32.mrb[0].mxu0 }
 0x233   :  { %v301_v42 = vpop.f32.mrb[1].mxu0  ;;  %v300_v44 = vadd.f32 %v299_v40, %v183_v39 }
 0x234   :  { %v303_v43 = vpop.f32.mrb[2].mxu0  ;;  %v302_v47 = vadd.f32 %v301_v42, %v187_v41 }
 0x235   :  { %v304_v45 = vadd.f32 %v303_v43, %v183_v39  ;;  %v305_v46 = vpop.f32.mrb[3].mxu0 }
 0x236   :  { %v306_v48 = vadd.f32 %v305_v46, %v187_v41 }
 0x237   :  { %v367_v49 = vpack.c.bf16 %v304_v45, %v300_v44 }
 0x238   :  { %v368_v50 = vpack.c.bf16 %v306_v48, %v302_v47 }
 0x239   :  { %493 = vrot.lane.b32.xlu1 %v367_v49, %s1467_s12 }
 0x23a   :  { %496 = vrot.lane.b32.xlu0 %v368_v50, %s1467_s12  ;;  %v309_v51 = vpop.f32.mrb[4].mxu0  ;;  %v377_v52 = vsel %vm45_vm0, %v368_v50, 0 }
 0x23b   :  { %v311_v53 = vpop.f32.mrb[5].mxu0  ;;  %1277 = vmatpush3.bf16.xpose.msra.mxu0 %v377_v52  ;;  %v310_v56 = vadd.f32 %v309_v51, %v183_v39 }
 0x23c   :  { %v313_v55 = vpop.f32.mrb[6].mxu0  ;;  %1282 = vmatprep.subr.bf16.mxu0 %v1465_v29  ;;  %v312_v59 = vadd.f32 %v311_v53, %v187_v41 }
 0x23d   :  { %v314_v57 = vadd.f32 %v313_v55, %v183_v39  ;;  %v315_v58 = vpop.f32.mrb[7].mxu0 }
 0x23e   :  { %v316_v60 = vadd.f32 %v315_v58, %v187_v41 }
 0x23f   :  { %v370_v61 = vpack.c.bf16 %v314_v57, %v310_v56 }
 0x240   :  { %v371_v63 = vpack.c.bf16 %v316_v60, %v312_v59 }
 0x242   :  { %v1274_v0 = vpop.f32.mrb[8].mxu0  ;;  %1279 = vmatmul.mubr.msk.bf16.vlgmr.msra.gmra.mrb[12].mxu0 %vm45_vm0, %v367_v49  ;;  %747 = vrot.lane.b32.xlu1 %v371_v63, %s1467_s12  ;;  %v629_v13 = vsel %vm45_vm0, %v371_v63, 0 }
 0x243   :  { %v361_v1 = vadd.f32 %v1274_v0, %v191_v62  ;;  %v352_v2 = vpop.f32.mrb[9].mxu0  ;;  %1284 = vmatprep.mubr.msk.bf16.mxu0 %vm1466_vm1, %v1465_v29 }
 0x244   :  { %v1275_v3 = vpop.f32.mrb[10].mxu0  ;;  %v353_v6 = vadd.f32 %v352_v2, %v191_v62 }
 0x245   :  { %v364_v4 = vadd.f32 %v1275_v3, %v191_v62  ;;  %v355_v5 = vpop.f32.mrb[11].mxu0 }
 0x246   :  { %v356_v7 = vadd.f32 %v355_v5, %v191_v62  ;;  %744 = vrot.lane.b32.xlu1 %v370_v61, %s1467_s12 }
 0x247   :  { %v1636_v8 = vpack.c.bf16 %v364_v4, %v361_v1 }
 0x248   :  { %v1638_v9 = vpack.c.bf16 %v356_v7, %v353_v6 }
 0x24a   :  { %1283 = vmatpush3.bf16.msra.mxu0 %v1638_v9 }
 0x24b   :  { %1294 = vmatprep.subr.bf16.mxu0 %v1465_v29 }
 0x2ab   :  { %v494_v12 = vpop.permute.xlu1 %493 }
 0x2ac   :  { %v497_v10 = vpop.permute.xlu0 %496 }
 0x2ad   :  { %v502_v11 = vsel %vm45_vm0, %v497_v10, 0 }
 0x2ae   :  { %1289 = vmatpush3.bf16.xpose.msra.mxu1 %v502_v11 }
 0x2af   :  { %1300 = vmatprep.subr.bf16.mxu1 %v1465_v29 }
 0x2b4   :  { %v748_v14 = vpop.permute.xlu1 %747 }
 0x2b5   :  { %1291 = vmatmul.mubr.msk.bf16.vlgmr.msra.gmra.mrb[0].mxu1 %vm45_vm0, %v494_v12  ;;  %v753_v15 = vsel %vm45_vm0, %v748_v14, 0 }
 0x2b6   :  { %1301 = vmatpush3.bf16.xpose.msra.mxu1 %v629_v13  ;;  %1302 = vmatprep.mubr.msk.bf16.mxu1 %vm1466_vm1, %v1465_v29 }
 0x2b7   :  { %1312 = vmatprep.subr.bf16.mxu1 %v1465_v29 }
 0x2b8   :  { %v745_v16 = vpop.permute.xlu1 %744 }
 0x2bd   :  { %1303 = vmatmul.mubr.msk.bf16.vlgmr.msra.gmra.mrb[4].mxu1 %vm45_vm0, %v370_v61 }
 0x2be   :  { %1313 = vmatpush3.bf16.xpose.msra.mxu1 %v753_v15  ;;  %1314 = vmatprep.mubr.msk.bf16.mxu1 %vm1466_vm1, %v1465_v29 }
 0x2c5   :  { %1315 = vmatmul.mubr.msk.bf16.vlgmr.msra.gmra.mrb[8].mxu1 %vm45_vm0, %v745_v16 }
 0x315   :  { %v413_v17 = vpop.f32.mrb[12].mxu0 }
 0x316   :  { %v1280_v18 = vpop.f32.mrb[13].mxu0  ;;  %v421_v19 = vsel %vm420_vm2, %v413_v17, -inf }
 0x317   :  { %422 = vmax.xlane.f32.xlu0 %v421_v19  ;;  %v416_v20 = vpop.f32.mrb[14].mxu0 }
 0x318   :  { %v1281_v21 = vpop.f32.mrb[15].mxu0  ;;  %v424_v22 = vsel %vm420_vm2, %v416_v20, -inf }
 0x319   :  { %425 = vmax.xlane.f32.xlu1 %v424_v22 }
 0x388   :  { %v538_v23 = vpop.f32.mrb[0].mxu1 }
 0x389   :  { %v1292_v25 = vpop.f32.mrb[1].mxu1  ;;  %v545_v26 = vsel %vm420_vm2, %v538_v23, -inf }
 0x38a   :  { %546 = vmax.xlane.f32.xlu0 %v545_v26  ;;  %v541_v27 = vpop.f32.mrb[2].mxu1 }
 0x38b   :  { %v1293_v28 = vpop.f32.mrb[3].mxu1  ;;  %v548_v30 = vsel %vm420_vm2, %v541_v27, -inf }
 0x38e   :  { %549 = vmax.xlane.f32.xlu0 %v548_v30 }
 0x390   :  { %v665_v31 = vpop.f32.mrb[4].mxu1 }
 0x391   :  { %v1304_v33 = vpop.f32.mrb[5].mxu1  ;;  %v672_v34 = vsel %vm420_vm2, %v665_v31, -inf }
 0x392   :  { %673 = vmax.xlane.f32.xlu0 %v672_v34  ;;  %v668_v35 = vpop.f32.mrb[6].mxu1 }
 0x393   :  { %v1305_v36 = vpop.f32.mrb[7].mxu1  ;;  %v675_v37 = vsel %vm420_vm2, %v668_v35, -inf }
 0x394   :  { %676 = vmax.xlane.f32.xlu1 %v675_v37 }
 0x398   :  { %v789_v38 = vpop.f32.mrb[8].mxu1 }
 0x399   :  { %v1316_v39 = vpop.f32.mrb[9].mxu1  ;;  %v796_v40 = vsel %vm420_vm2, %v789_v38, -inf }
 0x39a   :  { %797 = vmax.xlane.f32.xlu0 %v796_v40  ;;  %v792_v41 = vpop.f32.mrb[10].mxu1 }
 0x39b   :  { %v1317_v42 = vpop.f32.mrb[11].mxu1  ;;  %v799_v43 = vsel %vm420_vm2, %v792_v41, -inf }
 0x39c   :  { %800 = vmax.xlane.f32.xlu1 %v799_v43 }
 0x3a4   :  { %v423_v44 = vpop.xlane.xlu0 %422 }
 0x3a5   :  { %v427_v45 = vsub.f32 %v413_v17, %v423_v44 }
 0x3a6   :  { %v426_v46 = vpop.xlane.xlu1 %425 }
 0x3a7   :  { %v429_v47 = vmul.f32 1.442695, %v427_v45  ;;  %v428_v48 = vsub.f32 %v416_v20, %v426_v46 }
 0x3a9   :  { %1424 = vpow2.f32 %v429_v47  ;;  %v431_v49 = vmul.f32 1.442695, %v428_v48 }
 0x3ab   :  { %1426 = vpow2.f32 %v431_v49 }
 0x3b3   :  { %v1425_v50 = vpop.eup %1424 }
 0x3b4   :  { %v433_v51 = vsel %vm420_vm2, %v1425_v50, 0.0 }
 0x3b5   :  { %v1427_v52 = vpop.eup %1426  ;;  %434 = vadd.xlane.f32.xlu0 %v433_v51 }
 0x3b6   :  { %v436_v53 = vsel %vm420_vm2, %v1427_v52, 0.0 }
 0x3b7   :  { %437 = vadd.xlane.f32.xlu1 %v436_v53 }
 0x417   :  { %v547_v54 = vpop.xlane.xlu0 %546 }
 0x418   :  { %v551_v55 = vsub.f32 %v538_v23, %v547_v54 }
 0x41a   :  { %v553_v56 = vmul.f32 1.442695, %v551_v55 }
 0x41b   :  { %v550_v57 = vpop.xlane.xlu0 %549 }
 0x41c   :  { %1428 = vpow2.f32 %v553_v56  ;;  %v552_v58 = vsub.f32 %v541_v27, %v550_v57 }
 0x41e   :  { %v555_v59 = vmul.f32 1.442695, %v552_v58  ;;  %v1388_v58 = vld [vmem:[%s1754_s5] sm:$0xff]  }
 0x41f   :  { %v674_v60 = vpop.xlane.xlu0 %673  ;;  %1324 = vmatprep.subr.bf16.mxu1 %v1388_v58 }
 0x420   :  { %1430 = vpow2.f32 %v555_v59  ;;  %v678_v61 = vsub.f32 %v665_v31, %v674_v60  ;;  %v1390_v59 = vld [vmem:[%s1754_s5 + $0x10] sm:$0xff]   ;;  %1325 = vmatpush3.bf16.msra.mxu1 %v1388_v58  ;;  %v1391_v60 = vld [vmem:[%s1754_s5 + $0x18] sm:$0xff]  }
 0x421   :  { %v677_v62 = vpop.xlane.xlu1 %676 }
 0x422   :  { %v680_v63 = vmul.f32 1.442695, %v678_v61  ;;  %v679_v0 = vsub.f32 %v668_v35, %v677_v62  ;;  %v1392_v61 = vld [vmem:[%s1754_s5 + $0x20] sm:$0xff]  }
 0x424   :  { %1432 = vpow2.f32 %v680_v63  ;;  %v682_v1 = vmul.f32 1.442695, %v679_v0  ;;  %v1393_v63 = vld [vmem:[%s1754_s5 + $0x28] sm:$0xff]   ;;  %v1394_v0 = vld [vmem:[%s1754_s5 + $0x30] sm:$0xff]  }
 0x426   :  { %v1429_v2 = vpop.eup %1428  ;;  %1434 = vpow2.f32 %v682_v1 }
 0x427   :  { %v798_v3 = vpop.xlane.xlu0 %797  ;;  %v557_v4 = vsel %vm420_vm2, %v1429_v2, 0.0 }
 0x428   :  { %v802_v5 = vsub.f32 %v789_v38, %v798_v3  ;;  %558 = vadd.xlane.f32.xlu0 %v557_v4 }
 0x429   :  { %v801_v6 = vpop.xlane.xlu1 %800 }
 0x42a   :  { %v1431_v7 = vpop.eup %1430  ;;  %v804_v10 = vmul.f32 1.442695, %v802_v5  ;;  %v803_v11 = vsub.f32 %v792_v41, %v801_v6  ;;  %v1395_v6 = vld [vmem:[%s1754_s5 + $0x38] sm:$0xff]  }
 0x42b   :  { %v560_v12 = vsel %vm420_vm2, %v1431_v7, 0.0 }
 0x42c   :  { %1436 = vpow2.f32 %v804_v10  ;;  %v806_v13 = vmul.f32 1.442695, %v803_v11  ;;  %561 = vadd.xlane.f32.xlu1 %v560_v12  ;;  %v1396_v10 = vld [vmem:[%s1755_s7] sm:$0xff]  }
 0x42e   :  { %v1433_v14 = vpop.eup %1432  ;;  %1438 = vpow2.f32 %v806_v13 }
 0x42f   :  { %v684_v15 = vsel %vm420_vm2, %v1433_v14, 0.0 }
 0x430   :  { %v1435_v16 = vpop.eup %1434  ;;  %685 = vadd.xlane.f32.xlu0 %v684_v15 }
 0x431   :  { %v687_v17 = vsel %vm420_vm2, %v1435_v16, 0.0 }
 0x432   :  { %688 = vadd.xlane.f32.xlu1 %v687_v17 }
 0x436   :  { %v1437_v18 = vpop.eup %1436 }
 0x437   :  { %v808_v19 = vsel %vm420_vm2, %v1437_v18, 0.0 }
 0x438   :  { %v1439_v20 = vpop.eup %1438  ;;  %809 = vadd.xlane.f32.xlu0 %v808_v19 }
 0x439   :  { %v811_v21 = vsel %vm420_vm2, %v1439_v20, 0.0 }
 0x43a   :  { %812 = vadd.xlane.f32.xlu1 %v811_v21 }
 0x442   :  { %v435_v22 = vpop.xlane.xlu0 %434 }
 0x443   :  { %1440 = vrcp.f32 %v435_v22  ;;  %v1397_v22 = vld [vmem:[%s1755_s7 + $0x8] sm:$0xff]  }
 0x444   :  { %v438_v23 = vpop.xlane.xlu1 %437 }
 0x445   :  { %1442 = vrcp.f32 %v438_v23 }
 0x44b   :  { %822 = vrot.lane.b32.xlu1 %v1636_v8, %s1467_s12 }
 0x44d   :  { %v1441_v25 = vpop.eup %1440 }
 0x44e   :  { %571 = vrot.lane.b32.xlu0 %v1638_v9, %s1467_s12  ;;  %v443_v27 = vmul.f32 %v1441_v25, %v1425_v50  ;;  %v1398_v25 = vld [vmem:[%s1755_s7 + $0x10] sm:$0xff]  }
 0x44f   :  { %v1443_v26 = vpop.eup %1442 }
 0x450   :  { %v444_v28 = vmul.f32 %v1443_v26, %v1427_v52  ;;  %v1399_v26 = vld [vmem:[%s1755_s7 + $0x18] sm:$0xff]  }
 0x452   :  { %v445_v30 = vpack.c.bf16 %v444_v28, %v443_v27  ;;  %v1198_v27 = vld [vmem:[%s1757_s8] ss:$0 sm:$0xff] }
 0x454   :  { %1285 = vmatmul.mubr.msk.bf16.vlgmr.msra.gmra.mrb[16].mxu0 %vm420_vm2, %v445_v30 }
 0x455   :  { %1296 = vmatprep.mubr.msk.bf16.mxu0 %vm1466_vm1, %v1465_v29 }
 0x4b5   :  { %v559_v31 = vpop.xlane.xlu0 %558 }
 0x4b9   :  { %v562_v33 = vpop.xlane.xlu1 %561 }
 0x4ba   :  { %1444 = vrcp.f32 %v562_v33 }
 0x4bb   :  { %1446 = vrcp.f32 %v559_v31 }
 0x4bd   :  { %v686_v35 = vpop.xlane.xlu0 %685 }
 0x4bf   :  { %v689_v34 = vpop.xlane.xlu1 %688 }
 0x4c0   :  { %1448 = vrcp.f32 %v689_v34 }
 0x4c1   :  { %1450 = vrcp.f32 %v686_v35 }
 0x4c4   :  { %v1445_v36 = vpop.eup %1444 }
 0x4c5   :  { %v810_v37 = vpop.xlane.xlu0 %809  ;;  %v1447_v9 = vpop.eup %1446  ;;  %v568_v38 = vmul.f32 %v1445_v36, %v1431_v7 }
 0x4c6   :  { %v567_v40 = vmul.f32 %v1447_v9, %v1429_v2 }
 0x4c7   :  { %v813_v39 = vpop.xlane.xlu1 %812 }
 0x4c8   :  { %1452 = vrcp.f32 %v813_v39  ;;  %v569_v42 = vpack.c.bf16 %v568_v38, %v567_v40 }
 0x4c9   :  { %v572_v41 = vpop.permute.xlu0 %571  ;;  %1454 = vrcp.f32 %v810_v37 }
 0x4ca   :  { %1295 = vmatpush3.bf16.msra.mxu0 %v572_v41  ;;  %v1449_v43 = vpop.eup %1448 }
 0x4cb   :  { %1306 = vmatprep.subr.bf16.mxu0 %v1465_v29  ;;  %v1451_v44 = vpop.eup %1450  ;;  %v695_v45 = vmul.f32 %v1449_v43, %v1435_v16  ;;  %v823_v49 = vpop.permute.xlu1 %822 }
 0x4cc   :  { %v694_v46 = vmul.f32 %v1451_v44, %v1433_v14 }
 0x4cd   :  { %1297 = vmatmul.mubr.msk.bf16.vlgmr.msra.gmra.mrb[20].mxu0 %vm420_vm2, %v569_v42 }
 0x4ce   :  { %1307 = vmatpush3.bf16.msra.mxu0 %v1636_v8  ;;  %1308 = vmatprep.mubr.msk.bf16.mxu0 %vm1466_vm1, %v1465_v29  ;;  %v696_v47 = vpack.c.bf16 %v695_v45, %v694_v46 }
 0x4cf   :  { %1318 = vmatprep.subr.bf16.mxu0 %v1465_v29 }
 0x4d2   :  { %v1453_v48 = vpop.eup %1452 }
 0x4d3   :  { %v1455_v50 = vpop.eup %1454  ;;  %v819_v51 = vmul.f32 %v1453_v48, %v1439_v20 }
 0x4d4   :  { %v818_v52 = vmul.f32 %v1455_v50, %v1437_v18 }
 0x4d5   :  { %1309 = vmatmul.mubr.msk.bf16.vlgmr.msra.gmra.mrb[24].mxu0 %vm420_vm2, %v696_v47 }
 0x4d6   :  { %1319 = vmatpush3.bf16.msra.mxu0 %v823_v49  ;;  %1320 = vmatprep.mubr.msk.bf16.mxu0 %vm1466_vm1, %v1465_v29  ;;  %v820_v8 = vpack.c.bf16 %v819_v51, %v818_v52  ;;  %v1389_v29 = vld [vmem:[%s1754_s5 + $0x8] sm:$0xff]  }
 0x4d7   :  { %1326 = vmatprep.subr.bf16.mxu1 %v1389_v29 }
 0x4d8   :  { %1327 = vmatpush3.bf16.msra.mxu1 %v1389_v29 }
 0x4d9   :  { %1328 = vmatprep.subr.bf16.mxu1 %v1390_v59 }
 0x4dc   :  { %1329 = vmatpush3.bf16.msra.mxu1 %v1390_v59 }
 0x4dd   :  { %1321 = vmatmul.mubr.msk.bf16.vlgmr.msra.gmra.mrb[28].mxu0 %vm420_vm2, %v820_v8  ;;  %1330 = vmatprep.subr.bf16.mxu1 %v1391_v60 }
 0x4e0   :  { %1331 = vmatpush3.bf16.msra.mxu1 %v1391_v60 }
 0x4e1   :  { %1332 = vmatprep.subr.bf16.mxu1 %v1392_v61 }
 0x4e4   :  { %1333 = vmatpush3.bf16.msra.mxu1 %v1392_v61 }
 0x4e5   :  { %1334 = vmatprep.subr.bf16.mxu1 %v1393_v63 }
 0x4e8   :  { %1335 = vmatpush3.bf16.msra.mxu1 %v1393_v63 }
 0x4e9   :  { %1336 = vmatprep.subr.bf16.mxu1 %v1394_v0 }
 0x4ec   :  { %1337 = vmatpush3.bf16.msra.mxu1 %v1394_v0 }
 0x4ed   :  { %1338 = vmatprep.subr.bf16.mxu1 %v1395_v6 }
 0x4f0   :  { %1339 = vmatpush3.bf16.msra.mxu1 %v1395_v6 }
 0x4f1   :  { %1344 = vmatprep.subr.bf16.mxu1 %v1396_v10 }
 0x527   :  { %v483_v53 = vpop.f32.mrb[16].mxu0 }
 0x528   :  { %v1286_v54 = vpop.f32.mrb[17].mxu0 }
 0x529   :  { %v486_v55 = vpop.f32.mrb[18].mxu0 }
 0x52a   :  { %v490_v56 = vpack.c.bf16 %v486_v55, %v483_v53  ;;  %v1287_v57 = vpop.f32.mrb[19].mxu0 }
 0x52c   :  { %491 = vst.msk [vmem:[#allocation2] sm:$0xff] %vm45_vm0, %v490_v56 }
 0x5a0   :  { %v611_v62 = vpop.f32.mrb[20].mxu0 }
 0x5a1   :  { %v1298_v1 = vpop.f32.mrb[21].mxu0 }
 0x5a2   :  { %v614_v2 = vpop.f32.mrb[22].mxu0 }
 0x5a3   :  { %v618_v3 = vpack.c.bf16 %v614_v2, %v611_v62  ;;  %v1299_v4 = vpop.f32.mrb[23].mxu0  ;;  %v1205_v2 = vld [vmem:[%s1758_s9] ss:$0 sm:$0xff] }
 0x5a5   :  { %620 = vrot.lane.b32.xlu1 %v618_v3, %s1467_s12 }
 0x5a8   :  { %v734_v5 = vpop.f32.mrb[24].mxu0 }
 0x5a9   :  { %v1310_v7 = vpop.f32.mrb[25].mxu0 }
 0x5aa   :  { %v737_v11 = vpop.f32.mrb[26].mxu0 }
 0x5ab   :  { %v741_v12 = vpack.c.bf16 %v737_v11, %v734_v5  ;;  %v1311_v13 = vpop.f32.mrb[27].mxu0  ;;  %v1206_v5 = vld [vmem:[%s1759_s10] ss:$0 sm:$0xff] }
 0x5ad   :  { %742 = vst.msk [vmem:[#allocation2 + $0x8] sm:$0xff] %vm45_vm0, %v741_v12 }
 0x5b0   :  { %v862_v14 = vpop.f32.mrb[28].mxu0 }
 0x5b1   :  { %v1322_v15 = vpop.f32.mrb[29].mxu0 }
 0x5b2   :  { %v865_v16 = vpop.f32.mrb[30].mxu0 }
 0x5b3   :  { %v869_v17 = vpack.c.bf16 %v865_v16, %v862_v14  ;;  %v1323_v18 = vpop.f32.mrb[31].mxu0 }
 0x5b5   :  { %871 = vrot.lane.b32.xlu1 %v869_v17, %s1467_s12 }
 0x617   :  { %v621_v19 = vpop.permute.xlu1 %620 }
 0x618   :  { %624 = vst.msk [vmem:[#allocation2] sm:$0xff] %vm623_vm3, %v621_v19 }
 0x61f   :  { %v875_v20 = vld [vmem:[#allocation2] sm:$0xff] }
 0x620   :  { %1340 = vmatprep.mubr.bf16.mxu1 %v875_v20 }
 0x627   :  { %v872_v21 = vpop.permute.xlu1 %871 }
 0x628   :  { %874 = vst.msk [vmem:[#allocation2 + $0x8] sm:$0xff] %vm623_vm3, %v872_v21 }
 0x62f   :  { %v876_v23 = vld [vmem:[#allocation2 + $0x8] sm:$0xff] }
 0x630   :  { %1341 = vmatmul.mubr.bf16.vlgmr.msra.gmra.mrb[12].mxu1 %v876_v23 }
 0x631   :  { %1345 = vmatpush3.bf16.msra.mxu1 %v1396_v10  ;;  %1352 = vmatprep.mubr.msk.bf16.mxu1 %vm45_vm0, %v1595_v24  ;;  %v1189_v24 = vld [vmem:[%s1756_s6] ss:$0 sm:$0xff] }
 0x632   :  { %1346 = vmatprep.subr.bf16.mxu1 %v1397_v22  ;;  %v1362_v30 = vadd.f32 %v1198_v27, %v1189_v24 }
 0x635   :  { %1347 = vmatpush3.bf16.msra.mxu1 %v1397_v22 }
 0x636   :  { %1348 = vmatprep.subr.bf16.mxu1 %v1398_v25 }
 0x639   :  { %1349 = vmatpush3.bf16.msra.mxu1 %v1398_v25 }
 0x63a   :  { %1350 = vmatprep.subr.bf16.mxu1 %v1399_v26 }
 0x63d   :  { %1351 = vmatpush3.bf16.msra.mxu1 %v1399_v26 }
 0x640   :  { %1353 = vmatmul.mubr.msk.bf16.vlgmr.msra.gmra.mrb[12].mxu1 %vm45_vm0, %v1607_v32 }
 0x713   :  { %v1354_v28 = vpop.f32.mrb[12].mxu1 }
 0x714   :  { %v1053_v31 = vpop.f32.mrb[13].mxu1  ;;  %v1356_v36 = vadd.f32 %v1354_v28, %v1189_v24 }
 0x715   :  { %v1358_v33 = vadd.f32 %v1189_v24, %v1053_v31  ;;  %v1355_v34 = vpop.f32.mrb[14].mxu1 }
 0x716   :  { %v1056_v35 = vpop.f32.mrb[15].mxu1  ;;  %v1357_v32 = vadd.f32 %v1356_v36, %v1198_v27  ;;  %v1361_v38 = vadd.f32 %v1362_v30, %v1355_v34 }
 0x717   :  { %v1363_v37 = vadd.f32 %v1362_v30, %v1056_v35  ;;  %v1359_v9 = vadd.f32 %v1358_v33, %v1198_v27 }
 0x719   :  { %1074 = vadd.xlane.f32.xlu0 %v1359_v9  ;;  %1076 = vadd.xlane.f32.xlu1 %v1363_v37 }
 0x71d   :  { %1078 = vadd.xlane.f32.xlu0 %v1357_v32 }
 0x721   :  { %1080 = vadd.xlane.f32.xlu0 %v1361_v38 }
 0x7a6   :  { %v1075_v39 = vpop.xlane.xlu0 %1074  ;;  %v1077_v40 = vpop.xlane.xlu1 %1076 }
 0x7a7   :  { %v1083_v41 = vmul.f32 0.0078125, %v1075_v39  ;;  %v1084_v42 = vmul.f32 0.0078125, %v1077_v40 }
 0x7a9   :  { %v1087_v43 = vsub.f32 %v1359_v9, %v1083_v41  ;;  %v1088_v44 = vsub.f32 %v1363_v37, %v1084_v42 }
 0x7aa   :  { %v1079_v45 = vpop.xlane.xlu0 %1078 }
 0x7ab   :  { %v1085_v46 = vmul.f32 0.0078125, %v1079_v45  ;;  %v1091_v47 = vmul.f32 %v1087_v43, %v1087_v43  ;;  %v1092_v48 = vmul.f32 %v1088_v44, %v1088_v44 }
 0x7ad   :  { %v1089_v49 = vsub.f32 %v1357_v32, %v1085_v46  ;;  %1095 = vadd.xlane.f32.xlu0 %v1091_v47  ;;  %1097 = vadd.xlane.f32.xlu1 %v1092_v48 }
 0x7ae   :  { %v1081_v50 = vpop.xlane.xlu0 %1080 }
 0x7af   :  { %v1086_v51 = vmul.f32 0.0078125, %v1081_v50  ;;  %v1093_v52 = vmul.f32 %v1089_v49, %v1089_v49 }
 0x7b1   :  { %v1090_v8 = vsub.f32 %v1361_v38, %v1086_v51  ;;  %1099 = vadd.xlane.f32.xlu0 %v1093_v52 }
 0x7b3   :  { %v1094_v53 = vmul.f32 %v1090_v8, %v1090_v8 }
 0x7b5   :  { %1101 = vadd.xlane.f32.xlu1 %v1094_v53 }
 0x83a   :  { %v1096_v54 = vpop.xlane.xlu0 %1095  ;;  %v1098_v55 = vpop.xlane.xlu1 %1097 }
 0x83b   :  { %v1103_v56 = vmul.f32 0.0078125, %v1096_v54  ;;  %v1104_v57 = vmul.f32 0.0078125, %v1098_v55 }
 0x83d   :  { %v1107_v58 = vadd.f32 1e-12, %v1103_v56  ;;  %v1108_v29 = vadd.f32 1e-12, %v1104_v57 }
 0x83e   :  { %v1100_v59 = vpop.xlane.xlu0 %1099 }
 0x83f   :  { %1456 = vrsqrt.f32 %v1107_v58  ;;  %v1105_v60 = vmul.f32 0.0078125, %v1100_v59 }
 0x840   :  { %1458 = vrsqrt.f32 %v1108_v29 }
 0x841   :  { %v1109_v61 = vadd.f32 1e-12, %v1105_v60 }
 0x842   :  { %v1102_v62 = vpop.xlane.xlu1 %1101 }
 0x843   :  { %1460 = vrsqrt.f32 %v1109_v61  ;;  %v1106_v63 = vmul.f32 0.0078125, %v1102_v62 }
 0x845   :  { %v1110_v0 = vadd.f32 1e-12, %v1106_v63 }
 0x847   :  { %1462 = vrsqrt.f32 %v1110_v0 }
 0x849   :  { %v1457_v1 = vpop.eup %1456 }
 0x84a   :  { %v1459_v3 = vpop.eup %1458  ;;  %v1115_v4 = vmul.f32 %v1457_v1, %v1087_v43 }
 0x84b   :  { %v1116_v6 = vmul.f32 %v1459_v3, %v1088_v44 }
 0x84c   :  { %v1125_v7 = vmul.f32 %v1205_v2, %v1115_v4 }
 0x84d   :  { %v1461_v10 = vpop.eup %1460  ;;  %v1126_v11 = vmul.f32 %v1205_v2, %v1116_v6 }
 0x84e   :  { %v1135_v12 = vadd.f32 %v1206_v5, %v1125_v7  ;;  %v1117_v13 = vmul.f32 %v1461_v10, %v1089_v49 }
 0x84f   :  { %v1136_v14 = vadd.f32 %v1206_v5, %v1126_v11 }
 0x850   :  { %v1127_v17 = vmul.f32 %v1205_v2, %v1117_v13 }
 0x851   :  { %v1463_v15 = vpop.eup %1462  ;;  %v1218_v16 = vpack.c.bf16 %v1136_v14, %v1135_v12 }
 0x852   :  { %v1118_v18 = vmul.f32 %v1463_v15, %v1090_v8  ;;  %v1137_v20 = vadd.f32 %v1206_v5, %v1127_v17 }
 0x853   :  { %1219 = vst [vmem:[%s1760_s11] sm:$0xff] %v1218_v16  }
 0x854   :  { %v1128_v19 = vmul.f32 %v1205_v2, %v1118_v18 }
 0x856   :  { %v1138_v21 = vadd.f32 %v1206_v5, %v1128_v19 }
 0x858   :  { %v1223_v22 = vpack.c.bf16 %v1138_v21, %v1137_v20 }
 0x85a   :  { %1225 = vst [vmem:[%s1760_s11 + $0x8] sm:$0xff] %v1223_v22  }

// kernel: forward.8
= control target key start
LH: loop header
LB: loop body
LE: loop exit
PB: predicated region body
PF: predicated region fallthrough
CT: control target
= control target key end

     0   :  { %v1443_v23 = vmov 0   ;;  %vm1445_vm0 = vmmov 0   ;;  %vm436_vm1 = vcmask 523264   ;;  %vm484_vm2 = vcmask 130048   ;;  %s1731_s0 = inlined_call_operand.vmem [shape: bf16[2,16,128], index: 0, kind: input, shape index: {}]   ;;  %s1732_s3 = inlined_call_operand.vmem [shape: bf16[128,384], index: 3, kind: input, shape index: {}]   ;;  %s1733_s1 = inlined_call_operand.vmem [shape: f32[1,128], index: 1, kind: input, shape index: {}]   ;;  %s1734_s2 = inlined_call_operand.vmem [shape: f32[1,128], index: 2, kind: input, shape index: {}]   ;;  %s1735_s4 = inlined_call_operand.vmem [shape: f32[1,384], index: 4, kind: input, shape index: {}]   ;;  %s1736_s5 = inlined_call_operand.vmem [shape: bf16[128,128], index: 5, kind: input, shape index: {}]   ;;  %s1737_s6 = inlined_call_operand.vmem [shape: f32[1,128], index: 6, kind: input, shape index: {}]   ;;  %s1738_s7 = inlined_call_operand.vmem [shape: f32[1,128], index: 7, kind: input, shape index: {}]   ;;  %s1739_s8 = inlined_call_operand.vmem [shape: f32[1,128], index: 8, kind: input, shape index: {}]   ;;  %s1740_s9 = inlined_call_operand.vmem [shape: bf16[2,16,128], index: 9, kind: output, shape index: {}]  }
   0x1   :  { %v1192_v0 = vld [vmem:[%s1731_s0] sm:$0xff]   ;;  %v1209_v1 = vld [vmem:[%s1731_s0 + $0x8] sm:$0xff]   ;;  %360 = vmatprep.mubr.bf16.mxu0 %v1443_v23  ;;  %v1349_v30 = vld [vmem:[%s1732_s3 + $0x30] ss:$12 sps:$4 sm:$0xff]   ;;  %vm687_vm3 = vcmask 1048064  }
   0x2   :  { %v1193_v2 = vunpack.c.l.bf16 %v1192_v0  ;;  %v1197_v3 = vunpack.c.l.bf16 %v1209_v1  ;;  %v1194_v4 = vunpack.c.h.bf16 %v1192_v0  ;;  %v1198_v5 = vunpack.c.h.bf16 %v1209_v1  ;;  %v1339_v22 = vld [vmem:[%s1732_s3 + $0x4] ss:$12 sps:$4 sm:$0xff]   ;;  %v1341_v24 = vld [vmem:[%s1732_s3] ss:$12 sps:$4 sm:$0xff]   ;;  %v1342_v25 = vld [vmem:[%s1732_s3 + $0x1c] ss:$12 sps:$4 sm:$0xff]  }
   0x3   :  { %328 = vmatprep.subr.bf16.mxu0 %v1339_v22  ;;  %v1344_v26 = vld [vmem:[%s1732_s3 + $0x8] ss:$12 sps:$4 sm:$0xff]   ;;  %v1345_v27 = vld [vmem:[%s1732_s3 + $0x18] ss:$12 sps:$4 sm:$0xff]   ;;  %v1348_v29 = vld [vmem:[%s1732_s3 + $0x20] ss:$12 sps:$4 sm:$0xff]  }
   0x4   :  { %43 = vadd.xlane.f32.xlu0 %v1193_v2  ;;  %47 = vadd.xlane.f32.xlu1 %v1197_v3  ;;  %v1346_v28 = vld [vmem:[%s1732_s3 + $0x34] ss:$12 sps:$4 sm:$0xff]   ;;  %v1352_v31 = vld [vmem:[%s1732_s3 + $0x38] ss:$12 sps:$4 sm:$0xff]   ;;  %v1356_v34 = vld [vmem:[%s1732_s3 + $0x50] ss:$12 sps:$4 sm:$0xff]  }
   0x5   :  { %329 = vmatpush1.bf16.msra.mxu0 %v1341_v24  ;;  %1247 = vmatprep.subr.bf16.mxu1 %v1344_v26  ;;  %v1350_v32 = vld [vmem:[%s1732_s3 + $0x4c] ss:$12 sps:$4 sm:$0xff]   ;;  %v1353_v33 = vld [vmem:[%s1732_s3 + $0x48] ss:$12 sps:$4 sm:$0xff]   ;;  %v1354_v35 = vld [vmem:[%s1732_s3 + $0x64] ss:$12 sps:$4 sm:$0xff]  }
   0x6   :  { %330 = vmatprep.subr.bf16.mxu0 %v1342_v25  ;;  %1248 = vmatpush3.bf16.msra.mxu1 %v1344_v26  ;;  %v1357_v36 = vld [vmem:[%s1732_s3 + $0x60] ss:$12 sps:$4 sm:$0xff]   ;;  %v1360_v37 = vld [vmem:[%s1732_s3 + $0x68] ss:$12 sps:$4 sm:$0xff]   ;;  %v1361_v39 = vld [vmem:[%s1732_s3 + $0x78] ss:$12 sps:$4 sm:$0xff]  }
   0x7   :  { %1249 = vmatprep.subr.bf16.mxu1 %v1348_v29  ;;  %v1358_v38 = vld [vmem:[%s1732_s3 + $0x7c] ss:$12 sps:$4 sm:$0xff]   ;;  %v1364_v40 = vld [vmem:[%s1732_s3 + $0x80] ss:$12 sps:$4 sm:$0xff]   ;;  %v1368_v43 = vld [vmem:[%s1732_s3 + $0x98] ss:$12 sps:$4 sm:$0xff]  }
   0x8   :  { %45 = vadd.xlane.f32.xlu0 %v1194_v4  ;;  %49 = vadd.xlane.f32.xlu1 %v1198_v5  ;;  %v1362_v41 = vld [vmem:[%s1732_s3 + $0x94] ss:$12 sps:$4 sm:$0xff]   ;;  %v1365_v42 = vld [vmem:[%s1732_s3 + $0x90] ss:$12 sps:$4 sm:$0xff]   ;;  %v1366_v44 = vld [vmem:[%s1732_s3 + $0xac] ss:$12 sps:$4 sm:$0xff]  }
   0x9   :  { %331 = vmatpush1.bf16.msra.mxu0 %v1345_v27  ;;  %v1369_v45 = vld [vmem:[%s1732_s3 + $0xa8] ss:$12 sps:$4 sm:$0xff]   ;;  %v1370_v46 = vld [vmem:[%s1732_s3 + $0xb0] ss:$12 sps:$4 sm:$0xff]   ;;  %v1138_v60 = vld [vmem:[%s1733_s1] ss:$0 sm:$0xff] }
   0xa   :  { %332 = vmatprep.subr.bf16.mxu0 %v1346_v28  ;;  %1250 = vmatpush3.bf16.msra.mxu1 %v1348_v29  ;;  %v1139_v62 = vld [vmem:[%s1734_s2] ss:$0 sm:$0xff] }
   0xb   :  { %1251 = vmatprep.subr.bf16.mxu1 %v1352_v31 }
   0xd   :  { %333 = vmatpush1.bf16.msra.mxu0 %v1349_v30 }
   0xe   :  { %334 = vmatprep.subr.bf16.mxu0 %v1350_v32  ;;  %1252 = vmatpush3.bf16.msra.mxu1 %v1352_v31 }
   0xf   :  { %1253 = vmatprep.subr.bf16.mxu1 %v1356_v34 }
  0x11   :  { %335 = vmatpush1.bf16.msra.mxu0 %v1353_v33 }
  0x12   :  { %336 = vmatprep.subr.bf16.mxu0 %v1354_v35  ;;  %1254 = vmatpush3.bf16.msra.mxu1 %v1356_v34 }
  0x13   :  { %1255 = vmatprep.subr.bf16.mxu1 %v1360_v37 }
  0x15   :  { %337 = vmatpush1.bf16.msra.mxu0 %v1357_v36 }
  0x16   :  { %338 = vmatprep.subr.bf16.mxu0 %v1358_v38  ;;  %1256 = vmatpush3.bf16.msra.mxu1 %v1360_v37 }
  0x17   :  { %1257 = vmatprep.subr.bf16.mxu1 %v1364_v40 }
  0x19   :  { %339 = vmatpush1.bf16.msra.mxu0 %v1361_v39 }
  0x1a   :  { %340 = vmatprep.subr.bf16.mxu0 %v1362_v41  ;;  %1258 = vmatpush3.bf16.msra.mxu1 %v1364_v40  ;;  %v1444_v40 = vmov 0.0   ;;  %v185_v41 = vlaneseq }
  0x1b   :  { %1259 = vmatprep.subr.bf16.mxu1 %v1368_v43 }
  0x1d   :  { %341 = vmatpush1.bf16.msra.mxu0 %v1365_v42  ;;  %v186_v42 = vshrl.u32 %v185_v41, 7 }
  0x1e   :  { %342 = vmatprep.subr.bf16.mxu0 %v1366_v44  ;;  %1260 = vmatpush3.bf16.msra.mxu1 %v1368_v43  ;;  %v164_v43 = vld [vmem:[%s1735_s4] sm:$0x7]  ;;  %s1446_s4 = smov 64  }
  0x1f   :  { %1261 = vmatprep.subr.bf16.mxu1 %v1370_v46  ;;  %v191_v44 = vsub.s32 1, %v186_v42 }
  0x21   :  { %343 = vmatpush1.bf16.msra.mxu0 %v1369_v45  ;;  %v195_v45 = vsub.s32 2, %v186_v42 }
  0x22   :  { %1262 = vmatpush3.bf16.msra.mxu1 %v1370_v46  ;;  %1267 = vmatprep.subr.bf16.mxu0 %v1444_v40 }
  0x23   :  { %1279 = vmatprep.subr.bf16.mxu1 %v1444_v40 }
  0x91   :  { %v44_v6 = vpop.xlane.xlu0 %43  ;;  %v48_v7 = vpop.xlane.xlu1 %47 }
  0x92   :  { %v52_v8 = vmul.f32 0.0078125, %v44_v6  ;;  %v54_v9 = vmul.f32 0.0078125, %v48_v7 }
  0x94   :  { %v1503_v10 = vsub.f32 %v1193_v2, %v52_v8  ;;  %v1505_v11 = vsub.f32 %v1197_v3, %v54_v9 }
  0x95   :  { %v46_v12 = vpop.xlane.xlu0 %45  ;;  %v50_v13 = vpop.xlane.xlu1 %49 }
  0x96   :  { %v53_v14 = vmul.f32 0.0078125, %v46_v12  ;;  %v60_v15 = vmul.f32 %v1503_v10, %v1503_v10  ;;  %v55_v16 = vmul.f32 0.0078125, %v50_v13  ;;  %v62_v19 = vmul.f32 %v1505_v11, %v1505_v11 }
  0x98   :  { %v1509_v17 = vsub.f32 %v1194_v4, %v53_v14  ;;  %64 = vadd.xlane.f32.xlu0 %v60_v15  ;;  %v1511_v18 = vsub.f32 %v1198_v5, %v55_v16 }
  0x9a   :  { %v61_v20 = vmul.f32 %v1509_v17, %v1509_v17  ;;  %v63_v21 = vmul.f32 %v1511_v18, %v1511_v18 }
  0x9c   :  { %68 = vadd.xlane.f32.xlu0 %v62_v19  ;;  %66 = vadd.xlane.f32.xlu1 %v61_v20 }
  0xa0   :  { %70 = vadd.xlane.f32.xlu1 %v63_v21 }
 0x125   :  { %v65_v47 = vpop.xlane.xlu0 %64 }
 0x126   :  { %v72_v48 = vmul.f32 0.0078125, %v65_v47 }
 0x128   :  { %v76_v49 = vadd.f32 1e-05, %v72_v48  ;;  %v192_v48 = vrot.slane %v164_v43, %v191_v44 }
 0x129   :  { %v67_v50 = vpop.xlane.xlu1 %66  ;;  %v69_v51 = vpop.xlane.xlu0 %68 }
 0x12a   :  { %1379 = vrsqrt.f32 %v76_v49  ;;  %v73_v52 = vmul.f32 0.0078125, %v67_v50  ;;  %v74_v53 = vmul.f32 0.0078125, %v69_v51  ;;  %v196_v50 = vrot.slane %v164_v43, %v195_v45 }
 0x12c   :  { %v77_v54 = vadd.f32 1e-05, %v73_v52  ;;  %v78_v55 = vadd.f32 1e-05, %v74_v53 }
 0x12d   :  { %v71_v56 = vpop.xlane.xlu1 %70 }
 0x12e   :  { %1381 = vrsqrt.f32 %v77_v54  ;;  %v75_v57 = vmul.f32 0.0078125, %v71_v56 }
 0x12f   :  { %1383 = vrsqrt.f32 %v78_v55 }
 0x130   :  { %v79_v58 = vadd.f32 1e-05, %v75_v57 }
 0x132   :  { %1385 = vrsqrt.f32 %v79_v58 }
 0x134   :  { %v1380_v59 = vpop.eup %1379 }
 0x135   :  { %v84_v61 = vmul.f32 %v1380_v59, %v1503_v10 }
 0x137   :  { %v94_v63 = vmul.f32 %v1138_v60, %v84_v61 }
 0x138   :  { %v1382_v0 = vpop.eup %1381 }
 0x139   :  { %v1384_v1 = vpop.eup %1383  ;;  %v85_v2 = vmul.f32 %v1382_v0, %v1509_v17  ;;  %v104_v3 = vadd.f32 %v1139_v62, %v94_v63 }
 0x13a   :  { %v86_v4 = vmul.f32 %v1384_v1, %v1505_v11 }
 0x13b   :  { %v95_v5 = vmul.f32 %v1138_v60, %v85_v2  ;;  %v108_v6 = vsub.f32 0.0, %v104_v3 }
 0x13c   :  { %v1386_v7 = vpop.eup %1385  ;;  %v96_v8 = vmul.f32 %v1138_v60, %v86_v4 }
 0x13d   :  { %v105_v9 = vadd.f32 %v1139_v62, %v95_v5  ;;  %v112_v12 = vmul.f32 1.442695, %v108_v6  ;;  %v87_v10 = vmul.f32 %v1386_v7, %v1511_v18 }
 0x13e   :  { %v106_v13 = vadd.f32 %v1139_v62, %v96_v8 }
 0x13f   :  { %v109_v14 = vsub.f32 0.0, %v105_v9  ;;  %1387 = vpow2.f32 %v112_v12  ;;  %v97_v15 = vmul.f32 %v1138_v60, %v87_v10 }
 0x140   :  { %v110_v16 = vsub.f32 0.0, %v106_v13 }
 0x141   :  { %v114_v19 = vmul.f32 1.442695, %v109_v14  ;;  %v107_v20 = vadd.f32 %v1139_v62, %v97_v15 }
 0x142   :  { %v116_v21 = vmul.f32 1.442695, %v110_v16 }
 0x143   :  { %1389 = vpow2.f32 %v114_v19  ;;  %v111_v17 = vsub.f32 0.0, %v107_v20 }
 0x144   :  { %1391 = vpow2.f32 %v116_v21 }
 0x145   :  { %v118_v11 = vmul.f32 1.442695, %v111_v17 }
 0x147   :  { %1393 = vpow2.f32 %v118_v11 }
 0x149   :  { %v1388_v22 = vpop.eup %1387 }
 0x14a   :  { %v120_v24 = vadd.f32 1.0, %v1388_v22 }
 0x14c   :  { %1395 = vrcp.f32 %v120_v24 }
 0x14d   :  { %v1390_v25 = vpop.eup %1389 }
 0x14e   :  { %v1392_v26 = vpop.eup %1391  ;;  %v121_v27 = vadd.f32 1.0, %v1390_v25 }
 0x14f   :  { %v122_v18 = vadd.f32 1.0, %v1392_v26 }
 0x150   :  { %1397 = vrcp.f32 %v121_v27 }
 0x151   :  { %v1394_v28 = vpop.eup %1393  ;;  %1399 = vrcp.f32 %v122_v18 }
 0x152   :  { %v123_v29 = vadd.f32 1.0, %v1394_v28 }
 0x154   :  { %1401 = vrcp.f32 %v123_v29 }
 0x156   :  { %v1396_v30 = vpop.eup %1395 }
 0x157   :  { %v1602_v32 = vmul.f32 %v1396_v30, %v104_v3 }
 0x15a   :  { %v1398_v31 = vpop.eup %1397 }
 0x15b   :  { %v1604_v33 = vmul.f32 %v1398_v31, %v105_v9  ;;  %v1400_v34 = vpop.eup %1399 }
 0x15c   :  { %v1608_v37 = vmul.f32 %v1400_v34, %v106_v13 }
 0x15d   :  { %v182_v35 = vpack.c.bf16 %v1604_v33, %v1602_v32 }
 0x15e   :  { %v1402_v36 = vpop.eup %1401 }
 0x15f   :  { %361 = vmatmul.mubr.bf16.vlgmr.msra.gmra.mrb[0].mxu0 %v182_v35  ;;  %1263 = vmatprep.mubr.bf16.mxu1 %v182_v35  ;;  %v1610_v38 = vmul.f32 %v1402_v36, %v107_v20 }
 0x160   :  { %370 = vmatprep.mubr.bf16.mxu0 %v1443_v23  ;;  %v187_v23 = vsub.s32 0, %v186_v42 }
 0x161   :  { %v183_v39 = vpack.c.bf16 %v1610_v38, %v1608_v37 }
 0x162   :  { %v188_v46 = vrot.slane %v164_v43, %v187_v23 }
 0x163   :  { %1264 = vmatmul.mubr.bf16.vlgmr.msra.gmra.mrb[0].mxu1 %v183_v39 }
 0x164   :  { %1281 = vmatprep.mubr.msk.bf16.mxu1 %vm1445_vm0, %v1444_v40 }
 0x167   :  { %371 = vmatmul.mubr.bf16.gmra.mrb[4].mxu0 %v183_v39 }
 0x168   :  { %1269 = vmatprep.mubr.msk.bf16.mxu0 %vm1445_vm0, %v1444_v40 }
 0x232   :  { %v362_v47 = vpop.f32.mrb[0].mxu0 }
 0x233   :  { %v364_v49 = vpop.f32.mrb[1].mxu0  ;;  %v363_v52 = vadd.f32 %v362_v47, %v188_v46 }
 0x234   :  { %v366_v51 = vpop.f32.mrb[2].mxu0  ;;  %v365_v55 = vadd.f32 %v364_v49, %v192_v48 }
 0x235   :  { %v367_v53 = vadd.f32 %v366_v51, %v188_v46  ;;  %v368_v54 = vpop.f32.mrb[3].mxu0 }
 0x236   :  { %v369_v56 = vadd.f32 %v368_v54, %v192_v48  ;;  %v1265_v57 = vpop.f32.mrb[0].mxu1 }
 0x237   :  { %v430_v58 = vpack.c.bf16 %v367_v53, %v363_v52  ;;  %v424_v59 = vadd.f32 %v1265_v57, %v196_v50  ;;  %v415_v60 = vpop.f32.mrb[1].mxu1 }
 0x238   :  { %v431_v61 = vpack.c.bf16 %v369_v56, %v365_v55  ;;  %v1266_v62 = vpop.f32.mrb[2].mxu1  ;;  %v416_v1 = vadd.f32 %v415_v60, %v196_v50 }
 0x239   :  { %v427_v63 = vadd.f32 %v1266_v62, %v196_v50  ;;  %557 = vrot.lane.b32.xlu1 %v430_v58, %s1446_s4  ;;  %v418_v0 = vpop.f32.mrb[3].mxu1 }
 0x23a   :  { %v419_v2 = vadd.f32 %v418_v0, %v196_v50  ;;  %560 = vrot.lane.b32.xlu0 %v431_v61, %s1446_s4  ;;  %v372_v3 = vpop.f32.mrb[4].mxu0  ;;  %v441_v4 = vsel %vm436_vm1, %v431_v61, 0 }
 0x23b   :  { %v1627_v5 = vpack.c.bf16 %v427_v63, %v424_v59  ;;  %v374_v6 = vpop.f32.mrb[5].mxu0  ;;  %1268 = vmatpush3.bf16.xpose.msra.mxu0 %v441_v4  ;;  %v373_v9 = vadd.f32 %v372_v3, %v188_v46 }
 0x23c   :  { %v1629_v7 = vpack.c.bf16 %v419_v2, %v416_v1  ;;  %v376_v8 = vpop.f32.mrb[6].mxu0  ;;  %1273 = vmatprep.subr.bf16.mxu0 %v1444_v40  ;;  %v375_v13 = vadd.f32 %v374_v6, %v192_v48 }
 0x23d   :  { %v377_v12 = vadd.f32 %v376_v8, %v188_v46  ;;  %v378_v10 = vpop.f32.mrb[7].mxu0 }
 0x23e   :  { %v379_v14 = vadd.f32 %v378_v10, %v192_v48 }
 0x23f   :  { %v433_v15 = vpack.c.bf16 %v377_v12, %v373_v9 }
 0x240   :  { %v434_v16 = vpack.c.bf16 %v379_v14, %v375_v13 }
 0x242   :  { %1270 = vmatmul.mubr.msk.bf16.vlgmr.msra.gmra.mrb[8].mxu0 %vm436_vm1, %v430_v58  ;;  %811 = vrot.lane.b32.xlu1 %v434_v16, %s1446_s4  ;;  %v693_v17 = vsel %vm436_vm1, %v434_v16, 0 }
 0x243   :  { %1274 = vmatpush3.bf16.msra.mxu0 %v1629_v7  ;;  %1275 = vmatprep.mubr.msk.bf16.mxu0 %vm1445_vm0, %v1444_v40 }
 0x244   :  { %1285 = vmatprep.subr.bf16.mxu0 %v1444_v40 }
 0x246   :  { %808 = vrot.lane.b32.xlu1 %v433_v15, %s1446_s4 }
 0x2ab   :  { %v558_v21 = vpop.permute.xlu1 %557 }
 0x2ac   :  { %v561_v19 = vpop.permute.xlu0 %560 }
 0x2ad   :  { %v566_v20 = vsel %vm436_vm1, %v561_v19, 0 }
 0x2ae   :  { %1280 = vmatpush3.bf16.xpose.msra.mxu1 %v566_v20 }
 0x2af   :  { %1291 = vmatprep.subr.bf16.mxu1 %v1444_v40 }
 0x2b4   :  { %v812_v11 = vpop.permute.xlu1 %811 }
 0x2b5   :  { %1282 = vmatmul.mubr.msk.bf16.vlgmr.msra.gmra.mrb[4].mxu1 %vm436_vm1, %v558_v21  ;;  %v817_v22 = vsel %vm436_vm1, %v812_v11, 0 }
 0x2b6   :  { %1292 = vmatpush3.bf16.xpose.msra.mxu1 %v693_v17  ;;  %1293 = vmatprep.mubr.msk.bf16.mxu1 %vm1445_vm0, %v1444_v40 }
 0x2b7   :  { %1303 = vmatprep.subr.bf16.mxu1 %v1444_v40 }
 0x2b8   :  { %v809_v24 = vpop.permute.xlu1 %808 }
 0x2bd   :  { %1294 = vmatmul.mubr.msk.bf16.vlgmr.msra.gmra.mrb[8].mxu1 %vm436_vm1, %v433_v15 }
 0x2be   :  { %1304 = vmatpush3.bf16.xpose.msra.mxu1 %v817_v22  ;;  %1305 = vmatprep.mubr.msk.bf16.mxu1 %vm1445_vm0, %v1444_v40 }
 0x2c5   :  { %1306 = vmatmul.mubr.msk.bf16.vlgmr.msra.gmra.mrb[12].mxu1 %vm436_vm1, %v809_v24 }
 0x315   :  { %v477_v25 = vpop.f32.mrb[8].mxu0 }
 0x316   :  { %v1271_v26 = vpop.f32.mrb[9].mxu0  ;;  %v485_v27 = vsel %vm484_vm2, %v477_v25, -inf }
 0x317   :  { %486 = vmax.xlane.f32.xlu0 %v485_v27  ;;  %v480_v18 = vpop.f32.mrb[10].mxu0 }
 0x318   :  { %v1272_v28 = vpop.f32.mrb[11].mxu0  ;;  %v488_v29 = vsel %vm484_vm2, %v480_v18, -inf }
 0x319   :  { %489 = vmax.xlane.f32.xlu1 %v488_v29 }
 0x388   :  { %v602_v30 = vpop.f32.mrb[4].mxu1 }
 0x389   :  { %v1283_v31 = vpop.f32.mrb[5].mxu1  ;;  %v609_v34 = vsel %vm484_vm2, %v602_v30, -inf }
 0x38a   :  { %610 = vmax.xlane.f32.xlu0 %v609_v34  ;;  %v605_v35 = vpop.f32.mrb[6].mxu1 }
 0x38b   :  { %v1284_v36 = vpop.f32.mrb[7].mxu1  ;;  %v612_v39 = vsel %vm484_vm2, %v605_v35, -inf }
 0x38e   :  { %613 = vmax.xlane.f32.xlu0 %v612_v39 }
 0x390   :  { %v729_v41 = vpop.f32.mrb[8].mxu1 }
 0x391   :  { %v1295_v42 = vpop.f32.mrb[9].mxu1  ;;  %v736_v23 = vsel %vm484_vm2, %v729_v41, -inf }
 0x392   :  { %737 = vmax.xlane.f32.xlu0 %v736_v23  ;;  %v732_v43 = vpop.f32.mrb[10].mxu1 }
 0x393   :  { %v1296_v44 = vpop.f32.mrb[11].mxu1  ;;  %v739_v45 = vsel %vm484_vm2, %v732_v43, -inf }
 0x394   :  { %740 = vmax.xlane.f32.xlu1 %v739_v45 }
 0x398   :  { %v853_v46 = vpop.f32.mrb[12].mxu1 }
 0x399   :  { %v1307_v47 = vpop.f32.mrb[13].mxu1  ;;  %v860_v48 = vsel %vm484_vm2, %v853_v46, -inf }
 0x39a   :  { %861 = vmax.xlane.f32.xlu0 %v860_v48  ;;  %v856_v49 = vpop.f32.mrb[14].mxu1 }
 0x39b   :  { %v1308_v50 = vpop.f32.mrb[15].mxu1  ;;  %v863_v51 = vsel %vm484_vm2, %v856_v49, -inf }
 0x39c   :  { %864 = vmax.xlane.f32.xlu1 %v863_v51 }
 0x3a4   :  { %v487_v52 = vpop.xlane.xlu0 %486 }
 0x3a5   :  { %v491_v53 = vsub.f32 %v477_v25, %v487_v52 }
 0x3a6   :  { %v490_v54 = vpop.xlane.xlu1 %489 }
 0x3a7   :  { %v493_v55 = vmul.f32 1.442695, %v491_v53  ;;  %v492_v56 = vsub.f32 %v480_v18, %v490_v54 }
 0x3a9   :  { %1403 = vpow2.f32 %v493_v55  ;;  %v495_v57 = vmul.f32 1.442695, %v492_v56 }
 0x3ab   :  { %1405 = vpow2.f32 %v495_v57 }
 0x3b3   :  { %v1404_v58 = vpop.eup %1403 }
 0x3b4   :  { %v497_v59 = vsel %vm484_vm2, %v1404_v58, 0.0 }
 0x3b5   :  { %v1406_v60 = vpop.eup %1405  ;;  %498 = vadd.xlane.f32.xlu0 %v497_v59 }
 0x3b6   :  { %v500_v61 = vsel %vm484_vm2, %v1406_v60, 0.0 }
 0x3b7   :  { %501 = vadd.xlane.f32.xlu1 %v500_v61 }
 0x417   :  { %v611_v62 = vpop.xlane.xlu0 %610 }
 0x418   :  { %v615_v63 = vsub.f32 %v602_v30, %v611_v62 }
 0x41a   :  { %v617_v0 = vmul.f32 1.442695, %v615_v63 }
 0x41b   :  { %v614_v1 = vpop.xlane.xlu0 %613 }
 0x41c   :  { %1407 = vpow2.f32 %v617_v0  ;;  %v616_v2 = vsub.f32 %v605_v35, %v614_v1 }
 0x41e   :  { %v619_v3 = vmul.f32 1.442695, %v616_v2 }
 0x41f   :  { %v738_v4 = vpop.xlane.xlu0 %737 }
 0x420   :  { %1409 = vpow2.f32 %v619_v3  ;;  %v742_v6 = vsub.f32 %v729_v41, %v738_v4  ;;  %v1371_v4 = vld [vmem:[%s1736_s5] sm:$0xff]  }
 0x421   :  { %v741_v8 = vpop.xlane.xlu1 %740  ;;  %1315 = vmatprep.subr.bf16.mxu1 %v1371_v4 }
 0x422   :  { %v744_v9 = vmul.f32 1.442695, %v742_v6  ;;  %v743_v12 = vsub.f32 %v732_v43, %v741_v8  ;;  %1316 = vmatpush3.bf16.msra.mxu1 %v1371_v4  ;;  %v1373_v6 = vld [vmem:[%s1736_s5 + $0x10] sm:$0xff]   ;;  %v1374_v8 = vld [vmem:[%s1736_s5 + $0x18] sm:$0xff]  }
 0x424   :  { %1411 = vpow2.f32 %v744_v9  ;;  %v746_v10 = vmul.f32 1.442695, %v743_v12  ;;  %v1375_v9 = vld [vmem:[%s1736_s5 + $0x20] sm:$0xff]  }
 0x426   :  { %v1408_v13 = vpop.eup %1407  ;;  %1413 = vpow2.f32 %v746_v10  ;;  %v1376_v10 = vld [vmem:[%s1736_s5 + $0x28] sm:$0xff]  }
 0x427   :  { %v862_v14 = vpop.xlane.xlu0 %861  ;;  %v621_v15 = vsel %vm484_vm2, %v1408_v13, 0.0 }
 0x428   :  { %v866_v16 = vsub.f32 %v853_v46, %v862_v14  ;;  %622 = vadd.xlane.f32.xlu0 %v621_v15 }
 0x429   :  { %v865_v19 = vpop.xlane.xlu1 %864 }
 0x42a   :  { %v1410_v20 = vpop.eup %1409  ;;  %v868_v21 = vmul.f32 1.442695, %v866_v16  ;;  %v867_v17 = vsub.f32 %v856_v49, %v865_v19  ;;  %v1377_v19 = vld [vmem:[%s1736_s5 + $0x30] sm:$0xff]  }
 0x42b   :  { %v624_v11 = vsel %vm484_vm2, %v1410_v20, 0.0 }
 0x42c   :  { %1415 = vpow2.f32 %v868_v21  ;;  %v870_v22 = vmul.f32 1.442695, %v867_v17  ;;  %625 = vadd.xlane.f32.xlu1 %v624_v11  ;;  %v1378_v21 = vld [vmem:[%s1736_s5 + $0x38] sm:$0xff]  }
 0x42e   :  { %v1412_v24 = vpop.eup %1411  ;;  %1417 = vpow2.f32 %v870_v22 }
 0x42f   :  { %v748_v25 = vsel %vm484_vm2, %v1412_v24, 0.0 }
 0x430   :  { %v1414_v26 = vpop.eup %1413  ;;  %749 = vadd.xlane.f32.xlu0 %v748_v25 }
 0x431   :  { %v751_v27 = vsel %vm484_vm2, %v1414_v26, 0.0 }
 0x432   :  { %752 = vadd.xlane.f32.xlu1 %v751_v27 }
 0x436   :  { %v1416_v18 = vpop.eup %1415 }
 0x437   :  { %v872_v28 = vsel %vm484_vm2, %v1416_v18, 0.0 }
 0x438   :  { %v1418_v29 = vpop.eup %1417  ;;  %873 = vadd.xlane.f32.xlu0 %v872_v28 }
 0x439   :  { %v875_v30 = vsel %vm484_vm2, %v1418_v29, 0.0 }
 0x43a   :  { %876 = vadd.xlane.f32.xlu1 %v875_v30 }
 0x442   :  { %v499_v31 = vpop.xlane.xlu0 %498 }
 0x443   :  { %1419 = vrcp.f32 %v499_v31 }
 0x444   :  { %v502_v34 = vpop.xlane.xlu1 %501 }
 0x445   :  { %1421 = vrcp.f32 %v502_v34 }
 0x44b   :  { %886 = vrot.lane.b32.xlu1 %v1627_v5, %s1446_s4 }
 0x44d   :  { %v1420_v35 = vpop.eup %1419 }
 0x44e   :  { %635 = vrot.lane.b32.xlu0 %v1629_v7, %s1446_s4  ;;  %v507_v39 = vmul.f32 %v1420_v35, %v1404_v58  ;;  %v1172_v35 = vld [vmem:[%s1737_s6] ss:$0 sm:$0xff] }
 0x44f   :  { %v1422_v36 = vpop.eup %1421 }
 0x450   :  { %v508_v41 = vmul.f32 %v1422_v36, %v1406_v60 }
 0x452   :  { %v509_v42 = vpack.c.bf16 %v508_v41, %v507_v39 }
 0x454   :  { %1276 = vmatmul.mubr.msk.bf16.vlgmr.msra.gmra.mrb[12].mxu0 %vm484_vm2, %v509_v42 }
 0x455   :  { %1287 = vmatprep.mubr.msk.bf16.mxu0 %vm1445_vm0, %v1444_v40 }
 0x4b5   :  { %v623_v23 = vpop.xlane.xlu0 %622 }
 0x4b9   :  { %v626_v43 = vpop.xlane.xlu1 %625 }
 0x4ba   :  { %1423 = vrcp.f32 %v626_v43 }
 0x4bb   :  { %1425 = vrcp.f32 %v623_v23 }
 0x4bd   :  { %v750_v45 = vpop.xlane.xlu0 %749 }
 0x4bf   :  { %v753_v44 = vpop.xlane.xlu1 %752 }
 0x4c0   :  { %1427 = vrcp.f32 %v753_v44 }
 0x4c1   :  { %1429 = vrcp.f32 %v750_v45 }
 0x4c4   :  { %v1424_v46 = vpop.eup %1423 }
 0x4c5   :  { %v874_v47 = vpop.xlane.xlu0 %873  ;;  %v1426_v7 = vpop.eup %1425  ;;  %v632_v48 = vmul.f32 %v1424_v46, %v1410_v20 }
 0x4c6   :  { %v631_v50 = vmul.f32 %v1426_v7, %v1408_v13 }
 0x4c7   :  { %v877_v49 = vpop.xlane.xlu1 %876 }
 0x4c8   :  { %1431 = vrcp.f32 %v877_v49  ;;  %v633_v52 = vpack.c.bf16 %v632_v48, %v631_v50 }
 0x4c9   :  { %v636_v51 = vpop.permute.xlu0 %635  ;;  %1433 = vrcp.f32 %v874_v47 }
 0x4ca   :  { %1286 = vmatpush3.bf16.msra.mxu0 %v636_v51  ;;  %v1428_v53 = vpop.eup %1427 }
 0x4cb   :  { %1297 = vmatprep.subr.bf16.mxu0 %v1444_v40  ;;  %v1430_v54 = vpop.eup %1429  ;;  %v759_v55 = vmul.f32 %v1428_v53, %v1414_v26  ;;  %v887_v59 = vpop.permute.xlu1 %886 }
 0x4cc   :  { %v758_v56 = vmul.f32 %v1430_v54, %v1412_v24 }
 0x4cd   :  { %1288 = vmatmul.mubr.msk.bf16.vlgmr.msra.gmra.mrb[16].mxu0 %vm484_vm2, %v633_v52 }
 0x4ce   :  { %1298 = vmatpush3.bf16.msra.mxu0 %v1627_v5  ;;  %1299 = vmatprep.mubr.msk.bf16.mxu0 %vm1445_vm0, %v1444_v40  ;;  %v760_v57 = vpack.c.bf16 %v759_v55, %v758_v56 }
 0x4cf   :  { %1309 = vmatprep.subr.bf16.mxu0 %v1444_v40 }
 0x4d2   :  { %v1432_v58 = vpop.eup %1431 }
 0x4d3   :  { %v1434_v60 = vpop.eup %1433  ;;  %v883_v61 = vmul.f32 %v1432_v58, %v1418_v29 }
 0x4d4   :  { %v882_v62 = vmul.f32 %v1434_v60, %v1416_v18 }
 0x4d5   :  { %1300 = vmatmul.mubr.msk.bf16.vlgmr.msra.gmra.mrb[20].mxu0 %vm484_vm2, %v760_v57 }
 0x4d6   :  { %1310 = vmatpush3.bf16.msra.mxu0 %v887_v59  ;;  %1311 = vmatprep.mubr.msk.bf16.mxu0 %vm1445_vm0, %v1444_v40  ;;  %v884_v5 = vpack.c.bf16 %v883_v61, %v882_v62  ;;  %v1372_v40 = vld [vmem:[%s1736_s5 + $0x8] sm:$0xff]  }
 0x4d7   :  { %1317 = vmatprep.subr.bf16.mxu1 %v1372_v40 }
 0x4d8   :  { %1318 = vmatpush3.bf16.msra.mxu1 %v1372_v40 }
 0x4d9   :  { %1319 = vmatprep.subr.bf16.mxu1 %v1373_v6 }
 0x4dc   :  { %1320 = vmatpush3.bf16.msra.mxu1 %v1373_v6 }
 0x4dd   :  { %1312 = vmatmul.mubr.msk.bf16.vlgmr.msra.gmra.mrb[24].mxu0 %vm484_vm2, %v884_v5  ;;  %1321 = vmatprep.subr.bf16.mxu1 %v1374_v8 }
 0x4e0   :  { %1322 = vmatpush3.bf16.msra.mxu1 %v1374_v8 }
 0x4e1   :  { %1323 = vmatprep.subr.bf16.mxu1 %v1375_v9 }
 0x4e4   :  { %1324 = vmatpush3.bf16.msra.mxu1 %v1375_v9 }
 0x4e5   :  { %1325 = vmatprep.subr.bf16.mxu1 %v1376_v10 }
 0x4e8   :  { %1326 = vmatpush3.bf16.msra.mxu1 %v1376_v10 }
 0x4e9   :  { %1327 = vmatprep.subr.bf16.mxu1 %v1377_v19 }
 0x4ec   :  { %1328 = vmatpush3.bf16.msra.mxu1 %v1377_v19  ;;  %v1182_v19 = vld [vmem:[%s1739_s8] ss:$0 sm:$0xff] }
 0x4ed   :  { %1329 = vmatprep.subr.bf16.mxu1 %v1378_v21 }
 0x4f0   :  { %1330 = vmatpush3.bf16.msra.mxu1 %v1378_v21 }
 0x527   :  { %v547_v63 = vpop.f32.mrb[12].mxu0 }
 0x528   :  { %v1277_v0 = vpop.f32.mrb[13].mxu0 }
 0x529   :  { %v550_v1 = vpop.f32.mrb[14].mxu0 }
 0x52a   :  { %v554_v2 = vpack.c.bf16 %v550_v1, %v547_v63  ;;  %v1278_v3 = vpop.f32.mrb[15].mxu0 }
 0x52c   :  { %555 = vst.msk [vmem:[#allocation2] sm:$0xff] %vm436_vm1, %v554_v2 }
 0x5a0   :  { %v675_v12 = vpop.f32.mrb[16].mxu0 }
 0x5a1   :  { %v1289_v13 = vpop.f32.mrb[17].mxu0 }
 0x5a2   :  { %v678_v14 = vpop.f32.mrb[18].mxu0 }
 0x5a3   :  { %v682_v15 = vpack.c.bf16 %v678_v14, %v675_v12  ;;  %v1290_v16 = vpop.f32.mrb[19].mxu0  ;;  %v1181_v12 = vld [vmem:[%s1738_s7] ss:$0 sm:$0xff] }
 0x5a5   :  { %684 = vrot.lane.b32.xlu1 %v682_v15, %s1446_s4 }
 0x5a8   :  { %v798_v20 = vpop.f32.mrb[20].mxu0 }
 0x5a9   :  { %v1301_v17 = vpop.f32.mrb[21].mxu0 }
 0x5aa   :  { %v801_v11 = vpop.f32.mrb[22].mxu0 }
 0x5ab   :  { %v805_v22 = vpack.c.bf16 %v801_v11, %v798_v20  ;;  %v1302_v24 = vpop.f32.mrb[23].mxu0 }
 0x5ad   :  { %806 = vst.msk [vmem:[#allocation2 + $0x8] sm:$0xff] %vm436_vm1, %v805_v22 }
 0x5b0   :  { %v926_v25 = vpop.f32.mrb[24].mxu0 }
 0x5b1   :  { %v1313_v26 = vpop.f32.mrb[25].mxu0 }
 0x5b2   :  { %v929_v27 = vpop.f32.mrb[26].mxu0 }
 0x5b3   :  { %v933_v18 = vpack.c.bf16 %v929_v27, %v926_v25  ;;  %v1314_v28 = vpop.f32.mrb[27].mxu0 }
 0x5b5   :  { %935 = vrot.lane.b32.xlu1 %v933_v18, %s1446_s4 }
 0x617   :  { %v685_v29 = vpop.permute.xlu1 %684 }
 0x618   :  { %688 = vst.msk [vmem:[#allocation2] sm:$0xff] %vm687_vm3, %v685_v29 }
 0x61f   :  { %v939_v30 = vld [vmem:[#allocation2] sm:$0xff] }
 0x620   :  { %1331 = vmatprep.mubr.bf16.mxu1 %v939_v30 }
 0x627   :  { %v936_v31 = vpop.permute.xlu1 %935 }
 0x628   :  { %938 = vst.msk [vmem:[#allocation2 + $0x8] sm:$0xff] %vm687_vm3, %v936_v31 }
 0x62f   :  { %v940_v34 = vld [vmem:[#allocation2 + $0x8] sm:$0xff] }
 0x630   :  { %1332 = vmatmul.mubr.bf16.vlgmr.msra.gmra.mrb[16].mxu1 %v940_v34 }
 0x703   :  { %v1333_v36 = vpop.f32.mrb[16].mxu1 }
 0x704   :  { %v1029_v39 = vpop.f32.mrb[17].mxu1  ;;  %v1038_v43 = vadd.f32 %v1333_v36, %v1172_v35 }
 0x705   :  { %v1030_v41 = vadd.f32 %v1172_v35, %v1029_v39  ;;  %v1334_v42 = vpop.f32.mrb[18].mxu1 }
 0x706   :  { %v1032_v23 = vpop.f32.mrb[19].mxu1  ;;  %v1041_v47 = vadd.f32 %v1334_v42, %v1172_v35  ;;  %v1048_v7 = vadd.f32 %v1038_v43, %v1608_v37 }
 0x707   :  { %v1033_v44 = vadd.f32 %v1172_v35, %v1032_v23  ;;  %v1046_v45 = vadd.f32 %v1030_v41, %v1602_v32 }
 0x708   :  { %v1049_v48 = vadd.f32 %v1041_v47, %v1610_v38 }
 0x709   :  { %1050 = vadd.xlane.f32.xlu0 %v1046_v45  ;;  %v1047_v46 = vadd.f32 %v1033_v44, %v1604_v33 }
 0x70b   :  { %1052 = vadd.xlane.f32.xlu1 %v1047_v46 }
 0x70d   :  { %1054 = vadd.xlane.f32.xlu0 %v1048_v7 }
 0x711   :  { %1056 = vadd.xlane.f32.xlu0 %v1049_v48 }
 0x796   :  { %v1051_v49 = vpop.xlane.xlu0 %1050 }
 0x797   :  { %v1058_v50 = vmul.f32 0.0078125, %v1051_v49 }
 0x798   :  { %v1053_v51 = vpop.xlane.xlu1 %1052 }
 0x799   :  { %v1062_v52 = vsub.f32 %v1046_v45, %v1058_v50  ;;  %v1059_v53 = vmul.f32 0.0078125, %v1053_v51 }
 0x79a   :  { %v1055_v54 = vpop.xlane.xlu0 %1054 }
 0x79b   :  { %v1063_v55 = vsub.f32 %v1047_v46, %v1059_v53  ;;  %v1060_v56 = vmul.f32 0.0078125, %v1055_v54  ;;  %v1066_v32 = vmul.f32 %v1062_v52, %v1062_v52 }
 0x79d   :  { %v1064_v57 = vsub.f32 %v1048_v7, %v1060_v56  ;;  %1070 = vadd.xlane.f32.xlu0 %v1066_v32  ;;  %v1067_v33 = vmul.f32 %v1063_v55, %v1063_v55 }
 0x79e   :  { %v1057_v58 = vpop.xlane.xlu0 %1056 }
 0x79f   :  { %v1061_v59 = vmul.f32 0.0078125, %v1057_v58  ;;  %1072 = vadd.xlane.f32.xlu1 %v1067_v33  ;;  %v1068_v37 = vmul.f32 %v1064_v57, %v1064_v57 }
 0x7a1   :  { %v1065_v60 = vsub.f32 %v1049_v48, %v1061_v59  ;;  %1074 = vadd.xlane.f32.xlu0 %v1068_v37 }
 0x7a3   :  { %v1069_v38 = vmul.f32 %v1065_v60, %v1065_v60 }
 0x7a5   :  { %1076 = vadd.xlane.f32.xlu1 %v1069_v38 }
 0x82a   :  { %v1071_v61 = vpop.xlane.xlu0 %1070 }
 0x82b   :  { %v1078_v62 = vmul.f32 0.0078125, %v1071_v61 }
 0x82c   :  { %v1073_v5 = vpop.xlane.xlu1 %1072 }
 0x82d   :  { %v1082_v63 = vadd.f32 1e-12, %v1078_v62  ;;  %v1079_v0 = vmul.f32 0.0078125, %v1073_v5 }
 0x82e   :  { %v1075_v1 = vpop.xlane.xlu0 %1074 }
 0x82f   :  { %1435 = vrsqrt.f32 %v1082_v63  ;;  %v1083_v2 = vadd.f32 1e-12, %v1079_v0  ;;  %v1080_v3 = vmul.f32 0.0078125, %v1075_v1 }
 0x831   :  { %1437 = vrsqrt.f32 %v1083_v2  ;;  %v1084_v4 = vadd.f32 1e-12, %v1080_v3 }
 0x832   :  { %v1077_v40 = vpop.xlane.xlu1 %1076 }
 0x833   :  { %1439 = vrsqrt.f32 %v1084_v4  ;;  %v1081_v6 = vmul.f32 0.0078125, %v1077_v40 }
 0x835   :  { %v1085_v8 = vadd.f32 1e-12, %v1081_v6 }
 0x837   :  { %1441 = vrsqrt.f32 %v1085_v8 }
 0x839   :  { %v1436_v9 = vpop.eup %1435 }
 0x83a   :  { %v1090_v10 = vmul.f32 %v1436_v9, %v1062_v52 }
 0x83b   :  { %v1438_v13 = vpop.eup %1437 }
 0x83c   :  { %v1100_v14 = vmul.f32 %v1181_v12, %v1090_v10  ;;  %v1091_v15 = vmul.f32 %v1438_v13, %v1063_v55 }
 0x83d   :  { %v1440_v16 = vpop.eup %1439 }
 0x83e   :  { %v1101_v20 = vmul.f32 %v1181_v12, %v1091_v15  ;;  %v1092_v21 = vmul.f32 %v1440_v16, %v1064_v57  ;;  %v1110_v17 = vadd.f32 %v1182_v19, %v1100_v14 }
 0x840   :  { %v1111_v11 = vadd.f32 %v1182_v19, %v1101_v20  ;;  %v1102_v25 = vmul.f32 %v1181_v12, %v1092_v21 }
 0x841   :  { %v1442_v22 = vpop.eup %1441 }
 0x842   :  { %v1202_v24 = vpack.c.bf16 %v1111_v11, %v1110_v17  ;;  %v1093_v26 = vmul.f32 %v1442_v22, %v1065_v60  ;;  %v1112_v18 = vadd.f32 %v1182_v19, %v1102_v25 }
 0x844   :  { %1203 = vst [vmem:[%s1740_s9] sm:$0xff] %v1202_v24   ;;  %v1103_v27 = vmul.f32 %v1181_v12, %v1093_v26 }
 0x846   :  { %v1113_v28 = vadd.f32 %v1182_v19, %v1103_v27 }
 0x848   :  { %v1207_v29 = vpack.c.bf16 %v1113_v28, %v1112_v18 }
 0x84a   :  { %1210 = vst [vmem:[%s1740_s9 + $0x8] sm:$0xff] %v1207_v29  }

// kernel: forward.7
= control target key start
LH: loop header
LB: loop body
LE: loop exit
PB: predicated region body
PF: predicated region fallthrough
CT: control target
= control target key end

     0   :  { %v101_v26 = vlaneseq  ;;  %vm141_vm0 = vcmask 1041409   ;;  %v1809_v52 = vmov 1966171168   ;;  %vm1812_vm1 = vmmov 0   ;;  %s2215_s2 = inlined_call_operand.vmem [shape: bf16[256,128], index: 2, kind: input, shape index: {}]   ;;  %s2216_s1 = inlined_call_operand.vmem [shape: f32[2,1,256], index: 1, kind: input, shape index: {}]   ;;  %s2217_s3 = inlined_call_operand.vmem [shape: f32[1,128], index: 3, kind: input, shape index: {}]   ;;  %s2218_s0 = inlined_call_operand.vmem [shape: bf16[2,16,128], index: 0, kind: input, shape index: {}]   ;;  %s2219_s6 = inlined_call_operand.vmem [shape: bf16[128,384], index: 6, kind: input, shape index: {}]   ;;  %s2220_s4 = inlined_call_operand.vmem [shape: f32[1,128], index: 4, kind: input, shape index: {}]   ;;  %s2221_s5 = inlined_call_operand.vmem [shape: f32[1,128], index: 5, kind: input, shape index: {}]   ;;  %s2222_s7 = inlined_call_operand.vmem [shape: f32[1,384], index: 7, kind: input, shape index: {}]   ;;  %s2223_s8 = inlined_call_operand.vmem [shape: bf16[128,128], index: 8, kind: input, shape index: {}]   ;;  %s2224_s9 = inlined_call_operand.vmem [shape: f32[1,128], index: 9, kind: input, shape index: {}]   ;;  %s2225_s10 = inlined_call_operand.vmem [shape: f32[1,128], index: 10, kind: input, shape index: {}]   ;;  %s2226_s12 = inlined_call_operand.vmem [shape: bf16[2,16,128], index: 12, kind: input, shape index: {}]   ;;  %s2227_s11 = inlined_call_operand.vmem [shape: f32[1,128], index: 11, kind: input, shape index: {}]   ;;  %s2228_s13 = inlined_call_operand.vmem [shape: bf16[2,16,128], index: 13, kind: output, shape index: {}]  }
   0x1   :  { %v1681_v0 = vld [vmem:[%s2215_s2 + $0x40] sm:$0xff]   ;;  %v1683_v2 = vld [vmem:[%s2215_s2 + $0x48] sm:$0xff]   ;;  %v1685_v4 = vld [vmem:[%s2215_s2 + $0x50] sm:$0xff]   ;;  %v287_v53 = vunpack.c.l.s4 %v1809_v52  ;;  %vm717_vm2 = vcmask 523264   ;;  %vm765_vm3 = vcmask 130048   ;;  %vm968_vm4 = vcmask 1048064  }
   0x2   :  { %v1682_v1 = vld [vmem:[%s2215_s2] sm:$0xff]   ;;  %1530 = vmatprep.subr.bf16.mxu0 %v1681_v0  ;;  %v1684_v3 = vld [vmem:[%s2215_s2 + $0x8] sm:$0xff]   ;;  %v1686_v5 = vld [vmem:[%s2215_s2 + $0x10] sm:$0xff]   ;;  %v1938_v27 = vshrl.u32 %v101_v26, 7 }
   0x3   :  { %1531 = vmatpush3.bf16.msra.mxu0 %v1682_v1  ;;  %v1687_v6 = vld [vmem:[%s2215_s2 + $0x58] sm:$0xff]   ;;  %v1689_v8 = vld [vmem:[%s2215_s2 + $0x60] sm:$0xff]   ;;  %v1691_v10 = vld [vmem:[%s2215_s2 + $0x68] sm:$0xff]   ;;  %v288_v54 = vunpack.c.0.s8 %v287_v53 }
   0x4   :  { %1532 = vmatprep.subr.bf16.mxu0 %v1683_v2  ;;  %v1688_v7 = vld [vmem:[%s2215_s2 + $0x18] sm:$0xff]   ;;  %v1690_v9 = vld [vmem:[%s2215_s2 + $0x20] sm:$0xff]   ;;  %v1692_v15 = vld [vmem:[%s2215_s2 + $0x28] sm:$0xff]   ;;  %v1941_v29 = vsub.s32 1, %v1938_v27  ;;  %v1944_v30 = vsub.s32 0, %v1938_v27 }
   0x5   :  { %v53_v11 = vld [vmem:[%s2216_s1] sm:$0x3]  ;;  %v54_v12 = vld [vmem:[%s2216_s1 + $0x2] sm:$0x3]  ;;  %v1693_v18 = vld [vmem:[%s2215_s2 + $0x70] sm:$0xff]   ;;  %v291_v59 = vsub.s32 %v288_v54, %v1938_v27 }
   0x6   :  { %v55_v13 = vsub.f32 0.0, %v53_v11  ;;  %v56_v14 = vsub.f32 0.0, %v54_v12  ;;  %v1694_v19 = vld [vmem:[%s2215_s2 + $0x30] sm:$0xff]   ;;  %v1695_v20 = vld [vmem:[%s2215_s2 + $0x78] sm:$0xff]   ;;  %v1431_v56 = vld [vmem:[%s2217_s3] ss:$0 sm:$0xff] }
   0x7   :  { %1533 = vmatpush3.bf16.msra.mxu0 %v1684_v3  ;;  %v1696_v21 = vld [vmem:[%s2215_s2 + $0x38] sm:$0xff]   ;;  %v1502_v63 = vld [vmem:[%s2218_s0] sm:$0xff]   ;;  %v1527_v1 = vld [vmem:[%s2218_s0 + $0x8] sm:$0xff]  }
   0x8   :  { %1534 = vmatprep.subr.bf16.mxu0 %v1685_v4  ;;  %v57_v16 = vmul.f32 1.442695, %v55_v13  ;;  %v59_v17 = vmul.f32 1.442695, %v56_v14  ;;  %v1503_v3 = vunpack.c.l.bf16 %v1502_v63  ;;  %v1507_v13 = vunpack.c.l.bf16 %v1527_v1 }
   0xa   :  { %1737 = vpow2.f32 %v57_v16 }
   0xb   :  { %1535 = vmatpush3.bf16.msra.mxu0 %v1686_v5  ;;  %1739 = vpow2.f32 %v59_v17 }
   0xc   :  { %1536 = vmatprep.subr.bf16.mxu0 %v1687_v6 }
   0xf   :  { %1537 = vmatpush3.bf16.msra.mxu0 %v1688_v7  ;;  %v1508_v7 = vunpack.c.h.bf16 %v1527_v1 }
  0x10   :  { %1538 = vmatprep.subr.bf16.mxu0 %v1689_v8 }
  0x13   :  { %1539 = vmatpush3.bf16.msra.mxu0 %v1690_v9  ;;  %v1504_v9 = vunpack.c.h.bf16 %v1502_v63 }
  0x14   :  { %1540 = vmatprep.subr.bf16.mxu0 %v1691_v10  ;;  %v1738_v22 = vpop.eup %1737 }
  0x15   :  { %v1740_v23 = vpop.eup %1739  ;;  %v61_v24 = vadd.f32 1.0, %v1738_v22 }
  0x16   :  { %v62_v25 = vadd.f32 1.0, %v1740_v23 }
  0x17   :  { %1541 = vmatpush3.bf16.msra.mxu0 %v1692_v15  ;;  %1741 = vrcp.f32 %v61_v24 }
  0x18   :  { %1542 = vmatprep.subr.bf16.mxu0 %v1693_v18  ;;  %1743 = vrcp.f32 %v62_v25 }
  0x1b   :  { %1543 = vmatpush3.bf16.msra.mxu0 %v1694_v19 }
  0x1c   :  { %1544 = vmatprep.subr.bf16.mxu0 %v1695_v20 }
  0x1f   :  { %1545 = vmatpush3.bf16.msra.mxu0 %v1696_v21 }
  0x21   :  { %v1742_v28 = vpop.eup %1741 }
  0x22   :  { %v1744_v31 = vpop.eup %1743  ;;  %v65_v32 = vmul.f32 %v1742_v28, %v53_v11  ;;  %v1697_v28 = vld [vmem:[%s2219_s6 + $0x4] ss:$12 sps:$4 sm:$0xff]  }
  0x23   :  { %v66_v33 = vmul.f32 %v1744_v31, %v54_v12  ;;  %v1810_v31 = vmov 0   ;;  %609 = vmatprep.subr.bf16.mxu1 %v1697_v28 }
  0x24   :  { %v108_v34 = vrot.slane %v65_v32, %v1941_v29  ;;  %v104_v35 = vrot.slane %v65_v32, %v1944_v30  ;;  %641 = vmatprep.mubr.bf16.mxu1 %v1810_v31  ;;  %v1699_v32 = vld [vmem:[%s2219_s6] ss:$12 sps:$4 sm:$0xff]  }
  0x25   :  { %v116_v36 = vrot.slane %v66_v33, %v1941_v29  ;;  %v112_v37 = vrot.slane %v66_v33, %v1944_v30  ;;  %v1700_v33 = vld [vmem:[%s2219_s6 + $0x1c] ss:$12 sps:$4 sm:$0xff]   ;;  %610 = vmatpush1.bf16.msra.mxu1 %v1699_v32  ;;  %v1811_v32 = vmov 0.0  }
  0x26   :  { %v122_v38 = vpack.c.bf16 %v108_v34, %v108_v34  ;;  %v121_v39 = vpack.c.bf16 %v104_v35, %v104_v35  ;;  %v1702_v34 = vld [vmem:[%s2219_s6 + $0x18] ss:$12 sps:$4 sm:$0xff]   ;;  %611 = vmatprep.subr.bf16.mxu1 %v1700_v33  ;;  %v1703_v35 = vld [vmem:[%s2219_s6 + $0x34] ss:$12 sps:$4 sm:$0xff]  }
  0x27   :  { %v124_v40 = vpack.c.bf16 %v116_v36, %v116_v36  ;;  %v123_v41 = vpack.c.bf16 %v112_v37, %v112_v37  ;;  %v1705_v36 = vld [vmem:[%s2219_s6 + $0x30] ss:$12 sps:$4 sm:$0xff]   ;;  %v1706_v37 = vld [vmem:[%s2219_s6 + $0x4c] ss:$12 sps:$4 sm:$0xff]  }
  0x28   :  { %v137_v42 = vunpack.c.l.b16 %v122_v38  ;;  %v136_v44 = vunpack.c.l.b16 %v121_v39  ;;  %v1708_v38 = vld [vmem:[%s2219_s6 + $0x48] ss:$12 sps:$4 sm:$0xff]   ;;  %v1709_v39 = vld [vmem:[%s2219_s6 + $0x64] ss:$12 sps:$4 sm:$0xff]  }
  0x29   :  { %v139_v43 = vunpack.c.l.b16 %v124_v40  ;;  %v138_v45 = vunpack.c.l.b16 %v123_v41  ;;  %612 = vmatpush1.bf16.msra.mxu1 %v1702_v34  ;;  %v1711_v40 = vld [vmem:[%s2219_s6 + $0x60] ss:$12 sps:$4 sm:$0xff]   ;;  %v1712_v41 = vld [vmem:[%s2219_s6 + $0x7c] ss:$12 sps:$4 sm:$0xff]  }
  0x2a   :  { %613 = vmatprep.subr.bf16.mxu1 %v1703_v35 }
  0x2b   :  { %v143_v46 = vrot.slane %v139_v43, 7  ;;  %v140_v47 = vrot.slane %v138_v45, 7  ;;  %v1715_v43 = vld [vmem:[%s2219_s6 + $0x94] ss:$12 sps:$4 sm:$0xff]   ;;  %v1718_v45 = vld [vmem:[%s2219_s6 + $0xac] ss:$12 sps:$4 sm:$0xff]  }
  0x2d   :  { %v144_v48 = vsel %vm141_vm0, %v143_v46, %v137_v42  ;;  %v142_v49 = vsel %vm141_vm0, %v140_v47, %v136_v44  ;;  %614 = vmatpush1.bf16.msra.mxu1 %v1705_v36  ;;  %v1714_v42 = vld [vmem:[%s2219_s6 + $0x78] ss:$12 sps:$4 sm:$0xff]   ;;  %v1717_v44 = vld [vmem:[%s2219_s6 + $0x90] ss:$12 sps:$4 sm:$0xff]   ;;  %v1720_v46 = vld [vmem:[%s2219_s6 + $0xa8] ss:$12 sps:$4 sm:$0xff]  }
  0x2e   :  { %v146_v50 = vpack.c.b16 %v144_v48, %v144_v48  ;;  %v145_v51 = vpack.c.b16 %v142_v49, %v142_v49  ;;  %615 = vmatprep.subr.bf16.mxu1 %v1706_v37 }
  0x30   :  { %277 = vmatprep.mubr.bf16.mxu0 %v146_v50 }
  0x31   :  { %278 = vmatmul.mubr.bf16.vlgmr.msra.gmra.mrb[0].mxu0 %v145_v51  ;;  %616 = vmatpush1.bf16.msra.mxu1 %v1708_v38 }
  0x32   :  { %617 = vmatprep.subr.bf16.mxu1 %v1709_v39 }
  0x35   :  { %618 = vmatpush1.bf16.msra.mxu1 %v1711_v40 }
  0x36   :  { %619 = vmatprep.subr.bf16.mxu1 %v1712_v41 }
  0x39   :  { %620 = vmatpush1.bf16.msra.mxu1 %v1714_v42 }
  0x3a   :  { %621 = vmatprep.subr.bf16.mxu1 %v1715_v43 }
  0x3d   :  { %622 = vmatpush1.bf16.msra.mxu1 %v1717_v44 }
  0x3e   :  { %623 = vmatprep.subr.bf16.mxu1 %v1718_v45 }
  0x41   :  { %624 = vmatpush1.bf16.msra.mxu1 %v1720_v46 }
  0x42   :  { %1614 = vmatprep.subr.bf16.mxu1 %v1811_v32 }
 0x104   :  { %v1546_v55 = vpop.f32.mrb[0].mxu0 }
 0x105   :  { %v1547_v57 = vpop.f32.mrb[1].mxu0 }
 0x106   :  { %v1548_v58 = vadd.f32 %v1547_v57, %v1546_v55  ;;  %v1549_v60 = vpop.f32.mrb[2].mxu0 }
 0x107   :  { %v1550_v61 = vpop.f32.mrb[3].mxu0  ;;  %v2040_v60 = vld [vmem:[%s2221_s5] ss:$0 sm:$0xff] }
 0x108   :  { %v280_v62 = vadd.f32 %v1548_v58, %v1431_v56  ;;  %v2034_v58 = vld [vmem:[%s2220_s4] ss:$0 sm:$0xff] }
 0x10a   :  { %v292_v0 = vrot.slane %v280_v62, %v291_v59 }
 0x10c   :  { %v293_v2 = vcombine.high %v292_v0, %v292_v0  ;;  %v300_v4 = vrot.slane %v292_v0, %v291_v59 }
 0x10e   :  { %v311_v5 = vrot.slane %v300_v4, %v1944_v30  ;;  %v307_v6 = vrot.slane %v293_v2, %v291_v59 }
 0x110   :  { %v318_v8 = vadd.f32 %v1503_v3, %v311_v5  ;;  %v315_v10 = vrot.slane %v307_v6, %v1944_v30  ;;  %v319_v12 = vadd.f32 %v1504_v9, %v311_v5 }
 0x112   :  { %324 = vadd.xlane.f32.xlu0 %v318_v8  ;;  %v1962_v11 = vadd.f32 %v1508_v7, %v315_v10  ;;  %v320_v14 = vadd.f32 %v1507_v13, %v315_v10  ;;  %v1721_v7 = vld [vmem:[%s2219_s6 + $0x8] ss:$12 sps:$4 sm:$0xff]  }
 0x113   :  { %1588 = vmatprep.subr.bf16.mxu0 %v1721_v7 }
 0x114   :  { %1589 = vmatpush3.bf16.msra.mxu0 %v1721_v7 }
 0x116   :  { %326 = vadd.xlane.f32.xlu0 %v319_v12 }
 0x11a   :  { %328 = vadd.xlane.f32.xlu0 %v320_v14 }
 0x19f   :  { %v325_v15 = vpop.xlane.xlu0 %324 }
 0x1a0   :  { %v333_v16 = vmul.f32 0.0078125, %v325_v15  ;;  %v1725_v15 = vld [vmem:[%s2219_s6 + $0x68] ss:$12 sps:$4 sm:$0xff]  }
 0x1a2   :  { %v1964_v17 = vsub.f32 %v318_v8, %v333_v16  ;;  %v1722_v8 = vld [vmem:[%s2219_s6 + $0x20] ss:$12 sps:$4 sm:$0xff]  }
 0x1a3   :  { %v327_v18 = vpop.xlane.xlu0 %326  ;;  %1590 = vmatprep.subr.bf16.mxu0 %v1722_v8  ;;  %v1726_v16 = vld [vmem:[%s2219_s6 + $0x80] ss:$12 sps:$4 sm:$0xff]  }
 0x1a4   :  { %v334_v19 = vmul.f32 0.0078125, %v327_v18  ;;  %v341_v20 = vmul.f32 %v1964_v17, %v1964_v17  ;;  %1591 = vmatpush3.bf16.msra.mxu0 %v1722_v8 }
 0x1a6   :  { %v1968_v21 = vsub.f32 %v319_v12, %v334_v19  ;;  %345 = vadd.xlane.f32.xlu1 %v341_v20  ;;  %v1727_v19 = vld [vmem:[%s2219_s6 + $0x98] ss:$12 sps:$4 sm:$0xff]  }
 0x1a7   :  { %v329_v22 = vpop.xlane.xlu0 %328 }
 0x1a8   :  { %v335_v23 = vmul.f32 0.0078125, %v329_v22  ;;  %v342_v24 = vmul.f32 %v1968_v21, %v1968_v21 }
 0x1aa   :  { %v1972_v25 = vsub.f32 %v320_v14, %v335_v23  ;;  %347 = vadd.xlane.f32.xlu1 %v342_v24  ;;  %v1724_v14 = vld [vmem:[%s2219_s6 + $0x50] ss:$12 sps:$4 sm:$0xff]  }
 0x1ab   :  { %v1728_v23 = vld [vmem:[%s2219_s6 + $0xb0] ss:$12 sps:$4 sm:$0xff]  }
 0x1ac   :  { %v343_v26 = vmul.f32 %v1972_v25, %v1972_v25 }
 0x1ae   :  { %330 = vadd.xlane.f32.xlu1 %v1962_v11  ;;  %349 = vadd.xlane.f32.xlu0 %v343_v26 }
 0x233   :  { %v346_v47 = vpop.xlane.xlu1 %345 }
 0x234   :  { %v353_v48 = vmul.f32 0.0078125, %v346_v47 }
 0x236   :  { %v357_v49 = vadd.f32 1e-05, %v353_v48 }
 0x237   :  { %v348_v50 = vpop.xlane.xlu1 %347 }
 0x238   :  { %1745 = vrsqrt.f32 %v357_v49  ;;  %v354_v51 = vmul.f32 0.0078125, %v348_v50 }
 0x23a   :  { %v358_v52 = vadd.f32 1e-05, %v354_v51 }
 0x23b   :  { %v331_v53 = vpop.xlane.xlu1 %330  ;;  %v350_v24 = vpop.xlane.xlu0 %349 }
 0x23c   :  { %1747 = vrsqrt.f32 %v358_v52  ;;  %v336_v54 = vmul.f32 0.0078125, %v331_v53  ;;  %v355_v26 = vmul.f32 0.0078125, %v350_v24 }
 0x23e   :  { %v2027_v55 = vsub.f32 %v1962_v11, %v336_v54  ;;  %v1723_v11 = vld [vmem:[%s2219_s6 + $0x38] ss:$12 sps:$4 sm:$0xff]   ;;  %v359_v28 = vadd.f32 1e-05, %v355_v26 }
 0x23f   :  { %1592 = vmatprep.subr.bf16.mxu0 %v1723_v11 }
 0x240   :  { %v344_v56 = vmul.f32 %v2027_v55, %v2027_v55  ;;  %1593 = vmatpush3.bf16.msra.mxu0 %v1723_v11 }
 0x241   :  { %1594 = vmatprep.subr.bf16.mxu0 %v1724_v14 }
 0x242   :  { %v1746_v57 = vpop.eup %1745  ;;  %351 = vadd.xlane.f32.xlu1 %v344_v56 }
 0x243   :  { %v365_v59 = vmul.f32 %v1746_v57, %v1964_v17 }
 0x244   :  { %1595 = vmatpush3.bf16.msra.mxu0 %v1724_v14 }
 0x245   :  { %v375_v61 = vmul.f32 %v2034_v58, %v365_v59  ;;  %1596 = vmatprep.subr.bf16.mxu0 %v1725_v15 }
 0x246   :  { %v1748_v62 = vpop.eup %1747 }
 0x247   :  { %v366_v63 = vmul.f32 %v1748_v62, %v1968_v21  ;;  %v385_v0 = vadd.f32 %v2040_v60, %v375_v61 }
 0x248   :  { %1597 = vmatpush3.bf16.msra.mxu0 %v1725_v15 }
 0x249   :  { %v376_v1 = vmul.f32 %v2034_v58, %v366_v63  ;;  %v389_v2 = vsub.f32 0.0, %v385_v0  ;;  %1598 = vmatprep.subr.bf16.mxu0 %v1726_v16 }
 0x24b   :  { %v386_v3 = vadd.f32 %v2040_v60, %v376_v1  ;;  %v393_v4 = vmul.f32 1.442695, %v389_v2 }
 0x24c   :  { %1599 = vmatpush3.bf16.msra.mxu0 %v1726_v16 }
 0x24d   :  { %v390_v5 = vsub.f32 0.0, %v386_v3  ;;  %1749 = vpow2.f32 %v393_v4  ;;  %1600 = vmatprep.subr.bf16.mxu0 %v1727_v19 }
 0x24f   :  { %v395_v6 = vmul.f32 1.442695, %v390_v5 }
 0x250   :  { %1601 = vmatpush3.bf16.msra.mxu0 %v1727_v19 }
 0x251   :  { %1751 = vpow2.f32 %v395_v6  ;;  %1602 = vmatprep.subr.bf16.mxu0 %v1728_v23 }
 0x254   :  { %1603 = vmatpush3.bf16.msra.mxu0 %v1728_v23 }
 0x255   :  { %1608 = vmatprep.subr.bf16.mxu0 %v1811_v32 }
 0x257   :  { %v1750_v9 = vpop.eup %1749 }
 0x258   :  { %v401_v10 = vadd.f32 1.0, %v1750_v9 }
 0x25a   :  { %1753 = vrcp.f32 %v401_v10 }
 0x25b   :  { %v1752_v12 = vpop.eup %1751 }
 0x25c   :  { %v402_v13 = vadd.f32 1.0, %v1752_v12 }
 0x25e   :  { %1755 = vrcp.f32 %v402_v13 }
 0x25f   :  { %1757 = vrsqrt.f32 %v359_v28 }
 0x264   :  { %v1754_v17 = vpop.eup %1753 }
 0x265   :  { %v2068_v20 = vmul.f32 %v1754_v17, %v385_v0 }
 0x268   :  { %v1756_v18 = vpop.eup %1755 }
 0x269   :  { %v2070_v21 = vmul.f32 %v1756_v18, %v386_v3  ;;  %v1758_v33 = vpop.eup %1757 }
 0x26a   :  { %v367_v35 = vmul.f32 %v1758_v33, %v1972_v25 }
 0x26b   :  { %v463_v22 = vpack.c.bf16 %v2070_v21, %v2068_v20 }
 0x26d   :  { %642 = vmatmul.mubr.bf16.vlgmr.msra.gmra.mrb[0].mxu1 %v463_v22  ;;  %1604 = vmatprep.mubr.bf16.mxu0 %v463_v22 }
 0x26e   :  { %651 = vmatprep.mubr.bf16.mxu1 %v1810_v31  ;;  %v377_v31 = vmul.f32 %v2034_v58, %v367_v35 }
 0x270   :  { %v387_v38 = vadd.f32 %v2040_v60, %v377_v31 }
 0x272   :  { %v391_v39 = vsub.f32 0.0, %v387_v38 }
 0x274   :  { %v397_v42 = vmul.f32 1.442695, %v391_v39 }
 0x2cf   :  { %v352_v34 = vpop.xlane.xlu1 %351 }
 0x2d0   :  { %v356_v36 = vmul.f32 0.0078125, %v352_v34 }
 0x2d2   :  { %v360_v37 = vadd.f32 1e-05, %v356_v36 }
 0x2d4   :  { %1759 = vrsqrt.f32 %v360_v37 }
 0x2d5   :  { %1761 = vpow2.f32 %v397_v42 }
 0x2de   :  { %v1760_v40 = vpop.eup %1759 }
 0x2df   :  { %v368_v41 = vmul.f32 %v1760_v40, %v2027_v55  ;;  %v1762_v25 = vpop.eup %1761  ;;  %v445_v55 = vld [vmem:[%s2222_s7] sm:$0x7]  ;;  %s1813_s7 = smov 64  }
 0x2e0   :  { %v403_v47 = vadd.f32 1.0, %v1762_v25  ;;  %v469_v56 = vrot.slane %v445_v55, %v1944_v30 }
 0x2e1   :  { %v378_v43 = vmul.f32 %v2034_v58, %v368_v41  ;;  %v473_v58 = vrot.slane %v445_v55, %v1941_v29  ;;  %v476_v29 = vsub.s32 2, %v1938_v27 }
 0x2e3   :  { %v388_v44 = vadd.f32 %v2040_v60, %v378_v43  ;;  %v477_v30 = vrot.slane %v445_v55, %v476_v29 }
 0x2e5   :  { %v392_v45 = vsub.f32 0.0, %v388_v44 }
 0x2e7   :  { %v399_v46 = vmul.f32 1.442695, %v392_v45 }
 0x2e9   :  { %1763 = vpow2.f32 %v399_v46 }
 0x2ea   :  { %1765 = vrcp.f32 %v403_v47 }
 0x2f3   :  { %v1764_v48 = vpop.eup %1763 }
 0x2f4   :  { %v404_v49 = vadd.f32 1.0, %v1764_v48  ;;  %v1766_v50 = vpop.eup %1765 }
 0x2f5   :  { %v2086_v52 = vmul.f32 %v1766_v50, %v387_v38 }
 0x2f6   :  { %1767 = vrcp.f32 %v404_v49 }
 0x300   :  { %v1768_v51 = vpop.eup %1767 }
 0x301   :  { %v2088_v53 = vmul.f32 %v1768_v51, %v388_v44 }
 0x303   :  { %v464_v54 = vpack.c.bf16 %v2088_v53, %v2086_v52 }
 0x305   :  { %652 = vmatmul.mubr.bf16.gmra.mrb[4].mxu1 %v464_v54  ;;  %1605 = vmatmul.mubr.bf16.vlgmr.msra.gmra.mrb[4].mxu0 %v464_v54 }
 0x306   :  { %1610 = vmatprep.mubr.msk.bf16.mxu0 %vm1812_vm1, %v1811_v32  ;;  %1616 = vmatprep.mubr.msk.bf16.mxu1 %vm1812_vm1, %v1811_v32 }
 0x340   :  { %v643_v57 = vpop.f32.mrb[0].mxu1 }
 0x341   :  { %v645_v59 = vpop.f32.mrb[1].mxu1  ;;  %v644_v61 = vadd.f32 %v643_v57, %v469_v56 }
 0x342   :  { %v647_v60 = vpop.f32.mrb[2].mxu1  ;;  %v646_v0 = vadd.f32 %v645_v59, %v473_v58 }
 0x343   :  { %v648_v62 = vadd.f32 %v647_v60, %v469_v56  ;;  %v649_v63 = vpop.f32.mrb[3].mxu1 }
 0x344   :  { %v650_v1 = vadd.f32 %v649_v63, %v473_v58 }
 0x345   :  { %v711_v2 = vpack.c.bf16 %v648_v62, %v644_v61 }
 0x346   :  { %v712_v3 = vpack.c.bf16 %v650_v1, %v646_v0 }
 0x348   :  { %v722_v4 = vsel %vm717_vm2, %v712_v3, 0 }
 0x349   :  { %1609 = vmatpush3.bf16.xpose.msra.mxu0 %v722_v4 }
 0x34a   :  { %1626 = vmatprep.subr.bf16.mxu0 %v1811_v32 }
 0x350   :  { %1611 = vmatmul.mubr.msk.bf16.vlgmr.msra.gmra.mrb[8].mxu0 %vm717_vm2, %v711_v2 }
 0x351   :  { %1628 = vmatprep.mubr.msk.bf16.mxu0 %vm1812_vm1, %v1811_v32 }
 0x3d8   :  { %v653_v5 = vpop.f32.mrb[4].mxu1  ;;  %v1606_v6 = vpop.f32.mrb[4].mxu0 }
 0x3d9   :  { %v705_v7 = vadd.f32 %v1606_v6, %v477_v30  ;;  %v655_v8 = vpop.f32.mrb[5].mxu1  ;;  %v696_v9 = vpop.f32.mrb[5].mxu0  ;;  %v654_v12 = vadd.f32 %v653_v5, %v469_v56 }
 0x3da   :  { %v657_v10 = vpop.f32.mrb[6].mxu1  ;;  %v1607_v11 = vpop.f32.mrb[6].mxu0  ;;  %v656_v17 = vadd.f32 %v655_v8, %v473_v58  ;;  %v697_v18 = vadd.f32 %v696_v9, %v477_v30 }
 0x3db   :  { %v658_v13 = vadd.f32 %v657_v10, %v469_v56  ;;  %v708_v14 = vadd.f32 %v1607_v11, %v477_v30  ;;  %v659_v15 = vpop.f32.mrb[7].mxu1  ;;  %v699_v16 = vpop.f32.mrb[7].mxu0 }
 0x3dc   :  { %v660_v19 = vadd.f32 %v659_v15, %v473_v58  ;;  %v700_v22 = vadd.f32 %v699_v16, %v477_v30 }
 0x3dd   :  { %v714_v23 = vpack.c.bf16 %v658_v13, %v654_v12  ;;  %v2107_v24 = vpack.c.bf16 %v708_v14, %v705_v7 }
 0x3de   :  { %v715_v27 = vpack.c.bf16 %v660_v19, %v656_v17  ;;  %v2109_v26 = vpack.c.bf16 %v700_v22, %v697_v18 }
 0x3e0   :  { %1615 = vmatpush3.bf16.msra.mxu1 %v2109_v26  ;;  %v974_v58 = vsel %vm717_vm2, %v715_v27, 0 }
 0x3e1   :  { %1620 = vmatprep.subr.bf16.mxu1 %v1811_v32 }
 0x423   :  { %v758_v28 = vpop.f32.mrb[8].mxu0 }
 0x424   :  { %v1612_v33 = vpop.f32.mrb[9].mxu0  ;;  %v766_v34 = vsel %vm765_vm3, %v758_v28, -inf }
 0x425   :  { %767 = vmax.xlane.f32.xlu0 %v766_v34  ;;  %v761_v35 = vpop.f32.mrb[10].mxu0 }
 0x426   :  { %v1613_v36 = vpop.f32.mrb[11].mxu0  ;;  %v769_v37 = vsel %vm765_vm3, %v761_v35, -inf }
 0x427   :  { %770 = vmax.xlane.f32.xlu1 %v769_v37 }
 0x4b2   :  { %v768_v31 = vpop.xlane.xlu0 %767 }
 0x4b3   :  { %v772_v38 = vsub.f32 %v758_v28, %v768_v31 }
 0x4b4   :  { %v771_v39 = vpop.xlane.xlu1 %770 }
 0x4b5   :  { %v774_v40 = vmul.f32 1.442695, %v772_v38  ;;  %v773_v41 = vsub.f32 %v761_v35, %v771_v39 }
 0x4b7   :  { %1769 = vpow2.f32 %v774_v40  ;;  %v776_v42 = vmul.f32 1.442695, %v773_v41 }
 0x4b9   :  { %1771 = vpow2.f32 %v776_v42 }
 0x4c1   :  { %v1770_v43 = vpop.eup %1769 }
 0x4c2   :  { %v778_v44 = vsel %vm765_vm3, %v1770_v43, 0.0 }
 0x4c3   :  { %v1772_v45 = vpop.eup %1771  ;;  %779 = vadd.xlane.f32.xlu0 %v778_v44 }
 0x4c4   :  { %v781_v46 = vsel %vm765_vm3, %v1772_v45, 0.0 }
 0x4c5   :  { %782 = vadd.xlane.f32.xlu1 %v781_v46 }
 0x4d6   :  { %838 = vrot.lane.b32.xlu1 %v711_v2, %s1813_s7 }
 0x4d9   :  { %841 = vrot.lane.b32.xlu0 %v712_v3, %s1813_s7 }
 0x4da   :  { %1092 = vrot.lane.b32.xlu1 %v715_v27, %s1813_s7 }
 0x4de   :  { %1089 = vrot.lane.b32.xlu1 %v714_v23, %s1813_s7 }
 0x550   :  { %v780_v25 = vpop.xlane.xlu0 %779 }
 0x551   :  { %1773 = vrcp.f32 %v780_v25 }
 0x552   :  { %v783_v47 = vpop.xlane.xlu1 %782 }
 0x553   :  { %1775 = vrcp.f32 %v783_v47 }
 0x554   :  { %v842_v54 = vpop.permute.xlu0 %841 }
 0x555   :  { %v847_v56 = vsel %vm717_vm2, %v842_v54, 0 }
 0x556   :  { %v839_v57 = vpop.permute.xlu1 %838 }
 0x55a   :  { %v1093_v59 = vpop.permute.xlu1 %1092 }
 0x55b   :  { %v1774_v48 = vpop.eup %1773  ;;  %v1098_v60 = vsel %vm717_vm2, %v1093_v59, 0 }
 0x55c   :  { %v788_v50 = vmul.f32 %v1774_v48, %v1770_v43 }
 0x55d   :  { %v1776_v49 = vpop.eup %1775 }
 0x55e   :  { %v789_v51 = vmul.f32 %v1776_v49, %v1772_v45  ;;  %v1090_v61 = vpop.permute.xlu1 %1089 }
 0x560   :  { %v790_v55 = vpack.c.bf16 %v789_v51, %v788_v50 }
 0x562   :  { %1617 = vmatmul.mubr.msk.bf16.vlgmr.msra.gmra.mrb[8].mxu1 %vm765_vm3, %v790_v55 }
 0x563   :  { %1621 = vmatpush3.bf16.xpose.msra.mxu1 %v847_v56  ;;  %1622 = vmatprep.mubr.msk.bf16.mxu1 %vm1812_vm1, %v1811_v32 }
 0x564   :  { %1632 = vmatprep.subr.bf16.mxu1 %v1811_v32 }
 0x56a   :  { %1623 = vmatmul.mubr.msk.bf16.vlgmr.msra.gmra.mrb[12].mxu1 %vm717_vm2, %v839_v57 }
 0x56b   :  { %1633 = vmatpush3.bf16.xpose.msra.mxu1 %v974_v58  ;;  %1634 = vmatprep.mubr.msk.bf16.mxu1 %vm1812_vm1, %v1811_v32 }
 0x56c   :  { %1644 = vmatprep.subr.bf16.mxu1 %v1811_v32 }
 0x572   :  { %1635 = vmatmul.mubr.msk.bf16.vlgmr.msra.gmra.mrb[16].mxu1 %vm717_vm2, %v714_v23 }
 0x573   :  { %1645 = vmatpush3.bf16.xpose.msra.mxu1 %v1098_v60  ;;  %1646 = vmatprep.mubr.msk.bf16.mxu1 %vm1812_vm1, %v1811_v32 }
 0x57a   :  { %1647 = vmatmul.mubr.msk.bf16.vlgmr.msra.gmra.mrb[20].mxu1 %vm717_vm2, %v1090_v61 }
 0x635   :  { %v828_v62 = vpop.f32.mrb[8].mxu1 }
 0x636   :  { %v1618_v63 = vpop.f32.mrb[9].mxu1 }
 0x637   :  { %v831_v0 = vpop.f32.mrb[10].mxu1 }
 0x638   :  { %v835_v1 = vpack.c.bf16 %v831_v0, %v828_v62  ;;  %v1619_v2 = vpop.f32.mrb[11].mxu1 }
 0x63a   :  { %836 = vst.msk [vmem:[#allocation2] sm:$0xff] %vm717_vm2, %v835_v1 }
 0x63d   :  { %v883_v3 = vpop.f32.mrb[12].mxu1 }
 0x63e   :  { %v1624_v4 = vpop.f32.mrb[13].mxu1  ;;  %v890_v29 = vsel %vm765_vm3, %v883_v3, -inf }
 0x63f   :  { %891 = vmax.xlane.f32.xlu0 %v890_v29  ;;  %v886_v30 = vpop.f32.mrb[14].mxu1 }
 0x640   :  { %v1625_v5 = vpop.f32.mrb[15].mxu1  ;;  %v893_v6 = vsel %vm765_vm3, %v886_v30, -inf }
 0x641   :  { %894 = vmax.xlane.f32.xlu1 %v893_v6 }
 0x645   :  { %v1010_v7 = vpop.f32.mrb[16].mxu1 }
 0x646   :  { %v1636_v8 = vpop.f32.mrb[17].mxu1  ;;  %v1017_v9 = vsel %vm765_vm3, %v1010_v7, -inf }
 0x647   :  { %1018 = vmax.xlane.f32.xlu0 %v1017_v9  ;;  %v1013_v10 = vpop.f32.mrb[18].mxu1 }
 0x648   :  { %v1637_v11 = vpop.f32.mrb[19].mxu1  ;;  %v1020_v12 = vsel %vm765_vm3, %v1013_v10, -inf }
 0x64b   :  { %1021 = vmax.xlane.f32.xlu0 %v1020_v12 }
 0x64d   :  { %v1134_v13 = vpop.f32.mrb[20].mxu1 }
 0x64e   :  { %v1648_v14 = vpop.f32.mrb[21].mxu1  ;;  %v1141_v15 = vsel %vm765_vm3, %v1134_v13, -inf }
 0x64f   :  { %1142 = vmax.xlane.f32.xlu0 %v1141_v15  ;;  %v1137_v16 = vpop.f32.mrb[22].mxu1  ;;  %v1730_v14 = vld [vmem:[%s2223_s8 + $0x8] sm:$0xff]   ;;  %v1732_v15 = vld [vmem:[%s2223_s8 + $0x18] sm:$0xff]  }
 0x650   :  { %v1649_v17 = vpop.f32.mrb[23].mxu1  ;;  %v1144_v18 = vsel %vm765_vm3, %v1137_v16, -inf }
 0x651   :  { %1145 = vmax.xlane.f32.xlu1 %v1144_v18  ;;  %v1734_v18 = vld [vmem:[%s2223_s8 + $0x28] sm:$0xff]  }
 0x6cc   :  { %v892_v19 = vpop.xlane.xlu0 %891 }
 0x6cd   :  { %v896_v22 = vsub.f32 %v883_v3, %v892_v19 }
 0x6ce   :  { %v895_v23 = vpop.xlane.xlu1 %894 }
 0x6cf   :  { %v898_v27 = vmul.f32 1.442695, %v896_v22  ;;  %v897_v28 = vsub.f32 %v886_v30, %v895_v23 }
 0x6d1   :  { %1777 = vpow2.f32 %v898_v27  ;;  %v900_v33 = vmul.f32 1.442695, %v897_v28  ;;  %v1735_v28 = vld [vmem:[%s2223_s8 + $0x30] sm:$0xff]  }
 0x6d3   :  { %1779 = vpow2.f32 %v900_v33 }
 0x6d4   :  { %v1019_v34 = vpop.xlane.xlu0 %1018 }
 0x6d5   :  { %v1023_v35 = vsub.f32 %v1010_v7, %v1019_v34  ;;  %v1736_v34 = vld [vmem:[%s2223_s8 + $0x38] sm:$0xff]  }
 0x6d7   :  { %v1025_v36 = vmul.f32 1.442695, %v1023_v35 }
 0x6d8   :  { %v1022_v37 = vpop.xlane.xlu0 %1021 }
 0x6d9   :  { %1781 = vpow2.f32 %v1025_v36  ;;  %v1024_v31 = vsub.f32 %v1013_v10, %v1022_v37 }
 0x6db   :  { %v1778_v38 = vpop.eup %1777  ;;  %v1027_v39 = vmul.f32 1.442695, %v1024_v31 }
 0x6dc   :  { %v1143_v40 = vpop.xlane.xlu0 %1142  ;;  %v902_v41 = vsel %vm765_vm3, %v1778_v38, 0.0 }
 0x6dd   :  { %v1780_v42 = vpop.eup %1779  ;;  %1783 = vpow2.f32 %v1027_v39  ;;  %v1147_v43 = vsub.f32 %v1134_v13, %v1143_v40  ;;  %903 = vadd.xlane.f32.xlu0 %v902_v41  ;;  %v1729_v13 = vld [vmem:[%s2223_s8] sm:$0xff]  }
 0x6de   :  { %v1146_v44 = vpop.xlane.xlu1 %1145  ;;  %v905_v45 = vsel %vm765_vm3, %v1780_v42, 0.0  ;;  %1656 = vmatprep.subr.bf16.mxu1 %v1729_v13 }
 0x6df   :  { %v1149_v46 = vmul.f32 1.442695, %v1147_v43  ;;  %v1148_v25 = vsub.f32 %v1137_v16, %v1146_v44  ;;  %906 = vadd.xlane.f32.xlu1 %v905_v45  ;;  %1657 = vmatpush3.bf16.msra.mxu1 %v1729_v13  ;;  %v1733_v16 = vld [vmem:[%s2223_s8 + $0x20] sm:$0xff]  }
 0x6e0   :  { %1658 = vmatprep.subr.bf16.mxu1 %v1730_v14 }
 0x6e1   :  { %1785 = vpow2.f32 %v1149_v46  ;;  %v1151_v47 = vmul.f32 1.442695, %v1148_v25  ;;  %v1482_v25 = vld [vmem:[%s2224_s9] ss:$0 sm:$0xff] }
 0x6e3   :  { %v1782_v48 = vpop.eup %1781  ;;  %1787 = vpow2.f32 %v1151_v47  ;;  %1659 = vmatpush3.bf16.msra.mxu1 %v1730_v14 }
 0x6e4   :  { %v1029_v49 = vsel %vm765_vm3, %v1782_v48, 0.0 }
 0x6e5   :  { %1030 = vadd.xlane.f32.xlu0 %v1029_v49 }
 0x6e7   :  { %v1784_v50 = vpop.eup %1783 }
 0x6e8   :  { %v1032_v51 = vsel %vm765_vm3, %v1784_v50, 0.0 }
 0x6e9   :  { %1033 = vadd.xlane.f32.xlu1 %v1032_v51 }
 0x6eb   :  { %v1786_v54 = vpop.eup %1785 }
 0x6ec   :  { %v1153_v55 = vsel %vm765_vm3, %v1786_v54, 0.0 }
 0x6ed   :  { %v1788_v56 = vpop.eup %1787  ;;  %1154 = vadd.xlane.f32.xlu0 %v1153_v55 }
 0x6ee   :  { %v1156_v57 = vsel %vm765_vm3, %v1788_v56, 0.0 }
 0x6ef   :  { %1157 = vadd.xlane.f32.xlu1 %v1156_v57 }
 0x700   :  { %1167 = vrot.lane.b32.xlu1 %v2107_v24, %s1813_s7 }
 0x703   :  { %916 = vrot.lane.b32.xlu0 %v2109_v26, %s1813_s7 }
 0x76a   :  { %v904_v59 = vpop.xlane.xlu0 %903 }
 0x76c   :  { %v907_v58 = vpop.xlane.xlu1 %906 }
 0x76d   :  { %1789 = vrcp.f32 %v907_v58 }
 0x76e   :  { %1791 = vrcp.f32 %v904_v59 }
 0x772   :  { %v1031_v60 = vpop.xlane.xlu0 %1030 }
 0x776   :  { %v1034_v61 = vpop.xlane.xlu1 %1033 }
 0x777   :  { %1793 = vrcp.f32 %v1034_v61  ;;  %v1790_v62 = vpop.eup %1789 }
 0x778   :  { %1795 = vrcp.f32 %v1031_v60  ;;  %v1792_v0 = vpop.eup %1791  ;;  %v913_v1 = vmul.f32 %v1790_v62, %v1780_v42 }
 0x779   :  { %v912_v3 = vmul.f32 %v1792_v0, %v1778_v38 }
 0x77a   :  { %v1155_v63 = vpop.xlane.xlu0 %1154 }
 0x77b   :  { %v914_v29 = vpack.c.bf16 %v913_v1, %v912_v3 }
 0x77c   :  { %v1158_v2 = vpop.xlane.xlu1 %1157 }
 0x77d   :  { %1797 = vrcp.f32 %v1158_v2 }
 0x77e   :  { %v917_v4 = vpop.permute.xlu0 %916  ;;  %1799 = vrcp.f32 %v1155_v63 }
 0x77f   :  { %1627 = vmatpush3.bf16.msra.mxu0 %v917_v4 }
 0x780   :  { %1638 = vmatprep.subr.bf16.mxu0 %v1811_v32  ;;  %v1168_v9 = vpop.permute.xlu1 %1167 }
 0x781   :  { %v1794_v26 = vpop.eup %1793 }
 0x782   :  { %1629 = vmatmul.mubr.msk.bf16.vlgmr.msra.gmra.mrb[12].mxu0 %vm765_vm3, %v914_v29  ;;  %v1796_v30 = vpop.eup %1795  ;;  %v1040_v5 = vmul.f32 %v1794_v26, %v1784_v50 }
 0x783   :  { %1639 = vmatpush3.bf16.msra.mxu0 %v2107_v24  ;;  %1640 = vmatprep.mubr.msk.bf16.mxu0 %vm1812_vm1, %v1811_v32  ;;  %v1039_v6 = vmul.f32 %v1796_v30, %v1782_v48 }
 0x784   :  { %1650 = vmatprep.subr.bf16.mxu0 %v1811_v32 }
 0x785   :  { %v1041_v7 = vpack.c.bf16 %v1040_v5, %v1039_v6 }
 0x787   :  { %v1798_v8 = vpop.eup %1797 }
 0x788   :  { %v1800_v10 = vpop.eup %1799  ;;  %v1164_v11 = vmul.f32 %v1798_v8, %v1788_v56 }
 0x789   :  { %v1163_v12 = vmul.f32 %v1800_v10, %v1786_v54 }
 0x78a   :  { %1641 = vmatmul.mubr.msk.bf16.vlgmr.msra.gmra.mrb[16].mxu0 %vm765_vm3, %v1041_v7 }
 0x78b   :  { %1651 = vmatpush3.bf16.msra.mxu0 %v1168_v9  ;;  %1652 = vmatprep.mubr.msk.bf16.mxu0 %vm1812_vm1, %v1811_v32  ;;  %v1165_v24 = vpack.c.bf16 %v1164_v11, %v1163_v12  ;;  %v1731_v32 = vld [vmem:[%s2223_s8 + $0x10] sm:$0xff]  }
 0x78c   :  { %1660 = vmatprep.subr.bf16.mxu1 %v1731_v32 }
 0x78d   :  { %1661 = vmatpush3.bf16.msra.mxu1 %v1731_v32 }
 0x78e   :  { %1662 = vmatprep.subr.bf16.mxu1 %v1732_v15 }
 0x791   :  { %1663 = vmatpush3.bf16.msra.mxu1 %v1732_v15 }
 0x792   :  { %1653 = vmatmul.mubr.msk.bf16.vlgmr.msra.gmra.mrb[20].mxu0 %vm765_vm3, %v1165_v24  ;;  %1664 = vmatprep.subr.bf16.mxu1 %v1733_v16 }
 0x795   :  { %1665 = vmatpush3.bf16.msra.mxu1 %v1733_v16 }
 0x796   :  { %1666 = vmatprep.subr.bf16.mxu1 %v1734_v18 }
 0x799   :  { %1667 = vmatpush3.bf16.msra.mxu1 %v1734_v18  ;;  %v1510_v18 = vld [vmem:[%s2226_s12] sm:$0xff]  }
 0x79a   :  { %1668 = vmatprep.subr.bf16.mxu1 %v1735_v28 }
 0x79d   :  { %1669 = vmatpush3.bf16.msra.mxu1 %v1735_v28 }
 0x79e   :  { %1670 = vmatprep.subr.bf16.mxu1 %v1736_v34 }
 0x7a1   :  { %1671 = vmatpush3.bf16.msra.mxu1 %v1736_v34  ;;  %v1511_v34 = vunpack.c.l.bf16 %v1510_v18 }
 0x855   :  { %v956_v17 = vpop.f32.mrb[12].mxu0 }
 0x856   :  { %v1630_v19 = vpop.f32.mrb[13].mxu0 }
 0x857   :  { %v959_v22 = vpop.f32.mrb[14].mxu0 }
 0x858   :  { %v963_v23 = vpack.c.bf16 %v959_v22, %v956_v17  ;;  %v1631_v27 = vpop.f32.mrb[15].mxu0  ;;  %v1491_v17 = vld [vmem:[%s2225_s10] ss:$0 sm:$0xff] }
 0x85a   :  { %965 = vrot.lane.b32.xlu1 %v963_v23, %s1813_s7  ;;  %v1492_v23 = vld [vmem:[%s2227_s11] ss:$0 sm:$0xff] }
 0x85d   :  { %v1079_v33 = vpop.f32.mrb[16].mxu0 }
 0x85e   :  { %v1642_v35 = vpop.f32.mrb[17].mxu0 }
 0x85f   :  { %v1082_v36 = vpop.f32.mrb[18].mxu0 }
 0x860   :  { %v1086_v37 = vpack.c.bf16 %v1082_v36, %v1079_v33  ;;  %v1643_v31 = vpop.f32.mrb[19].mxu0  ;;  %v1512_v36 = vunpack.c.h.bf16 %v1510_v18 }
 0x862   :  { %1087 = vst.msk [vmem:[#allocation2 + $0x8] sm:$0xff] %vm717_vm2, %v1086_v37 }
 0x865   :  { %v1207_v38 = vpop.f32.mrb[20].mxu0 }
 0x866   :  { %v1654_v39 = vpop.f32.mrb[21].mxu0 }
 0x867   :  { %v1210_v40 = vpop.f32.mrb[22].mxu0  ;;  %v1528_v39 = vld [vmem:[%s2226_s12 + $0x8] sm:$0xff]  }
 0x868   :  { %v1214_v41 = vpack.c.bf16 %v1210_v40, %v1207_v38  ;;  %v1655_v42 = vpop.f32.mrb[23].mxu0 }
 0x86a   :  { %1216 = vrot.lane.b32.xlu1 %v1214_v41, %s1813_s7 }
 0x8cc   :  { %v966_v43 = vpop.permute.xlu1 %965 }
 0x8cd   :  { %969 = vst.msk [vmem:[#allocation2] sm:$0xff] %vm968_vm4, %v966_v43 }
 0x8d4   :  { %v1220_v44 = vld [vmem:[#allocation2] sm:$0xff] }
 0x8d5   :  { %1672 = vmatprep.mubr.bf16.mxu1 %v1220_v44 }
 0x8dc   :  { %v1217_v45 = vpop.permute.xlu1 %1216 }
 0x8dd   :  { %1219 = vst.msk [vmem:[#allocation2 + $0x8] sm:$0xff] %vm968_vm4, %v1217_v45  ;;  %v1515_v45 = vunpack.c.l.bf16 %v1528_v39 }
 0x8e4   :  { %v1221_v46 = vld [vmem:[#allocation2 + $0x8] sm:$0xff] }
 0x8e5   :  { %1673 = vmatmul.mubr.bf16.vlgmr.msra.gmra.mrb[24].mxu1 %v1221_v46 }
 0x9b8   :  { %v1674_v47 = vpop.f32.mrb[24].mxu1 }
 0x9b9   :  { %v1310_v48 = vpop.f32.mrb[25].mxu1  ;;  %v1319_v54 = vadd.f32 %v1674_v47, %v1482_v25  ;;  %v1516_v47 = vunpack.c.h.bf16 %v1528_v39 }
 0x9ba   :  { %v1311_v49 = vadd.f32 %v1482_v25, %v1310_v48  ;;  %v1675_v50 = vpop.f32.mrb[26].mxu1 }
 0x9bb   :  { %v1313_v51 = vpop.f32.mrb[27].mxu1  ;;  %v1322_v58 = vadd.f32 %v1675_v50, %v1482_v25  ;;  %v1329_v59 = vadd.f32 %v1319_v54, %v2086_v52 }
 0x9bc   :  { %v1314_v55 = vadd.f32 %v1482_v25, %v1313_v51  ;;  %v1327_v56 = vadd.f32 %v1311_v49, %v2068_v20 }
 0x9bd   :  { %v1330_v60 = vadd.f32 %v1322_v58, %v2088_v53 }
 0x9be   :  { %1331 = vadd.xlane.f32.xlu0 %v1327_v56  ;;  %v1328_v57 = vadd.f32 %v1314_v55, %v2070_v21 }
 0x9c0   :  { %1333 = vadd.xlane.f32.xlu1 %v1328_v57 }
 0x9c2   :  { %1335 = vadd.xlane.f32.xlu0 %v1329_v59 }
 0x9c6   :  { %1337 = vadd.xlane.f32.xlu0 %v1330_v60 }
 0xa4b   :  { %v1332_v61 = vpop.xlane.xlu0 %1331 }
 0xa4c   :  { %v1339_v62 = vmul.f32 0.0078125, %v1332_v61 }
 0xa4d   :  { %v1334_v63 = vpop.xlane.xlu1 %1333 }
 0xa4e   :  { %v1343_v0 = vsub.f32 %v1327_v56, %v1339_v62  ;;  %v1340_v1 = vmul.f32 0.0078125, %v1334_v63 }
 0xa4f   :  { %v1336_v2 = vpop.xlane.xlu0 %1335 }
 0xa50   :  { %v1344_v3 = vsub.f32 %v1328_v57, %v1340_v1  ;;  %v1341_v4 = vmul.f32 0.0078125, %v1336_v2  ;;  %v1347_v20 = vmul.f32 %v1343_v0, %v1343_v0 }
 0xa52   :  { %v1345_v29 = vsub.f32 %v1329_v59, %v1341_v4  ;;  %1351 = vadd.xlane.f32.xlu0 %v1347_v20  ;;  %v1348_v21 = vmul.f32 %v1344_v3, %v1344_v3 }
 0xa53   :  { %v1338_v26 = vpop.xlane.xlu0 %1337 }
 0xa54   :  { %v1342_v30 = vmul.f32 0.0078125, %v1338_v26  ;;  %1353 = vadd.xlane.f32.xlu1 %v1348_v21  ;;  %v1349_v52 = vmul.f32 %v1345_v29, %v1345_v29 }
 0xa56   :  { %v1346_v5 = vsub.f32 %v1330_v60, %v1342_v30  ;;  %1355 = vadd.xlane.f32.xlu0 %v1349_v52 }
 0xa58   :  { %v1350_v53 = vmul.f32 %v1346_v5, %v1346_v5 }
 0xa5a   :  { %1357 = vadd.xlane.f32.xlu1 %v1350_v53 }
 0xadf   :  { %v1352_v6 = vpop.xlane.xlu0 %1351 }
 0xae0   :  { %v1359_v7 = vmul.f32 0.0078125, %v1352_v6 }
 0xae1   :  { %v1354_v8 = vpop.xlane.xlu1 %1353 }
 0xae2   :  { %v1363_v9 = vadd.f32 1e-12, %v1359_v7  ;;  %v1360_v10 = vmul.f32 0.0078125, %v1354_v8 }
 0xae3   :  { %v1356_v11 = vpop.xlane.xlu0 %1355 }
 0xae4   :  { %1801 = vrsqrt.f32 %v1363_v9  ;;  %v1364_v12 = vadd.f32 1e-12, %v1360_v10  ;;  %v1361_v24 = vmul.f32 0.0078125, %v1356_v11 }
 0xae6   :  { %1803 = vrsqrt.f32 %v1364_v12  ;;  %v1365_v13 = vadd.f32 1e-12, %v1361_v24 }
 0xae7   :  { %v1358_v14 = vpop.xlane.xlu1 %1357 }
 0xae8   :  { %1805 = vrsqrt.f32 %v1365_v13  ;;  %v1362_v32 = vmul.f32 0.0078125, %v1358_v14 }
 0xaea   :  { %v1366_v15 = vadd.f32 1e-12, %v1362_v32 }
 0xaec   :  { %1807 = vrsqrt.f32 %v1366_v15 }
 0xaee   :  { %v1802_v16 = vpop.eup %1801 }
 0xaef   :  { %v1371_v19 = vmul.f32 %v1802_v16, %v1343_v0 }
 0xaf0   :  { %v1804_v22 = vpop.eup %1803 }
 0xaf1   :  { %v1381_v27 = vmul.f32 %v1491_v17, %v1371_v19  ;;  %v1372_v28 = vmul.f32 %v1804_v22, %v1344_v3 }
 0xaf2   :  { %v1806_v33 = vpop.eup %1805 }
 0xaf3   :  { %v1391_v35 = vadd.f32 %v1492_v23, %v1381_v27  ;;  %v1382_v37 = vmul.f32 %v1491_v17, %v1372_v28  ;;  %v1373_v31 = vmul.f32 %v1806_v33, %v1345_v29 }
 0xaf5   :  { %v1392_v38 = vadd.f32 %v1492_v23, %v1382_v37  ;;  %v1383_v40 = vmul.f32 %v1491_v17, %v1373_v31  ;;  %v1403_v42 = vadd.f32 %v1511_v34, %v1391_v35 }
 0xaf6   :  { %v1808_v41 = vpop.eup %1807 }
 0xaf7   :  { %v1404_v43 = vadd.f32 %v1512_v36, %v1392_v38  ;;  %v1374_v44 = vmul.f32 %v1808_v41, %v1346_v5  ;;  %v1393_v25 = vadd.f32 %v1492_v23, %v1383_v40 }
 0xaf9   :  { %v1520_v46 = vpack.c.bf16 %v1404_v43, %v1403_v42  ;;  %v1384_v48 = vmul.f32 %v1491_v17, %v1374_v44  ;;  %v1405_v50 = vadd.f32 %v1515_v45, %v1393_v25 }
 0xafb   :  { %1521 = vst [vmem:[%s2228_s13] sm:$0xff] %v1520_v46   ;;  %v1394_v49 = vadd.f32 %v1492_v23, %v1384_v48 }
 0xafd   :  { %v1406_v51 = vadd.f32 %v1516_v47, %v1394_v49 }
 0xaff   :  { %v1525_v54 = vpack.c.bf16 %v1406_v51, %v1405_v50 }
 0xb01   :  { %1529 = vst [vmem:[%s2228_s13 + $0x8] sm:$0xff] %v1525_v54  }

// kernel: forward.9
= control target key start
LH: loop header
LB: loop body
LE: loop exit
PB: predicated region body
PF: predicated region fallthrough
CT: control target
= control target key end

     0   :  { %s2229_s0 = inlined_call_operand.vmem [shape: bf16[2,16,128], index: 0, kind: input, shape index: {}]   ;;  %s2230_s1 = inlined_call_operand.vmem [shape: f32[2,1,256], index: 1, kind: input, shape index: {}]   ;;  %s2231_s2 = inlined_call_operand.vmem [shape: bf16[256,128], index: 2, kind: input, shape index: {}]   ;;  %s2232_s3 = inlined_call_operand.vmem [shape: f32[1,128], index: 3, kind: input, shape index: {}]   ;;  %s2233_s4 = inlined_call_operand.vmem [shape: f32[1,128], index: 4, kind: input, shape index: {}]   ;;  %s2234_s5 = inlined_call_operand.vmem [shape: f32[1,128], index: 5, kind: input, shape index: {}]   ;;  %s2235_s6 = inlined_call_operand.vmem [shape: bf16[128,384], index: 6, kind: input, shape index: {}]   ;;  %s2236_s7 = inlined_call_operand.vmem [shape: f32[1,384], index: 7, kind: input, shape index: {}]   ;;  %s2237_s8 = inlined_call_operand.vmem [shape: bf16[128,128], index: 8, kind: input, shape index: {}]   ;;  %s2238_s9 = inlined_call_operand.vmem [shape: f32[1,128], index: 9, kind: input, shape index: {}]   ;;  %s2239_s10 = inlined_call_operand.vmem [shape: f32[1,128], index: 10, kind: input, shape index: {}]   ;;  %s2240_s11 = inlined_call_operand.vmem [shape: f32[1,128], index: 11, kind: input, shape index: {}]   ;;  %s2241_s12 = inlined_call_operand.vmem [shape: bf16[2,16,128], index: 12, kind: input, shape index: {}]   ;;  %s2242_s13 = inlined_call_operand.hbm [shape: f32[2,16,128], index: 13, kind: output, shape index: {}]  }
   0x1   :  { %v1662_v0 = vld [vmem:[%s2231_s2 + $0x40] sm:$0xff]   ;;  %v1664_v2 = vld [vmem:[%s2231_s2 + $0x48] sm:$0xff]   ;;  %v1666_v4 = vld [vmem:[%s2231_s2 + $0x50] sm:$0xff]  }
   0x2   :  { %v1663_v1 = vld [vmem:[%s2231_s2] sm:$0xff]   ;;  %1508 = vmatprep.subr.bf16.mxu0 %v1662_v0  ;;  %v1665_v3 = vld [vmem:[%s2231_s2 + $0x8] sm:$0xff]   ;;  %v1667_v5 = vld [vmem:[%s2231_s2 + $0x10] sm:$0xff]  }
   0x3   :  { %1509 = vmatpush3.bf16.msra.mxu0 %v1663_v1  ;;  %v1668_v6 = vld [vmem:[%s2231_s2 + $0x58] sm:$0xff]   ;;  %v1670_v8 = vld [vmem:[%s2231_s2 + $0x60] sm:$0xff]   ;;  %v1672_v10 = vld [vmem:[%s2231_s2 + $0x68] sm:$0xff]  }
   0x4   :  { %1510 = vmatprep.subr.bf16.mxu0 %v1664_v2  ;;  %v1669_v7 = vld [vmem:[%s2231_s2 + $0x18] sm:$0xff]   ;;  %v1671_v9 = vld [vmem:[%s2231_s2 + $0x20] sm:$0xff]   ;;  %v1673_v13 = vld [vmem:[%s2231_s2 + $0x28] sm:$0xff]  }
   0x5   :  { %v54_v11 = vld [vmem:[%s2230_s1] sm:$0x3]  ;;  %v55_v12 = vld [vmem:[%s2230_s1 + $0x2] sm:$0x3]  ;;  %v1674_v16 = vld [vmem:[%s2231_s2 + $0x70] sm:$0xff]  }
   0x6   :  { %v56_v14 = vsub.f32 0.0, %v54_v11  ;;  %v57_v15 = vsub.f32 0.0, %v55_v12  ;;  %v1675_v19 = vld [vmem:[%s2231_s2 + $0x30] sm:$0xff]   ;;  %v1676_v20 = vld [vmem:[%s2231_s2 + $0x78] sm:$0xff]  }
   0x7   :  { %1511 = vmatpush3.bf16.msra.mxu0 %v1665_v3  ;;  %v1677_v21 = vld [vmem:[%s2231_s2 + $0x38] sm:$0xff]  }
   0x8   :  { %1512 = vmatprep.subr.bf16.mxu0 %v1666_v4  ;;  %v58_v17 = vmul.f32 1.442695, %v56_v14  ;;  %v60_v18 = vmul.f32 1.442695, %v57_v15 }
   0xa   :  { %1718 = vpow2.f32 %v58_v17 }
   0xb   :  { %1513 = vmatpush3.bf16.msra.mxu0 %v1667_v5  ;;  %1720 = vpow2.f32 %v60_v18 }
   0xc   :  { %1514 = vmatprep.subr.bf16.mxu0 %v1668_v6 }
   0xf   :  { %1515 = vmatpush3.bf16.msra.mxu0 %v1669_v7 }
  0x10   :  { %1516 = vmatprep.subr.bf16.mxu0 %v1670_v8 }
  0x13   :  { %1517 = vmatpush3.bf16.msra.mxu0 %v1671_v9 }
  0x14   :  { %1518 = vmatprep.subr.bf16.mxu0 %v1672_v10  ;;  %v1719_v22 = vpop.eup %1718 }
  0x15   :  { %v1721_v23 = vpop.eup %1720  ;;  %v62_v24 = vadd.f32 1.0, %v1719_v22 }
  0x16   :  { %v63_v25 = vadd.f32 1.0, %v1721_v23 }
  0x17   :  { %1519 = vmatpush3.bf16.msra.mxu0 %v1673_v13 }
  0x18   :  { %1520 = vmatprep.subr.bf16.mxu0 %v1674_v16 }
  0x1b   :  { %1521 = vmatpush3.bf16.msra.mxu0 %v1675_v19 }
  0x1c   :  { %1522 = vmatprep.subr.bf16.mxu0 %v1676_v20 }
  0x1f   :  { %1523 = vmatpush3.bf16.msra.mxu0 %v1677_v21 }
  0x20   :  { %18 = vsyncpa [#allocation4], 0  ;;  %1722 = vrcp.f32 %v62_v24  ;;  %v102_v26 = vlaneseq  ;;  %vm142_vm0 = vcmask 1041409   ;;  %v1814_v52 = vmov 1966171168   ;;  %v1491_v63 = vld [vmem:[%s2229_s0] sm:$0xff]  }
  0x21   :  { %1724 = vrcp.f32 %v63_v25  ;;  %v288_v53 = vunpack.c.l.s4 %v1814_v52  ;;  %v1428_v56 = vld [vmem:[%s2232_s3] ss:$0 sm:$0xff]  ;;  %v1506_v1 = vld [vmem:[%s2229_s0 + $0x8] sm:$0xff]   ;;  %v1492_v3 = vunpack.c.l.bf16 %v1491_v63  ;;  %v1493_v9 = vunpack.c.h.bf16 %v1491_v63 }
  0x22   :  { %v1946_v27 = vshrl.u32 %v102_v26, 7  ;;  %v1497_v7 = vunpack.c.h.bf16 %v1506_v1  ;;  %v1496_v13 = vunpack.c.l.bf16 %v1506_v1  ;;  %vm1817_vm1 = vmmov 0  }
  0x23   :  { %v289_v54 = vunpack.c.0.s8 %v288_v53  ;;  %vm718_vm2 = vcmask 523264   ;;  %vm766_vm3 = vcmask 130048   ;;  %vm969_vm4 = vcmask 1048064  }
  0x24   :  { %v1949_v29 = vsub.s32 1, %v1946_v27  ;;  %v1952_v30 = vsub.s32 0, %v1946_v27 }
  0x25   :  { %v292_v59 = vsub.s32 %v289_v54, %v1946_v27 }
  0x2a   :  { %v1723_v28 = vpop.eup %1722 }
  0x2b   :  { %v1725_v31 = vpop.eup %1724  ;;  %v66_v32 = vmul.f32 %v1723_v28, %v54_v11  ;;  %v1678_v28 = vld [vmem:[%s2235_s6 + $0x4] ss:$12 sps:$4 sm:$0xff]  }
  0x2c   :  { %v67_v33 = vmul.f32 %v1725_v31, %v55_v12  ;;  %v1680_v31 = vld [vmem:[%s2235_s6] ss:$12 sps:$4 sm:$0xff]   ;;  %610 = vmatprep.subr.bf16.mxu1 %v1678_v28 }
  0x2d   :  { %v109_v34 = vrot.slane %v66_v32, %v1949_v29  ;;  %v105_v35 = vrot.slane %v66_v32, %v1952_v30  ;;  %v1681_v32 = vld [vmem:[%s2235_s6 + $0x1c] ss:$12 sps:$4 sm:$0xff]   ;;  %611 = vmatpush1.bf16.msra.mxu1 %v1680_v31  ;;  %v1816_v31 = vmov 0.0  }
  0x2e   :  { %v117_v36 = vrot.slane %v67_v33, %v1949_v29  ;;  %v113_v37 = vrot.slane %v67_v33, %v1952_v30  ;;  %v1683_v33 = vld [vmem:[%s2235_s6 + $0x18] ss:$12 sps:$4 sm:$0xff]   ;;  %612 = vmatprep.subr.bf16.mxu1 %v1681_v32 }
  0x2f   :  { %v123_v38 = vpack.c.bf16 %v109_v34, %v109_v34  ;;  %v122_v39 = vpack.c.bf16 %v105_v35, %v105_v35  ;;  %v1684_v34 = vld [vmem:[%s2235_s6 + $0x34] ss:$12 sps:$4 sm:$0xff]   ;;  %v1815_v35 = vmov 0  }
  0x30   :  { %v125_v40 = vpack.c.bf16 %v117_v36, %v117_v36  ;;  %v124_v41 = vpack.c.bf16 %v113_v37, %v113_v37  ;;  %642 = vmatprep.mubr.bf16.mxu1 %v1815_v35  ;;  %v1686_v36 = vld [vmem:[%s2235_s6 + $0x30] ss:$12 sps:$4 sm:$0xff]   ;;  %v1687_v37 = vld [vmem:[%s2235_s6 + $0x4c] ss:$12 sps:$4 sm:$0xff]  }
  0x31   :  { %v138_v42 = vunpack.c.l.b16 %v123_v38  ;;  %v137_v44 = vunpack.c.l.b16 %v122_v39  ;;  %613 = vmatpush1.bf16.msra.mxu1 %v1683_v33  ;;  %v1689_v38 = vld [vmem:[%s2235_s6 + $0x48] ss:$12 sps:$4 sm:$0xff]   ;;  %v1690_v39 = vld [vmem:[%s2235_s6 + $0x64] ss:$12 sps:$4 sm:$0xff]  }
  0x32   :  { %v140_v43 = vunpack.c.l.b16 %v125_v40  ;;  %v139_v45 = vunpack.c.l.b16 %v124_v41  ;;  %614 = vmatprep.subr.bf16.mxu1 %v1684_v34  ;;  %v1692_v40 = vld [vmem:[%s2235_s6 + $0x60] ss:$12 sps:$4 sm:$0xff]   ;;  %v1693_v41 = vld [vmem:[%s2235_s6 + $0x7c] ss:$12 sps:$4 sm:$0xff]  }
  0x34   :  { %v144_v46 = vrot.slane %v140_v43, 7  ;;  %v141_v47 = vrot.slane %v139_v45, 7  ;;  %v1696_v43 = vld [vmem:[%s2235_s6 + $0x94] ss:$12 sps:$4 sm:$0xff]   ;;  %v1699_v45 = vld [vmem:[%s2235_s6 + $0xac] ss:$12 sps:$4 sm:$0xff]  }
  0x35   :  { %615 = vmatpush1.bf16.msra.mxu1 %v1686_v36 }
  0x36   :  { %v145_v48 = vsel %vm142_vm0, %v144_v46, %v138_v42  ;;  %v143_v49 = vsel %vm142_vm0, %v141_v47, %v137_v44  ;;  %616 = vmatprep.subr.bf16.mxu1 %v1687_v37  ;;  %v1695_v42 = vld [vmem:[%s2235_s6 + $0x78] ss:$12 sps:$4 sm:$0xff]   ;;  %v1698_v44 = vld [vmem:[%s2235_s6 + $0x90] ss:$12 sps:$4 sm:$0xff]   ;;  %v1701_v46 = vld [vmem:[%s2235_s6 + $0xa8] ss:$12 sps:$4 sm:$0xff]  }
  0x37   :  { %v147_v50 = vpack.c.b16 %v145_v48, %v145_v48  ;;  %v146_v51 = vpack.c.b16 %v143_v49, %v143_v49 }
  0x39   :  { %278 = vmatprep.mubr.bf16.mxu0 %v147_v50  ;;  %617 = vmatpush1.bf16.msra.mxu1 %v1689_v38 }
  0x3a   :  { %279 = vmatmul.mubr.bf16.vlgmr.msra.gmra.mrb[0].mxu0 %v146_v51  ;;  %618 = vmatprep.subr.bf16.mxu1 %v1690_v39 }
  0x3d   :  { %619 = vmatpush1.bf16.msra.mxu1 %v1692_v40 }
  0x3e   :  { %620 = vmatprep.subr.bf16.mxu1 %v1693_v41 }
  0x41   :  { %621 = vmatpush1.bf16.msra.mxu1 %v1695_v42 }
  0x42   :  { %622 = vmatprep.subr.bf16.mxu1 %v1696_v43 }
  0x45   :  { %623 = vmatpush1.bf16.msra.mxu1 %v1698_v44 }
  0x46   :  { %624 = vmatprep.subr.bf16.mxu1 %v1699_v45 }
  0x49   :  { %625 = vmatpush1.bf16.msra.mxu1 %v1701_v46 }
  0x4a   :  { %1592 = vmatprep.subr.bf16.mxu1 %v1816_v31 }
 0x10d   :  { %v1524_v55 = vpop.f32.mrb[0].mxu0 }
 0x10e   :  { %v1525_v57 = vpop.f32.mrb[1].mxu0 }
 0x10f   :  { %v1526_v58 = vadd.f32 %v1525_v57, %v1524_v55  ;;  %v1527_v60 = vpop.f32.mrb[2].mxu0 }
 0x110   :  { %v1528_v61 = vpop.f32.mrb[3].mxu0  ;;  %v2048_v60 = vld [vmem:[%s2234_s5] ss:$0 sm:$0xff] }
 0x111   :  { %v281_v62 = vadd.f32 %v1526_v58, %v1428_v56  ;;  %v2042_v58 = vld [vmem:[%s2233_s4] ss:$0 sm:$0xff] }
 0x113   :  { %v293_v0 = vrot.slane %v281_v62, %v292_v59 }
 0x115   :  { %v294_v2 = vcombine.high %v293_v0, %v293_v0  ;;  %v301_v4 = vrot.slane %v293_v0, %v292_v59 }
 0x117   :  { %v312_v5 = vrot.slane %v301_v4, %v1952_v30  ;;  %v308_v6 = vrot.slane %v294_v2, %v292_v59 }
 0x119   :  { %v319_v8 = vadd.f32 %v1492_v3, %v312_v5  ;;  %v316_v10 = vrot.slane %v308_v6, %v1952_v30  ;;  %v320_v12 = vadd.f32 %v1493_v9, %v312_v5 }
 0x11b   :  { %325 = vadd.xlane.f32.xlu0 %v319_v8  ;;  %v1970_v11 = vadd.f32 %v1497_v7, %v316_v10  ;;  %v321_v14 = vadd.f32 %v1496_v13, %v316_v10  ;;  %v1702_v7 = vld [vmem:[%s2235_s6 + $0x8] ss:$12 sps:$4 sm:$0xff]  }
 0x11c   :  { %1566 = vmatprep.subr.bf16.mxu0 %v1702_v7 }
 0x11d   :  { %1567 = vmatpush3.bf16.msra.mxu0 %v1702_v7 }
 0x11f   :  { %327 = vadd.xlane.f32.xlu0 %v320_v12 }
 0x123   :  { %329 = vadd.xlane.f32.xlu0 %v321_v14 }
 0x1a8   :  { %v326_v15 = vpop.xlane.xlu0 %325 }
 0x1a9   :  { %v334_v16 = vmul.f32 0.0078125, %v326_v15  ;;  %v1706_v15 = vld [vmem:[%s2235_s6 + $0x68] ss:$12 sps:$4 sm:$0xff]  }
 0x1ab   :  { %v1972_v17 = vsub.f32 %v319_v8, %v334_v16  ;;  %v1703_v8 = vld [vmem:[%s2235_s6 + $0x20] ss:$12 sps:$4 sm:$0xff]  }
 0x1ac   :  { %v328_v18 = vpop.xlane.xlu0 %327  ;;  %1568 = vmatprep.subr.bf16.mxu0 %v1703_v8  ;;  %v1707_v16 = vld [vmem:[%s2235_s6 + $0x80] ss:$12 sps:$4 sm:$0xff]  }
 0x1ad   :  { %v335_v19 = vmul.f32 0.0078125, %v328_v18  ;;  %v342_v20 = vmul.f32 %v1972_v17, %v1972_v17  ;;  %1569 = vmatpush3.bf16.msra.mxu0 %v1703_v8 }
 0x1af   :  { %v1976_v21 = vsub.f32 %v320_v12, %v335_v19  ;;  %346 = vadd.xlane.f32.xlu1 %v342_v20  ;;  %v1708_v19 = vld [vmem:[%s2235_s6 + $0x98] ss:$12 sps:$4 sm:$0xff]  }
 0x1b0   :  { %v330_v22 = vpop.xlane.xlu0 %329 }
 0x1b1   :  { %v336_v23 = vmul.f32 0.0078125, %v330_v22  ;;  %v343_v24 = vmul.f32 %v1976_v21, %v1976_v21 }
 0x1b3   :  { %v1980_v25 = vsub.f32 %v321_v14, %v336_v23  ;;  %348 = vadd.xlane.f32.xlu1 %v343_v24  ;;  %v1705_v14 = vld [vmem:[%s2235_s6 + $0x50] ss:$12 sps:$4 sm:$0xff]  }
 0x1b4   :  { %v1709_v23 = vld [vmem:[%s2235_s6 + $0xb0] ss:$12 sps:$4 sm:$0xff]  }
 0x1b5   :  { %v344_v26 = vmul.f32 %v1980_v25, %v1980_v25 }
 0x1b7   :  { %331 = vadd.xlane.f32.xlu1 %v1970_v11  ;;  %350 = vadd.xlane.f32.xlu0 %v344_v26 }
 0x23c   :  { %v347_v47 = vpop.xlane.xlu1 %346 }
 0x23d   :  { %v354_v48 = vmul.f32 0.0078125, %v347_v47 }
 0x23f   :  { %v358_v49 = vadd.f32 1e-05, %v354_v48 }
 0x240   :  { %v349_v50 = vpop.xlane.xlu1 %348 }
 0x241   :  { %1726 = vrsqrt.f32 %v358_v49  ;;  %v355_v51 = vmul.f32 0.0078125, %v349_v50 }
 0x243   :  { %v359_v52 = vadd.f32 1e-05, %v355_v51 }
 0x244   :  { %v332_v53 = vpop.xlane.xlu1 %331  ;;  %v351_v24 = vpop.xlane.xlu0 %350 }
 0x245   :  { %1728 = vrsqrt.f32 %v359_v52  ;;  %v337_v54 = vmul.f32 0.0078125, %v332_v53  ;;  %v356_v26 = vmul.f32 0.0078125, %v351_v24 }
 0x247   :  { %v2035_v55 = vsub.f32 %v1970_v11, %v337_v54  ;;  %v1704_v11 = vld [vmem:[%s2235_s6 + $0x38] ss:$12 sps:$4 sm:$0xff]   ;;  %v360_v28 = vadd.f32 1e-05, %v356_v26 }
 0x248   :  { %1570 = vmatprep.subr.bf16.mxu0 %v1704_v11 }
 0x249   :  { %v345_v56 = vmul.f32 %v2035_v55, %v2035_v55  ;;  %1571 = vmatpush3.bf16.msra.mxu0 %v1704_v11 }
 0x24a   :  { %1572 = vmatprep.subr.bf16.mxu0 %v1705_v14 }
 0x24b   :  { %v1727_v57 = vpop.eup %1726  ;;  %352 = vadd.xlane.f32.xlu1 %v345_v56 }
 0x24c   :  { %v366_v59 = vmul.f32 %v1727_v57, %v1972_v17 }
 0x24d   :  { %1573 = vmatpush3.bf16.msra.mxu0 %v1705_v14 }
 0x24e   :  { %v376_v61 = vmul.f32 %v2042_v58, %v366_v59  ;;  %1574 = vmatprep.subr.bf16.mxu0 %v1706_v15 }
 0x24f   :  { %v1729_v62 = vpop.eup %1728 }
 0x250   :  { %v367_v63 = vmul.f32 %v1729_v62, %v1976_v21  ;;  %v386_v0 = vadd.f32 %v2048_v60, %v376_v61 }
 0x251   :  { %1575 = vmatpush3.bf16.msra.mxu0 %v1706_v15 }
 0x252   :  { %v377_v1 = vmul.f32 %v2042_v58, %v367_v63  ;;  %v390_v2 = vsub.f32 0.0, %v386_v0  ;;  %1576 = vmatprep.subr.bf16.mxu0 %v1707_v16 }
 0x254   :  { %v387_v3 = vadd.f32 %v2048_v60, %v377_v1  ;;  %v394_v4 = vmul.f32 1.442695, %v390_v2 }
 0x255   :  { %1577 = vmatpush3.bf16.msra.mxu0 %v1707_v16 }
 0x256   :  { %v391_v5 = vsub.f32 0.0, %v387_v3  ;;  %1730 = vpow2.f32 %v394_v4  ;;  %1578 = vmatprep.subr.bf16.mxu0 %v1708_v19 }
 0x258   :  { %v396_v6 = vmul.f32 1.442695, %v391_v5 }
 0x259   :  { %1579 = vmatpush3.bf16.msra.mxu0 %v1708_v19 }
 0x25a   :  { %1732 = vpow2.f32 %v396_v6  ;;  %1580 = vmatprep.subr.bf16.mxu0 %v1709_v23 }
 0x25d   :  { %1581 = vmatpush3.bf16.msra.mxu0 %v1709_v23 }
 0x25e   :  { %1586 = vmatprep.subr.bf16.mxu0 %v1816_v31 }
 0x260   :  { %v1731_v9 = vpop.eup %1730 }
 0x261   :  { %v402_v10 = vadd.f32 1.0, %v1731_v9 }
 0x263   :  { %1734 = vrcp.f32 %v402_v10 }
 0x264   :  { %v1733_v12 = vpop.eup %1732 }
 0x265   :  { %v403_v13 = vadd.f32 1.0, %v1733_v12 }
 0x267   :  { %1736 = vrcp.f32 %v403_v13 }
 0x268   :  { %1738 = vrsqrt.f32 %v360_v28 }
 0x26d   :  { %v1735_v17 = vpop.eup %1734 }
 0x26e   :  { %v2076_v20 = vmul.f32 %v1735_v17, %v386_v0 }
 0x271   :  { %v1737_v18 = vpop.eup %1736 }
 0x272   :  { %v2078_v21 = vmul.f32 %v1737_v18, %v387_v3  ;;  %v1739_v32 = vpop.eup %1738 }
 0x273   :  { %v368_v34 = vmul.f32 %v1739_v32, %v1980_v25 }
 0x274   :  { %v464_v22 = vpack.c.bf16 %v2078_v21, %v2076_v20 }
 0x276   :  { %643 = vmatmul.mubr.bf16.vlgmr.msra.gmra.mrb[0].mxu1 %v464_v22  ;;  %1582 = vmatprep.mubr.bf16.mxu0 %v464_v22 }
 0x277   :  { %652 = vmatprep.mubr.bf16.mxu1 %v1815_v35  ;;  %v378_v35 = vmul.f32 %v2042_v58, %v368_v34 }
 0x279   :  { %v388_v38 = vadd.f32 %v2048_v60, %v378_v35 }
 0x27b   :  { %v392_v39 = vsub.f32 0.0, %v388_v38 }
 0x27d   :  { %v398_v42 = vmul.f32 1.442695, %v392_v39 }
 0x2d8   :  { %v353_v33 = vpop.xlane.xlu1 %352 }
 0x2d9   :  { %v357_v36 = vmul.f32 0.0078125, %v353_v33 }
 0x2db   :  { %v361_v37 = vadd.f32 1e-05, %v357_v36 }
 0x2dd   :  { %1740 = vrsqrt.f32 %v361_v37 }
 0x2de   :  { %1742 = vpow2.f32 %v398_v42 }
 0x2e7   :  { %v1741_v40 = vpop.eup %1740 }
 0x2e8   :  { %v369_v41 = vmul.f32 %v1741_v40, %v2035_v55  ;;  %v1743_v25 = vpop.eup %1742  ;;  %v446_v55 = vld [vmem:[%s2236_s7] sm:$0x7]  ;;  %s1818_s7 = smov 64  }
 0x2e9   :  { %v404_v47 = vadd.f32 1.0, %v1743_v25  ;;  %v470_v56 = vrot.slane %v446_v55, %v1952_v30 }
 0x2ea   :  { %v379_v43 = vmul.f32 %v2042_v58, %v369_v41  ;;  %v474_v58 = vrot.slane %v446_v55, %v1949_v29  ;;  %v477_v29 = vsub.s32 2, %v1946_v27 }
 0x2ec   :  { %v389_v44 = vadd.f32 %v2048_v60, %v379_v43  ;;  %v478_v30 = vrot.slane %v446_v55, %v477_v29 }
 0x2ee   :  { %v393_v45 = vsub.f32 0.0, %v389_v44 }
 0x2f0   :  { %v400_v46 = vmul.f32 1.442695, %v393_v45 }
 0x2f2   :  { %1744 = vpow2.f32 %v400_v46 }
 0x2f3   :  { %1746 = vrcp.f32 %v404_v47 }
 0x2fc   :  { %v1745_v48 = vpop.eup %1744 }
 0x2fd   :  { %v405_v49 = vadd.f32 1.0, %v1745_v48  ;;  %v1747_v50 = vpop.eup %1746 }
 0x2fe   :  { %v2094_v52 = vmul.f32 %v1747_v50, %v388_v38 }
 0x2ff   :  { %1748 = vrcp.f32 %v405_v49 }
 0x309   :  { %v1749_v51 = vpop.eup %1748 }
 0x30a   :  { %v2096_v53 = vmul.f32 %v1749_v51, %v389_v44 }
 0x30c   :  { %v465_v54 = vpack.c.bf16 %v2096_v53, %v2094_v52 }
 0x30e   :  { %653 = vmatmul.mubr.bf16.gmra.mrb[4].mxu1 %v465_v54  ;;  %1583 = vmatmul.mubr.bf16.vlgmr.msra.gmra.mrb[4].mxu0 %v465_v54 }
 0x30f   :  { %1588 = vmatprep.mubr.msk.bf16.mxu0 %vm1817_vm1, %v1816_v31  ;;  %1594 = vmatprep.mubr.msk.bf16.mxu1 %vm1817_vm1, %v1816_v31 }
 0x349   :  { %v644_v57 = vpop.f32.mrb[0].mxu1 }
 0x34a   :  { %v646_v59 = vpop.f32.mrb[1].mxu1  ;;  %v645_v61 = vadd.f32 %v644_v57, %v470_v56 }
 0x34b   :  { %v648_v60 = vpop.f32.mrb[2].mxu1  ;;  %v647_v0 = vadd.f32 %v646_v59, %v474_v58 }
 0x34c   :  { %v649_v62 = vadd.f32 %v648_v60, %v470_v56  ;;  %v650_v63 = vpop.f32.mrb[3].mxu1 }
 0x34d   :  { %v651_v1 = vadd.f32 %v650_v63, %v474_v58 }
 0x34e   :  { %v712_v2 = vpack.c.bf16 %v649_v62, %v645_v61 }
 0x34f   :  { %v713_v3 = vpack.c.bf16 %v651_v1, %v647_v0 }
 0x351   :  { %v723_v4 = vsel %vm718_vm2, %v713_v3, 0 }
 0x352   :  { %1587 = vmatpush3.bf16.xpose.msra.mxu0 %v723_v4 }
 0x353   :  { %1604 = vmatprep.subr.bf16.mxu0 %v1816_v31 }
 0x359   :  { %1589 = vmatmul.mubr.msk.bf16.vlgmr.msra.gmra.mrb[8].mxu0 %vm718_vm2, %v712_v2 }
 0x35a   :  { %1606 = vmatprep.mubr.msk.bf16.mxu0 %vm1817_vm1, %v1816_v31 }
 0x3e1   :  { %v654_v5 = vpop.f32.mrb[4].mxu1  ;;  %v1584_v6 = vpop.f32.mrb[4].mxu0 }
 0x3e2   :  { %v706_v7 = vadd.f32 %v1584_v6, %v478_v30  ;;  %v656_v8 = vpop.f32.mrb[5].mxu1  ;;  %v697_v9 = vpop.f32.mrb[5].mxu0  ;;  %v655_v12 = vadd.f32 %v654_v5, %v470_v56 }
 0x3e3   :  { %v658_v10 = vpop.f32.mrb[6].mxu1  ;;  %v1585_v11 = vpop.f32.mrb[6].mxu0  ;;  %v657_v17 = vadd.f32 %v656_v8, %v474_v58  ;;  %v698_v18 = vadd.f32 %v697_v9, %v478_v30 }
 0x3e4   :  { %v659_v13 = vadd.f32 %v658_v10, %v470_v56  ;;  %v709_v14 = vadd.f32 %v1585_v11, %v478_v30  ;;  %v660_v15 = vpop.f32.mrb[7].mxu1  ;;  %v700_v16 = vpop.f32.mrb[7].mxu0 }
 0x3e5   :  { %v661_v19 = vadd.f32 %v660_v15, %v474_v58  ;;  %v701_v22 = vadd.f32 %v700_v16, %v478_v30 }
 0x3e6   :  { %v715_v23 = vpack.c.bf16 %v659_v13, %v655_v12  ;;  %v2115_v24 = vpack.c.bf16 %v709_v14, %v706_v7 }
 0x3e7   :  { %v716_v27 = vpack.c.bf16 %v661_v19, %v657_v17  ;;  %v2117_v26 = vpack.c.bf16 %v701_v22, %v698_v18 }
 0x3e9   :  { %1593 = vmatpush3.bf16.msra.mxu1 %v2117_v26  ;;  %v975_v58 = vsel %vm718_vm2, %v716_v27, 0 }
 0x3ea   :  { %1598 = vmatprep.subr.bf16.mxu1 %v1816_v31 }
 0x42c   :  { %v759_v28 = vpop.f32.mrb[8].mxu0 }
 0x42d   :  { %v1590_v32 = vpop.f32.mrb[9].mxu0  ;;  %v767_v33 = vsel %vm766_vm3, %v759_v28, -inf }
 0x42e   :  { %768 = vmax.xlane.f32.xlu0 %v767_v33  ;;  %v762_v34 = vpop.f32.mrb[10].mxu0 }
 0x42f   :  { %v1591_v36 = vpop.f32.mrb[11].mxu0  ;;  %v770_v37 = vsel %vm766_vm3, %v762_v34, -inf }
 0x430   :  { %771 = vmax.xlane.f32.xlu1 %v770_v37 }
 0x4bb   :  { %v769_v35 = vpop.xlane.xlu0 %768 }
 0x4bc   :  { %v773_v38 = vsub.f32 %v759_v28, %v769_v35 }
 0x4bd   :  { %v772_v39 = vpop.xlane.xlu1 %771 }
 0x4be   :  { %v775_v40 = vmul.f32 1.442695, %v773_v38  ;;  %v774_v41 = vsub.f32 %v762_v34, %v772_v39 }
 0x4c0   :  { %1750 = vpow2.f32 %v775_v40  ;;  %v777_v42 = vmul.f32 1.442695, %v774_v41 }
 0x4c2   :  { %1752 = vpow2.f32 %v777_v42 }
 0x4ca   :  { %v1751_v43 = vpop.eup %1750 }
 0x4cb   :  { %v779_v44 = vsel %vm766_vm3, %v1751_v43, 0.0 }
 0x4cc   :  { %v1753_v45 = vpop.eup %1752  ;;  %780 = vadd.xlane.f32.xlu0 %v779_v44 }
 0x4cd   :  { %v782_v46 = vsel %vm766_vm3, %v1753_v45, 0.0 }
 0x4ce   :  { %783 = vadd.xlane.f32.xlu1 %v782_v46 }
 0x4df   :  { %839 = vrot.lane.b32.xlu1 %v712_v2, %s1818_s7 }
 0x4e2   :  { %842 = vrot.lane.b32.xlu0 %v713_v3, %s1818_s7 }
 0x4e3   :  { %1093 = vrot.lane.b32.xlu1 %v716_v27, %s1818_s7 }
 0x4e7   :  { %1090 = vrot.lane.b32.xlu1 %v715_v23, %s1818_s7 }
 0x559   :  { %v781_v25 = vpop.xlane.xlu0 %780 }
 0x55a   :  { %1754 = vrcp.f32 %v781_v25 }
 0x55b   :  { %v784_v47 = vpop.xlane.xlu1 %783 }
 0x55c   :  { %1756 = vrcp.f32 %v784_v47 }
 0x55d   :  { %v843_v54 = vpop.permute.xlu0 %842 }
 0x55e   :  { %v848_v56 = vsel %vm718_vm2, %v843_v54, 0 }
 0x55f   :  { %v840_v57 = vpop.permute.xlu1 %839 }
 0x563   :  { %v1094_v59 = vpop.permute.xlu1 %1093 }
 0x564   :  { %v1755_v48 = vpop.eup %1754  ;;  %v1099_v60 = vsel %vm718_vm2, %v1094_v59, 0 }
 0x565   :  { %v789_v50 = vmul.f32 %v1755_v48, %v1751_v43 }
 0x566   :  { %v1757_v49 = vpop.eup %1756 }
 0x567   :  { %v790_v51 = vmul.f32 %v1757_v49, %v1753_v45  ;;  %v1091_v61 = vpop.permute.xlu1 %1090 }
 0x569   :  { %v791_v55 = vpack.c.bf16 %v790_v51, %v789_v50 }
 0x56b   :  { %1595 = vmatmul.mubr.msk.bf16.vlgmr.msra.gmra.mrb[8].mxu1 %vm766_vm3, %v791_v55 }
 0x56c   :  { %1599 = vmatpush3.bf16.xpose.msra.mxu1 %v848_v56  ;;  %1600 = vmatprep.mubr.msk.bf16.mxu1 %vm1817_vm1, %v1816_v31 }
 0x56d   :  { %1610 = vmatprep.subr.bf16.mxu1 %v1816_v31 }
 0x573   :  { %1601 = vmatmul.mubr.msk.bf16.vlgmr.msra.gmra.mrb[12].mxu1 %vm718_vm2, %v840_v57 }
 0x574   :  { %1611 = vmatpush3.bf16.xpose.msra.mxu1 %v975_v58  ;;  %1612 = vmatprep.mubr.msk.bf16.mxu1 %vm1817_vm1, %v1816_v31 }
 0x575   :  { %1622 = vmatprep.subr.bf16.mxu1 %v1816_v31 }
 0x57b   :  { %1613 = vmatmul.mubr.msk.bf16.vlgmr.msra.gmra.mrb[16].mxu1 %vm718_vm2, %v715_v23 }
 0x57c   :  { %1623 = vmatpush3.bf16.xpose.msra.mxu1 %v1099_v60  ;;  %1624 = vmatprep.mubr.msk.bf16.mxu1 %vm1817_vm1, %v1816_v31 }
 0x583   :  { %1625 = vmatmul.mubr.msk.bf16.vlgmr.msra.gmra.mrb[20].mxu1 %vm718_vm2, %v1091_v61 }
 0x63e   :  { %v829_v62 = vpop.f32.mrb[8].mxu1 }
 0x63f   :  { %v1596_v63 = vpop.f32.mrb[9].mxu1 }
 0x640   :  { %v832_v0 = vpop.f32.mrb[10].mxu1 }
 0x641   :  { %v836_v1 = vpack.c.bf16 %v832_v0, %v829_v62  ;;  %v1597_v2 = vpop.f32.mrb[11].mxu1 }
 0x643   :  { %837 = vst.msk [vmem:[#allocation2] sm:$0xff] %vm718_vm2, %v836_v1 }
 0x646   :  { %v884_v3 = vpop.f32.mrb[12].mxu1 }
 0x647   :  { %v1602_v4 = vpop.f32.mrb[13].mxu1  ;;  %v891_v29 = vsel %vm766_vm3, %v884_v3, -inf }
 0x648   :  { %892 = vmax.xlane.f32.xlu0 %v891_v29  ;;  %v887_v30 = vpop.f32.mrb[14].mxu1 }
 0x649   :  { %v1603_v5 = vpop.f32.mrb[15].mxu1  ;;  %v894_v6 = vsel %vm766_vm3, %v887_v30, -inf }
 0x64a   :  { %895 = vmax.xlane.f32.xlu1 %v894_v6 }
 0x64e   :  { %v1011_v7 = vpop.f32.mrb[16].mxu1 }
 0x64f   :  { %v1614_v8 = vpop.f32.mrb[17].mxu1  ;;  %v1018_v9 = vsel %vm766_vm3, %v1011_v7, -inf }
 0x650   :  { %1019 = vmax.xlane.f32.xlu0 %v1018_v9  ;;  %v1014_v10 = vpop.f32.mrb[18].mxu1 }
 0x651   :  { %v1615_v11 = vpop.f32.mrb[19].mxu1  ;;  %v1021_v12 = vsel %vm766_vm3, %v1014_v10, -inf }
 0x654   :  { %1022 = vmax.xlane.f32.xlu0 %v1021_v12 }
 0x656   :  { %v1135_v13 = vpop.f32.mrb[20].mxu1 }
 0x657   :  { %v1626_v14 = vpop.f32.mrb[21].mxu1  ;;  %v1142_v15 = vsel %vm766_vm3, %v1135_v13, -inf }
 0x658   :  { %1143 = vmax.xlane.f32.xlu0 %v1142_v15  ;;  %v1138_v16 = vpop.f32.mrb[22].mxu1  ;;  %v1711_v14 = vld [vmem:[%s2237_s8 + $0x8] sm:$0xff]   ;;  %v1713_v15 = vld [vmem:[%s2237_s8 + $0x18] sm:$0xff]  }
 0x659   :  { %v1627_v17 = vpop.f32.mrb[23].mxu1  ;;  %v1145_v18 = vsel %vm766_vm3, %v1138_v16, -inf }
 0x65a   :  { %1146 = vmax.xlane.f32.xlu1 %v1145_v18  ;;  %v1715_v18 = vld [vmem:[%s2237_s8 + $0x28] sm:$0xff]  }
 0x6d5   :  { %v893_v19 = vpop.xlane.xlu0 %892 }
 0x6d6   :  { %v897_v22 = vsub.f32 %v884_v3, %v893_v19 }
 0x6d7   :  { %v896_v23 = vpop.xlane.xlu1 %895 }
 0x6d8   :  { %v899_v27 = vmul.f32 1.442695, %v897_v22  ;;  %v898_v28 = vsub.f32 %v887_v30, %v896_v23 }
 0x6da   :  { %1758 = vpow2.f32 %v899_v27  ;;  %v901_v32 = vmul.f32 1.442695, %v898_v28  ;;  %v1716_v28 = vld [vmem:[%s2237_s8 + $0x30] sm:$0xff]  }
 0x6dc   :  { %1760 = vpow2.f32 %v901_v32 }
 0x6dd   :  { %v1020_v33 = vpop.xlane.xlu0 %1019 }
 0x6de   :  { %v1024_v34 = vsub.f32 %v1011_v7, %v1020_v33  ;;  %v1717_v33 = vld [vmem:[%s2237_s8 + $0x38] sm:$0xff]  }
 0x6e0   :  { %v1026_v36 = vmul.f32 1.442695, %v1024_v34 }
 0x6e1   :  { %v1023_v37 = vpop.xlane.xlu0 %1022 }
 0x6e2   :  { %1762 = vpow2.f32 %v1026_v36  ;;  %v1025_v35 = vsub.f32 %v1014_v10, %v1023_v37 }
 0x6e4   :  { %v1759_v38 = vpop.eup %1758  ;;  %v1028_v39 = vmul.f32 1.442695, %v1025_v35 }
 0x6e5   :  { %v1144_v40 = vpop.xlane.xlu0 %1143  ;;  %v903_v41 = vsel %vm766_vm3, %v1759_v38, 0.0 }
 0x6e6   :  { %v1761_v42 = vpop.eup %1760  ;;  %1764 = vpow2.f32 %v1028_v39  ;;  %v1148_v43 = vsub.f32 %v1135_v13, %v1144_v40  ;;  %904 = vadd.xlane.f32.xlu0 %v903_v41  ;;  %v1710_v13 = vld [vmem:[%s2237_s8] sm:$0xff]  }
 0x6e7   :  { %v1147_v44 = vpop.xlane.xlu1 %1146  ;;  %v906_v45 = vsel %vm766_vm3, %v1761_v42, 0.0  ;;  %1634 = vmatprep.subr.bf16.mxu1 %v1710_v13 }
 0x6e8   :  { %v1150_v46 = vmul.f32 1.442695, %v1148_v43  ;;  %v1149_v25 = vsub.f32 %v1138_v16, %v1147_v44  ;;  %907 = vadd.xlane.f32.xlu1 %v906_v45  ;;  %1635 = vmatpush3.bf16.msra.mxu1 %v1710_v13  ;;  %v1714_v16 = vld [vmem:[%s2237_s8 + $0x20] sm:$0xff]  }
 0x6e9   :  { %1636 = vmatprep.subr.bf16.mxu1 %v1711_v14 }
 0x6ea   :  { %1766 = vpow2.f32 %v1150_v46  ;;  %v1152_v47 = vmul.f32 1.442695, %v1149_v25  ;;  %v1479_v25 = vld [vmem:[%s2238_s9] ss:$0 sm:$0xff] }
 0x6ec   :  { %v1763_v48 = vpop.eup %1762  ;;  %1768 = vpow2.f32 %v1152_v47  ;;  %1637 = vmatpush3.bf16.msra.mxu1 %v1711_v14 }
 0x6ed   :  { %v1030_v49 = vsel %vm766_vm3, %v1763_v48, 0.0 }
 0x6ee   :  { %1031 = vadd.xlane.f32.xlu0 %v1030_v49 }
 0x6f0   :  { %v1765_v50 = vpop.eup %1764 }
 0x6f1   :  { %v1033_v51 = vsel %vm766_vm3, %v1765_v50, 0.0 }
 0x6f2   :  { %1034 = vadd.xlane.f32.xlu1 %v1033_v51 }
 0x6f4   :  { %v1767_v54 = vpop.eup %1766 }
 0x6f5   :  { %v1154_v55 = vsel %vm766_vm3, %v1767_v54, 0.0 }
 0x6f6   :  { %v1769_v56 = vpop.eup %1768  ;;  %1155 = vadd.xlane.f32.xlu0 %v1154_v55 }
 0x6f7   :  { %v1157_v57 = vsel %vm766_vm3, %v1769_v56, 0.0 }
 0x6f8   :  { %1158 = vadd.xlane.f32.xlu1 %v1157_v57 }
 0x709   :  { %1168 = vrot.lane.b32.xlu1 %v2115_v24, %s1818_s7 }
 0x70c   :  { %917 = vrot.lane.b32.xlu0 %v2117_v26, %s1818_s7 }
 0x773   :  { %v905_v59 = vpop.xlane.xlu0 %904 }
 0x775   :  { %v908_v58 = vpop.xlane.xlu1 %907 }
 0x776   :  { %1770 = vrcp.f32 %v908_v58 }
 0x777   :  { %1772 = vrcp.f32 %v905_v59 }
 0x77b   :  { %v1032_v60 = vpop.xlane.xlu0 %1031 }
 0x77f   :  { %v1035_v61 = vpop.xlane.xlu1 %1034 }
 0x780   :  { %1774 = vrcp.f32 %v1035_v61  ;;  %v1771_v62 = vpop.eup %1770 }
 0x781   :  { %1776 = vrcp.f32 %v1032_v60  ;;  %v1773_v0 = vpop.eup %1772  ;;  %v914_v1 = vmul.f32 %v1771_v62, %v1761_v42 }
 0x782   :  { %v913_v3 = vmul.f32 %v1773_v0, %v1759_v38 }
 0x783   :  { %v1156_v63 = vpop.xlane.xlu0 %1155 }
 0x784   :  { %v915_v29 = vpack.c.bf16 %v914_v1, %v913_v3 }
 0x785   :  { %v1159_v2 = vpop.xlane.xlu1 %1158 }
 0x786   :  { %1778 = vrcp.f32 %v1159_v2 }
 0x787   :  { %v918_v4 = vpop.permute.xlu0 %917  ;;  %1780 = vrcp.f32 %v1156_v63 }
 0x788   :  { %1605 = vmatpush3.bf16.msra.mxu0 %v918_v4 }
 0x789   :  { %1616 = vmatprep.subr.bf16.mxu0 %v1816_v31  ;;  %v1169_v9 = vpop.permute.xlu1 %1168 }
 0x78a   :  { %v1775_v26 = vpop.eup %1774 }
 0x78b   :  { %1607 = vmatmul.mubr.msk.bf16.vlgmr.msra.gmra.mrb[12].mxu0 %vm766_vm3, %v915_v29  ;;  %v1777_v30 = vpop.eup %1776  ;;  %v1041_v5 = vmul.f32 %v1775_v26, %v1765_v50 }
 0x78c   :  { %1617 = vmatpush3.bf16.msra.mxu0 %v2115_v24  ;;  %1618 = vmatprep.mubr.msk.bf16.mxu0 %vm1817_vm1, %v1816_v31  ;;  %v1040_v6 = vmul.f32 %v1777_v30, %v1763_v48 }
 0x78d   :  { %1628 = vmatprep.subr.bf16.mxu0 %v1816_v31 }
 0x78e   :  { %v1042_v7 = vpack.c.bf16 %v1041_v5, %v1040_v6 }
 0x790   :  { %v1779_v8 = vpop.eup %1778 }
 0x791   :  { %v1781_v10 = vpop.eup %1780  ;;  %v1165_v11 = vmul.f32 %v1779_v8, %v1769_v56 }
 0x792   :  { %v1164_v12 = vmul.f32 %v1781_v10, %v1767_v54 }
 0x793   :  { %1619 = vmatmul.mubr.msk.bf16.vlgmr.msra.gmra.mrb[16].mxu0 %vm766_vm3, %v1042_v7 }
 0x794   :  { %1629 = vmatpush3.bf16.msra.mxu0 %v1169_v9  ;;  %1630 = vmatprep.mubr.msk.bf16.mxu0 %vm1817_vm1, %v1816_v31  ;;  %v1166_v24 = vpack.c.bf16 %v1165_v11, %v1164_v12  ;;  %v1712_v31 = vld [vmem:[%s2237_s8 + $0x10] sm:$0xff]  }
 0x795   :  { %1638 = vmatprep.subr.bf16.mxu1 %v1712_v31 }
 0x796   :  { %1639 = vmatpush3.bf16.msra.mxu1 %v1712_v31 }
 0x797   :  { %1640 = vmatprep.subr.bf16.mxu1 %v1713_v15 }
 0x79a   :  { %1641 = vmatpush3.bf16.msra.mxu1 %v1713_v15 }
 0x79b   :  { %1631 = vmatmul.mubr.msk.bf16.vlgmr.msra.gmra.mrb[20].mxu0 %vm766_vm3, %v1166_v24  ;;  %1642 = vmatprep.subr.bf16.mxu1 %v1714_v16 }
 0x79e   :  { %1643 = vmatpush3.bf16.msra.mxu1 %v1714_v16 }
 0x79f   :  { %1644 = vmatprep.subr.bf16.mxu1 %v1715_v18 }
 0x7a2   :  { %1645 = vmatpush3.bf16.msra.mxu1 %v1715_v18  ;;  %v1499_v18 = vld [vmem:[%s2241_s12] sm:$0xff]  }
 0x7a3   :  { %1646 = vmatprep.subr.bf16.mxu1 %v1716_v28 }
 0x7a6   :  { %1647 = vmatpush3.bf16.msra.mxu1 %v1716_v28 }
 0x7a7   :  { %1648 = vmatprep.subr.bf16.mxu1 %v1717_v33 }
 0x7aa   :  { %1649 = vmatpush3.bf16.msra.mxu1 %v1717_v33 }
 0x85e   :  { %v957_v17 = vpop.f32.mrb[12].mxu0 }
 0x85f   :  { %v1608_v19 = vpop.f32.mrb[13].mxu0 }
 0x860   :  { %v960_v22 = vpop.f32.mrb[14].mxu0 }
 0x861   :  { %v964_v23 = vpack.c.bf16 %v960_v22, %v957_v17  ;;  %v1609_v27 = vpop.f32.mrb[15].mxu0  ;;  %v1488_v17 = vld [vmem:[%s2239_s10] ss:$0 sm:$0xff]  ;;  %s1819_s10 = smov [#allocation3]  }
 0x863   :  { %966 = vrot.lane.b32.xlu1 %v964_v23, %s1818_s7  ;;  %v1489_v23 = vld [vmem:[%s2240_s11] ss:$0 sm:$0xff]  ;;  %s1417_s11 = sshll.u32 %s1819_s10, 4  ;;  %s1418_s11 = int_to_ptr.vmem [resolvable:$true] %s1417_s11 }
 0x864   :  { %p1795_p1 = scmp.lt.s32.totalorder %s1418_s11, %s1418_s11 }
 0x866   :  { %v1080_v32 = vpop.f32.mrb[16].mxu0 }
 0x867   :  { %v1620_v34 = vpop.f32.mrb[17].mxu0 }
 0x868   :  { %v1083_v36 = vpop.f32.mrb[18].mxu0  ;;  %v1507_v34 = vld [vmem:[%s2241_s12 + $0x8] sm:$0xff]   ;;  %s1790_s12 = scalar_lea.vmem %s1418_s11, 512 }
 0x869   :  { %v1087_v37 = vpack.c.bf16 %v1083_v36, %v1080_v32  ;;  %v1621_v35 = vpop.f32.mrb[19].mxu0  ;;  %v1500_v32 = vunpack.c.l.bf16 %v1499_v18  ;;  %p1791_p0 = scmp.ne.s32.totalorder %s1418_s11, %s1790_s12  ;;  %p1796_p2 = scmp.lt.s32.totalorder %s1790_s12, %s1790_s12 }
 0x86b   :  { %1088 = vst.msk [vmem:[#allocation2 + $0x8] sm:$0xff] %vm718_vm2, %v1087_v37  ;;  %p1797_p3 = por %p1796_p2, %p1795_p1 }
 0x86d   :  { %p1798_p4 = pnand %p1797_p3, %p1791_p0 }
 0x86e   :  { %v1208_v38 = vpop.f32.mrb[20].mxu0 }
 0x86f   :  { %v1632_v39 = vpop.f32.mrb[21].mxu0 }
 0x870   :  { %v1211_v40 = vpop.f32.mrb[22].mxu0 }
 0x871   :  { %v1215_v41 = vpack.c.bf16 %v1211_v40, %v1208_v38  ;;  %v1633_v42 = vpop.f32.mrb[23].mxu0  ;;  %v1501_v38 = vunpack.c.h.bf16 %v1499_v18 }
 0x873   :  { %1217 = vrot.lane.b32.xlu1 %v1215_v41, %s1818_s7  ;;  %v1504_v41 = vunpack.c.l.bf16 %v1507_v34 }
 0x8d5   :  { %v967_v43 = vpop.permute.xlu1 %966 }
 0x8d6   :  { %970 = vst.msk [vmem:[#allocation2] sm:$0xff] %vm969_vm4, %v967_v43 }
 0x8dd   :  { %v1221_v44 = vld [vmem:[#allocation2] sm:$0xff] }
 0x8de   :  { %1650 = vmatprep.mubr.bf16.mxu1 %v1221_v44 }
 0x8e5   :  { %v1218_v45 = vpop.permute.xlu1 %1217 }
 0x8e6   :  { %1220 = vst.msk [vmem:[#allocation2 + $0x8] sm:$0xff] %vm969_vm4, %v1218_v45 }
 0x8ed   :  { %v1222_v46 = vld [vmem:[#allocation2 + $0x8] sm:$0xff] }
 0x8ee   :  { %1651 = vmatmul.mubr.bf16.vlgmr.msra.gmra.mrb[24].mxu1 %v1222_v46 }
 0x9c1   :  { %v1652_v47 = vpop.f32.mrb[24].mxu1 }
 0x9c2   :  { %v1311_v48 = vpop.f32.mrb[25].mxu1  ;;  %v1320_v54 = vadd.f32 %v1652_v47, %v1479_v25  ;;  %v1505_v47 = vunpack.c.h.bf16 %v1507_v34 }
 0x9c3   :  { %v1312_v49 = vadd.f32 %v1479_v25, %v1311_v48  ;;  %v1653_v50 = vpop.f32.mrb[26].mxu1 }
 0x9c4   :  { %v1314_v51 = vpop.f32.mrb[27].mxu1  ;;  %v1323_v58 = vadd.f32 %v1653_v50, %v1479_v25  ;;  %v1330_v59 = vadd.f32 %v1320_v54, %v2094_v52 }
 0x9c5   :  { %v1315_v55 = vadd.f32 %v1479_v25, %v1314_v51  ;;  %v1328_v56 = vadd.f32 %v1312_v49, %v2076_v20 }
 0x9c6   :  { %v1331_v60 = vadd.f32 %v1323_v58, %v2096_v53 }
 0x9c7   :  { %1332 = vadd.xlane.f32.xlu0 %v1328_v56  ;;  %v1329_v57 = vadd.f32 %v1315_v55, %v2078_v21 }
 0x9c9   :  { %1334 = vadd.xlane.f32.xlu1 %v1329_v57 }
 0x9cb   :  { %1336 = vadd.xlane.f32.xlu0 %v1330_v59 }
 0x9cf   :  { %1338 = vadd.xlane.f32.xlu0 %v1331_v60 }
 0xa54   :  { %v1333_v61 = vpop.xlane.xlu0 %1332 }
 0xa55   :  { %v1340_v62 = vmul.f32 0.0078125, %v1333_v61 }
 0xa56   :  { %v1335_v63 = vpop.xlane.xlu1 %1334 }
 0xa57   :  { %v1344_v0 = vsub.f32 %v1328_v56, %v1340_v62  ;;  %v1341_v1 = vmul.f32 0.0078125, %v1335_v63 }
 0xa58   :  { %v1337_v2 = vpop.xlane.xlu0 %1336 }
 0xa59   :  { %v1345_v3 = vsub.f32 %v1329_v57, %v1341_v1  ;;  %v1342_v4 = vmul.f32 0.0078125, %v1337_v2  ;;  %v1348_v20 = vmul.f32 %v1344_v0, %v1344_v0 }
 0xa5b   :  { %v1346_v29 = vsub.f32 %v1330_v59, %v1342_v4  ;;  %1352 = vadd.xlane.f32.xlu0 %v1348_v20  ;;  %v1349_v21 = vmul.f32 %v1345_v3, %v1345_v3 }
 0xa5c   :  { %v1339_v26 = vpop.xlane.xlu0 %1338 }
 0xa5d   :  { %v1343_v30 = vmul.f32 0.0078125, %v1339_v26  ;;  %1354 = vadd.xlane.f32.xlu1 %v1349_v21  ;;  %v1350_v52 = vmul.f32 %v1346_v29, %v1346_v29 }
 0xa5f   :  { %v1347_v5 = vsub.f32 %v1331_v60, %v1343_v30  ;;  %1356 = vadd.xlane.f32.xlu0 %v1350_v52 }
 0xa61   :  { %v1351_v53 = vmul.f32 %v1347_v5, %v1347_v5 }
 0xa63   :  { %1358 = vadd.xlane.f32.xlu1 %v1351_v53 }
 0xae8   :  { %v1353_v6 = vpop.xlane.xlu0 %1352 }
 0xae9   :  { %v1360_v7 = vmul.f32 0.0078125, %v1353_v6 }
 0xaea   :  { %v1355_v8 = vpop.xlane.xlu1 %1354 }
 0xaeb   :  { %v1364_v9 = vadd.f32 1e-12, %v1360_v7  ;;  %v1361_v10 = vmul.f32 0.0078125, %v1355_v8 }
 0xaec   :  { %v1357_v11 = vpop.xlane.xlu0 %1356 }
 0xaed   :  { %1782 = vrsqrt.f32 %v1364_v9  ;;  %v1365_v12 = vadd.f32 1e-12, %v1361_v10  ;;  %v1362_v24 = vmul.f32 0.0078125, %v1357_v11 }
 0xaef   :  { %1784 = vrsqrt.f32 %v1365_v12  ;;  %v1366_v13 = vadd.f32 1e-12, %v1362_v24 }
 0xaf0   :  { %v1359_v14 = vpop.xlane.xlu1 %1358 }
 0xaf1   :  { %1786 = vrsqrt.f32 %v1366_v13  ;;  %v1363_v31 = vmul.f32 0.0078125, %v1359_v14 }
 0xaf3   :  { %v1367_v15 = vadd.f32 1e-12, %v1363_v31 }
 0xaf5   :  { %1788 = vrsqrt.f32 %v1367_v15 }
 0xaf7   :  { %v1783_v16 = vpop.eup %1782 }
 0xaf8   :  { %v1372_v19 = vmul.f32 %v1783_v16, %v1344_v0 }
 0xaf9   :  { %v1785_v22 = vpop.eup %1784 }
 0xafa   :  { %v1382_v27 = vmul.f32 %v1488_v17, %v1372_v19  ;;  %v1373_v28 = vmul.f32 %v1785_v22, %v1345_v3 }
 0xafb   :  { %v1787_v33 = vpop.eup %1786 }
 0xafc   :  { %v1392_v36 = vadd.f32 %v1489_v23, %v1382_v27  ;;  %v1383_v37 = vmul.f32 %v1488_v17, %v1373_v28  ;;  %v1374_v35 = vmul.f32 %v1787_v33, %v1346_v29 }
 0xafe   :  { %v1393_v39 = vadd.f32 %v1489_v23, %v1383_v37  ;;  %v1384_v40 = vmul.f32 %v1488_v17, %v1374_v35  ;;  %v1404_v42 = vadd.f32 %v1500_v32, %v1392_v36 }
 0xaff   :  { %v1789_v43 = vpop.eup %1788 }
 0xb00   :  { %v1394_v44 = vadd.f32 %v1489_v23, %v1384_v40  ;;  %v1375_v45 = vmul.f32 %v1789_v43, %v1347_v5  ;;  %v1405_v46 = vadd.f32 %v1501_v38, %v1393_v39  ;;  %1408 = vst [vmem:[#allocation3] sm:$0xff] %v1404_v42 }
 0xb02   :  { %v1385_v25 = vmul.f32 %v1488_v17, %v1375_v45  ;;  %v1406_v48 = vadd.f32 %v1504_v41, %v1394_v44  ;;  %1409 = vst [vmem:[#allocation3 + $0x8] sm:$0xff] %v1405_v46 }
 0xb04   :  { %v1395_v49 = vadd.f32 %v1489_v23, %v1385_v25  ;;  %1410 = vst [vmem:[#allocation3 + $0x10] sm:$0xff] %v1406_v48 }
 0xb06   :  { %v1407_v50 = vadd.f32 %v1505_v47, %v1395_v49 }
 0xb08   :  { %1411 = vst [vmem:[#allocation3 + $0x18] sm:$0xff] %v1407_v50 }
 0xb09   :  { %1801 = shalt.err (!%p1798_p4)
}
 0xb0a   :  { %s1802_s22 = scalar_lea.hbm %s2242_s13, 512 }
 0xb0b   :  { %p1803_p5 = scmp.ne.s32.totalorder %s2242_s13, %s1802_s22  ;;  %p1806_p6 = scmp.lt.u32.totalorder %s1802_s22, %s2242_s13 }
 0xb0d   :  { %p1808_p7 = pnand %p1806_p6, %p1803_p5 }
 0xb0f   :  { %1811 = shalt.err (!%p1808_p7)
}
 0xb10   :  { %s1820_s4 = smov 128   ;;  %s1821_s5 = smov 8  }
 0xb11   :  { %1423 = dma.vmem_to_hbm [thread:$0]  %s1418_s11, 512, %s2242_s13, [#allocation4], %s1820_s4, %s1820_s4, %s1821_s5  }
 0xb12   :  { %1812 = dma.done.wait [#allocation4], 512  }
 0xb13   :  { %1813 = vsyncadd [#allocation4], 4294966784 }
 0xb14   :  { %1427 = vsyncpa [#allocation4], 1 }

</bundles_post_ra>
